<compile_context>
chip_gen: v7x
topology: tpu7x:2x2x1
jax: 0.10.0
libtpu: 0.0.40
codegen_flags: <defaults>
</compile_context>

<pallas_src>
import jax
import jax.numpy as jnp
from jax.experimental import pallas as pl
from jax.experimental.pallas import tpu as pltpu

# -------------------- problem sizes (small, consistent with the module) ----
B = 2           # batch
S_TGT = 8       # target sequence length
S_SRC = 8       # source (memory) sequence length
D = 32          # d_model
H = 4           # attention heads
DK = D // H     # per-head dim
DFF = 64        # feed-forward hidden dim
VOCAB = 128     # vocab size (lane-dense output)
N_LAYERS = 2    # decoder layers
EPS = 1e-6

# packed parameter-vector slab layout: 13 rows per layer + 3 trailing rows
VEC_ROWS = ((13 * N_LAYERS + 3 + 7) // 8) * 8     # pad rows to sublane multiple
VEC_W = 128                                       # >= max(3D, 2D, DFF, VOCAB)
assert max(3 * D, 2 * D, DFF, VOCAB) <= VEC_W


# ============================== kernel =====================================
def decoder_kernel(x_ref, mem_ref, src_mask_ref, tgt_mask_ref, vec_ref, *rest):
    o_ref = rest[-1]          # single output
    mats = rest[:-1]          # 7 weight matrices per layer + final projection

    x = x_ref[...].astype(jnp.float32).reshape(B * S_TGT, D)
    mem = mem_ref[...].astype(jnp.float32).reshape(B * S_SRC, D)

    # Mask -> additive bias, computed ONCE and expanded to the (H*B) group axis
    # used by the batched attention contractions (hoisted out of layers/heads).
    neg_tgt = jnp.where(tgt_mask_ref[...] == 0, jnp.float32(-1e9), jnp.float32(0.0))  # (B,St,St)
    neg_src = jnp.where(src_mask_ref[...] == 0, jnp.float32(-1e9), jnp.float32(0.0))  # (B,1,Ss)
    tgt_bias = jnp.concatenate([neg_tgt] * H, axis=0)   # (H*B, St, St), g = h*B + b
    src_bias = jnp.concatenate([neg_src] * H, axis=0)   # (H*B, 1,  Ss)

    def vec(row, width):
        # static slice of the packed parameter slab -> (1, width)
        return vec_ref[row:row + 1, 0:width]

    def layer_norm(v, a, b):
        # torch: a * (x - mean) / (std_unbiased + eps) + b
        mean = jnp.mean(v, axis=-1, keepdims=True)
        var = jnp.sum((v - mean) ** 2, axis=-1, keepdims=True) / (v.shape[-1] - 1)
        return a * (v - mean) / (jnp.sqrt(var) + EPS) + b

    def split_heads(t2d, s):
        # (B*s, H*DK) -> (H*B, s, DK); group index g = h*B + b
        t = t2d.reshape(B, s, D)
        return jnp.concatenate([t[:, :, h * DK:(h + 1) * DK] for h in range(H)], axis=0)

    def merge_heads(tg, s):
        # (H*B, s, DK) -> (B*s, H*DK)
        return jnp.concatenate([tg[h * B:(h + 1) * B] for h in range(H)],
                               axis=-1).reshape(B * s, D)

    def attention(q_g, k_g, v_g, bias_g):
        # one batched contraction over the (H*B) group axis instead of a head loop
        s = jnp.einsum('gqd,gkd->gqk', q_g, k_g,
                       preferred_element_type=jnp.float32) + bias_g
        m = jnp.max(s, axis=-1, keepdims=True)
        e = jnp.exp(s - m)
        p = e * pl.reciprocal(jnp.sum(e, axis=-1, keepdims=True), approx=True)
        return jnp.einsum('gqk,gkd->gqd', p, v_g,
                          preferred_element_type=jnp.float32)

    for l in range(N_LAYERS):        # static unroll, N_LAYERS is tiny
        wqkv_s, wo_s, wq_c, wkv_c, wo_c, w1, w2 = mats[7 * l: 7 * l + 7]
        r = 13 * l

        # --- sublayer 0: masked self-attention (fused QKV, scale folded in Wq) ---
        ln1 = layer_norm(x, vec(r + 0, D), vec(r + 1, D))
        qkv = jnp.dot(ln1, wqkv_s[...],
                      preferred_element_type=jnp.float32) + vec(r + 2, 3 * D)
        a = attention(split_heads(qkv[:, 0:D], S_TGT),
                      split_heads(qkv[:, D:2 * D], S_TGT),
                      split_heads(qkv[:, 2 * D:3 * D], S_TGT),
                      tgt_bias)
        x = x + jnp.dot(merge_heads(a, S_TGT), wo_s[...],
                        preferred_element_type=jnp.float32) + vec(r + 3, D)

        # --- sublayer 1: source attention over memory (fused KV) ---
        ln2 = layer_norm(x, vec(r + 4, D), vec(r + 5, D))
        q = jnp.dot(ln2, wq_c[...],
                    preferred_element_type=jnp.float32) + vec(r + 6, D)
        kv = jnp.dot(mem, wkv_c[...],
                     preferred_element_type=jnp.float32) + vec(r + 7, 2 * D)
        a = attention(split_heads(q, S_TGT),
                      split_heads(kv[:, 0:D], S_SRC),
                      split_heads(kv[:, D:2 * D], S_SRC),
                      src_bias)
        x = x + jnp.dot(merge_heads(a, S_TGT), wo_c[...],
                        preferred_element_type=jnp.float32) + vec(r + 8, D)

        # --- sublayer 2: position-wise feed-forward ---
        ln3 = layer_norm(x, vec(r + 9, D), vec(r + 10, D))
        hid = jnp.maximum(jnp.dot(ln3, w1[...],
                                  preferred_element_type=jnp.float32) + vec(r + 11, DFF), 0.0)
        x = x + jnp.dot(hid, w2[...],
                        preferred_element_type=jnp.float32) + vec(r + 12, D)

    # --- final LayerNorm + vocab projection + log-softmax (lane-dense, V=128) ---
    rf = 13 * N_LAYERS
    xn = layer_norm(x, vec(rf + 0, D), vec(rf + 1, D))
    logits = jnp.dot(xn, mats[-1][...],
                     preferred_element_type=jnp.float32) + vec(rf + 2, VOCAB)
    m = jnp.max(logits, axis=-1, keepdims=True)
    z = logits - m
    lse = jnp.log(jnp.sum(jnp.exp(z), axis=-1, keepdims=True))
    o_ref[...] = (z - lse).reshape(B, S_TGT, VOCAB).astype(o_ref.dtype)


# ============================== wrapper ====================================
def decoder_forward(x, memory, src_mask, tgt_mask, vec_slab, mats,
                    src=None, posmask=None):
    # TODO(synk): pointer_gen branch (scatter_add_ of attention weights over the
    # vocab + sigmoid gate) and the posmask multiply are not implemented; this is
    # the pointer_gen=False / posmask=None path of Decoder.forward.
    del src, posmask
    vmem = pl.BlockSpec(memory_space=pltpu.MemorySpace.VMEM)
    dec_logsm = pl.pallas_call(
        decoder_kernel,
        out_shape=jax.ShapeDtypeStruct((B, S_TGT, VOCAB), jnp.float32),
        in_specs=[vmem] * (5 + len(mats)),
        out_specs=vmem,
    )(x, memory, src_mask, tgt_mask, vec_slab, *mats)
    return dec_logsm, jnp.zeros((1, 1), jnp.float32)


# ============================ parameters ===================================
def _linear(key, out_f, in_f, scale=0.1):
    kw, kb = jax.random.split(key)
    return (jax.random.normal(kw, (out_f, in_f), jnp.float32) * scale,
            jax.random.normal(kb, (out_f,), jnp.float32) * scale)


def _ln(key):
    k1, k2 = jax.random.split(key)
    return (1.0 + 0.1 * jax.random.normal(k1, (D,), jnp.float32),
            0.1 * jax.random.normal(k2, (D,), jnp.float32))


def _attn(key):
    ks = jax.random.split(key, 4)
    wq, bq = _linear(ks[0], D, D)
    wk, bk = _linear(ks[1], D, D)
    wv, bv = _linear(ks[2], D, D)
    wo, bo = _linear(ks[3], D, D)
    return (wq, bq, wk, bk, wv, bv, wo, bo)


def make_params(key):
    """Raw torch-Linear-style parameters (weights are (out, in), y = x @ W.T + b)."""
    keys = jax.random.split(key, N_LAYERS + 2)
    layers = []
    for l in range(N_LAYERS):
        ks = jax.random.split(keys[l], 7)
        w1, b1 = _linear(ks[5], DFF, D)
        w2, b2 = _linear(ks[6], D, DFF)
        layers.append(dict(ln1=_ln(ks[0]), self_attn=_attn(ks[1]),
                           ln2=_ln(ks[2]), src_attn=_attn(ks[3]),
                           ln3=_ln(ks[4]), ffn=(w1, b1, w2, b2)))
    return dict(layers=layers, norm=_ln(keys[N_LAYERS]),
                proj=_linear(keys[N_LAYERS + 1], VOCAB, D))


def pack_params(params):
    """Pack for the kernel: fused/pre-transposed matrices + one (32,128) vector slab.
    The 1/sqrt(d_k) attention scale is folded into Wq / bq here."""
    scale = DK ** -0.5
    slab = jnp.zeros((VEC_ROWS, VEC_W), jnp.float32)
    mats = []

    def setrow(s, r, v):
        v = jnp.asarray(v, jnp.float32).reshape(-1)
        return s.at[r, :v.shape[0]].set(v)

    for l, lp in enumerate(params['layers']):
        r = 13 * l
        a1, c1 = lp['ln1']
        wq, bq, wk, bk, wv, bv, wo, bo = lp['self_attn']
        slab = setrow(slab, r + 0, a1)
        slab = setrow(slab, r + 1, c1)
        slab = setrow(slab, r + 2, jnp.concatenate([bq * scale, bk, bv]))
        slab = setrow(slab, r + 3, bo)
        mats += [jnp.concatenate([wq.T * scale, wk.T, wv.T], axis=1), wo.T]

        a2, c2 = lp['ln2']
        cwq, cbq, cwk, cbk, cwv, cbv, cwo, cbo = lp['src_attn']
        slab = setrow(slab, r + 4, a2)
        slab = setrow(slab, r + 5, c2)
        slab = setrow(slab, r + 6, cbq * scale)
        slab = setrow(slab, r + 7, jnp.concatenate([cbk, cbv]))
        slab = setrow(slab, r + 8, cbo)
        mats += [cwq.T * scale, jnp.concatenate([cwk.T, cwv.T], axis=1), cwo.T]

        a3, c3 = lp['ln3']
        w1, b1, w2, b2 = lp['ffn']
        slab = setrow(slab, r + 9, a3)
        slab = setrow(slab, r + 10, c3)
        slab = setrow(slab, r + 11, b1)
        slab = setrow(slab, r + 12, b2)
        mats += [w1.T, w2.T]

    rf = 13 * N_LAYERS
    af, cf = params['norm']
    wp, bp = params['proj']
    slab = setrow(slab, rf + 0, af)
    slab = setrow(slab, rf + 1, cf)
    slab = setrow(slab, rf + 2, bp)
    mats.append(wp.T)
    return slab, mats


# ============================ pure-JAX reference ===========================
def reference(x, memory, src_mask, tgt_mask, params):
    def layer_norm(v, p):
        a, b = p
        mean = jnp.mean(v, axis=-1, keepdims=True)
        var = jnp.sum((v - mean) ** 2, axis=-1, keepdims=True) / (v.shape[-1] - 1)
        return a * (v - mean) / (jnp.sqrt(var) + EPS) + b

    def mha(q_in, k_in, v_in, mask, p):
        wq, bq, wk, bk, wv, bv, wo, bo = p
        Bq, Sq, _ = q_in.shape
        Sk = k_in.shape[1]
        heads = lambda t, s: t.reshape(Bq, s, H, DK).transpose(0, 2, 1, 3)
        q = heads(q_in @ wq.T + bq, Sq)
        k = heads(k_in @ wk.T + bk, Sk)
        v = heads(v_in @ wv.T + bv, Sk)
        scores = jnp.einsum('bhqd,bhkd->bhqk', q, k) / jnp.sqrt(jnp.float32(DK))
        scores = jnp.where(mask[:, None] == 0, jnp.float32(-1e9), scores)
        p_attn = jax.nn.softmax(scores, axis=-1)
        o = jnp.einsum('bhqk,bhkd->bhqd', p_attn, v)
        return o.transpose(0, 2, 1, 3).reshape(Bq, Sq, D) @ wo.T + bo

    for lp in params['layers']:
        h = layer_norm(x, lp['ln1'])
        x = x + mha(h, h, h, tgt_mask, lp['self_attn'])
        h = layer_norm(x, lp['ln2'])
        x = x + mha(h, memory, memory, src_mask, lp['src_attn'])
        h = layer_norm(x, lp['ln3'])
        w1, b1, w2, b2 = lp['ffn']
        x = x + (jnp.maximum(h @ w1.T + b1, 0.0) @ w2.T + b2)

    xn = layer_norm(x, params['norm'])
    wp, bp = params['proj']
    return jax.nn.log_softmax(xn @ wp.T + bp, axis=-1)


# ================================= main ====================================
if __name__ == "__main__":
    key = jax.random.PRNGKey(0)
    kx, km, ks, kp = jax.random.split(key, 4)

    x = jax.random.normal(kx, (B, S_TGT, D), jnp.float32)
    memory = jax.random.normal(km, (B, S_SRC, D), jnp.float32)

    # source padding mask (B, 1, S_src): 1 = attend, 0 = masked
    src_mask = (jax.random.uniform(ks, (B, 1, S_SRC)) > 0.3).astype(jnp.int32)
    src_mask = src_mask.at[:, :, 0].set(1)           # never a fully-masked row
    # causal target mask (B, S_tgt, S_tgt)
    tgt_mask = jnp.tile(jnp.tril(jnp.ones((S_TGT, S_TGT), jnp.int32))[None], (B, 1, 1))

    params = make_params(kp)
    vec_slab, mats = pack_params(params)

    logp, _extra = decoder_forward(x, memory, src_mask, tgt_mask, vec_slab, mats)
    logp = jax.block_until_ready(logp)

    ref = reference(x, memory, src_mask, tgt_mask, params)
    assert logp.shape == (B, S_TGT, VOCAB)
    err = float(jnp.max(jnp.abs(logp - ref)))
    # tolerance accounts for approx EUP reciprocal in the softmax (perf feedback)
    assert err < 2e-3, f"mismatch vs reference: max |err| = {err}"

    print("KERNEL_OK")
</pallas_src>

<mosaic_0001>
module attributes {stable_mosaic.version = 11 : i64} {
  func.func @decoder_kernel(%arg0: memref<2x8x32xf32, #tpu.memory_space<vmem>>, %arg1: memref<2x8x32xf32, #tpu.memory_space<vmem>>, %arg2: memref<2x1x8xi32, #tpu.memory_space<vmem>>, %arg3: memref<2x8x8xi32, #tpu.memory_space<vmem>>, %arg4: memref<32x128xf32, #tpu.memory_space<vmem>>, %arg5: memref<32x96xf32, #tpu.memory_space<vmem>>, %arg6: memref<32x32xf32, #tpu.memory_space<vmem>>, %arg7: memref<32x32xf32, #tpu.memory_space<vmem>>, %arg8: memref<32x64xf32, #tpu.memory_space<vmem>>, %arg9: memref<32x32xf32, #tpu.memory_space<vmem>>, %arg10: memref<32x64xf32, #tpu.memory_space<vmem>>, %arg11: memref<64x32xf32, #tpu.memory_space<vmem>>, %arg12: memref<32x96xf32, #tpu.memory_space<vmem>>, %arg13: memref<32x32xf32, #tpu.memory_space<vmem>>, %arg14: memref<32x32xf32, #tpu.memory_space<vmem>>, %arg15: memref<32x64xf32, #tpu.memory_space<vmem>>, %arg16: memref<32x32xf32, #tpu.memory_space<vmem>>, %arg17: memref<32x64xf32, #tpu.memory_space<vmem>>, %arg18: memref<64x32xf32, #tpu.memory_space<vmem>>, %arg19: memref<32x128xf32, #tpu.memory_space<vmem>>, %arg20: memref<2x8x128xf32, #tpu.memory_space<vmem>>) attributes {dimension_semantics = [], scalar_prefetch = 0 : i64, scratch_operands = 0 : i64, tpu.core_type = #tpu.core_type<tc>} {
    %c0 = arith.constant 0 : index
    %c0_0 = arith.constant 0 : index
    %c0_1 = arith.constant 0 : index
    %0 = vector.load %arg0[%c0, %c0_0, %c0_1] : memref<2x8x32xf32, #tpu.memory_space<vmem>>, vector<2x8x32xf32>
    %1 = vector.shape_cast %0 : vector<2x8x32xf32> to vector<16x32xf32>
    %c0_2 = arith.constant 0 : index
    %c0_3 = arith.constant 0 : index
    %c0_4 = arith.constant 0 : index
    %2 = vector.load %arg1[%c0_2, %c0_3, %c0_4] : memref<2x8x32xf32, #tpu.memory_space<vmem>>, vector<2x8x32xf32>
    %3 = vector.shape_cast %2 : vector<2x8x32xf32> to vector<16x32xf32>
    %c0_5 = arith.constant 0 : index
    %c0_6 = arith.constant 0 : index
    %c0_7 = arith.constant 0 : index
    %4 = vector.load %arg3[%c0_5, %c0_6, %c0_7] : memref<2x8x8xi32, #tpu.memory_space<vmem>>, vector<2x8x8xi32>
    %c0_i32 = arith.constant 0 : i32
    %5 = vector.broadcast %c0_i32 : i32 to vector<2x8x8xi32>
    %6 = arith.cmpi eq, %4, %5 : vector<2x8x8xi32>
    %cst = arith.constant -1.000000e+09 : f32
    %cst_8 = arith.constant 0.000000e+00 : f32
    %7 = vector.broadcast %cst : f32 to vector<2x8x8xf32>
    %8 = vector.broadcast %cst_8 : f32 to vector<2x8x8xf32>
    %9 = arith.select %6, %7, %8 : vector<2x8x8xi1>, vector<2x8x8xf32>
    %c0_9 = arith.constant 0 : index
    %c0_10 = arith.constant 0 : index
    %c0_11 = arith.constant 0 : index
    %10 = vector.load %arg2[%c0_9, %c0_10, %c0_11] : memref<2x1x8xi32, #tpu.memory_space<vmem>>, vector<2x1x8xi32>
    %c0_i32_12 = arith.constant 0 : i32
    %11 = vector.broadcast %c0_i32_12 : i32 to vector<2x1x8xi32>
    %12 = arith.cmpi eq, %10, %11 : vector<2x1x8xi32>
    %cst_13 = arith.constant -1.000000e+09 : f32
    %cst_14 = arith.constant 0.000000e+00 : f32
    %13 = vector.broadcast %cst_13 : f32 to vector<2x1x8xf32>
    %14 = vector.broadcast %cst_14 : f32 to vector<2x1x8xf32>
    %15 = arith.select %12, %13, %14 : vector<2x1x8xi1>, vector<2x1x8xf32>
    %16 = tpu.concatenate %9, %9, %9, %9 in 0 : vector<2x8x8xf32>, vector<2x8x8xf32>, vector<2x8x8xf32>, vector<2x8x8xf32> -> vector<8x8x8xf32>
    %17 = tpu.concatenate %15, %15, %15, %15 in 0 : vector<2x1x8xf32>, vector<2x1x8xf32>, vector<2x1x8xf32>, vector<2x1x8xf32> -> vector<8x1x8xf32>
    %c0_15 = arith.constant 0 : index
    %c0_16 = arith.constant 0 : index
    %18 = vector.load %arg4[%c0_15, %c0_16] : memref<32x128xf32, #tpu.memory_space<vmem>>, vector<1x32xf32>
    %c1 = arith.constant 1 : index
    %c0_17 = arith.constant 0 : index
    %19 = vector.load %arg4[%c1, %c0_17] : memref<32x128xf32, #tpu.memory_space<vmem>>, vector<1x32xf32>
    %cst_18 = arith.constant dense<0.000000e+00> : vector<16xf32>
    %20 = vector.multi_reduction <add>, %1, %cst_18 [1] : vector<16x32xf32> to vector<16xf32>
    %21 = vector.shape_cast %20 : vector<16xf32> to vector<16x1xf32>
    %cst_19 = arith.constant 3.200000e+01 : f32
    %22 = vector.broadcast %cst_19 : f32 to vector<16x1xf32>
    %23 = arith.divf %21, %22 : vector<16x1xf32>
    %24 = vector.broadcast %23 : vector<16x1xf32> to vector<16x32xf32>
    %25 = arith.subf %1, %24 : vector<16x32xf32>
    %26 = arith.mulf %25, %25 : vector<16x32xf32>
    %cst_20 = arith.constant dense<0.000000e+00> : vector<16xf32>
    %27 = vector.multi_reduction <add>, %26, %cst_20 [1] : vector<16x32xf32> to vector<16xf32>
    %28 = vector.shape_cast %27 : vector<16xf32> to vector<16x1xf32>
    %cst_21 = arith.constant 3.100000e+01 : f32
    %29 = vector.broadcast %cst_21 : f32 to vector<16x1xf32>
    %30 = arith.divf %28, %29 : vector<16x1xf32>
    %31 = vector.broadcast %23 : vector<16x1xf32> to vector<16x32xf32>
    %32 = arith.subf %1, %31 : vector<16x32xf32>
    %33 = vector.broadcast %18 : vector<1x32xf32> to vector<16x32xf32>
    %34 = arith.mulf %33, %32 : vector<16x32xf32>
    %35 = math.sqrt %30 : vector<16x1xf32>
    %cst_22 = arith.constant 9.99999997E-7 : f32
    %36 = vector.broadcast %cst_22 : f32 to vector<16x1xf32>
    %37 = arith.addf %35, %36 : vector<16x1xf32>
    %38 = vector.broadcast %37 : vector<16x1xf32> to vector<16x32xf32>
    %39 = arith.divf %34, %38 : vector<16x32xf32>
    %40 = vector.broadcast %19 : vector<1x32xf32> to vector<16x32xf32>
    %41 = arith.addf %39, %40 : vector<16x32xf32>
    %c0_23 = arith.constant 0 : index
    %c0_24 = arith.constant 0 : index
    %42 = vector.load %arg5[%c0_23, %c0_24] : memref<32x96xf32, #tpu.memory_space<vmem>>, vector<32x96xf32>
    %cst_25 = arith.constant dense<0.000000e+00> : vector<16x96xf32>
    %43 = tpu.matmul %41, %42, %cst_25 {dimension_numbers = #tpu.dot_dimension_numbers<[1], [0], [0], [1], [0, 0, 1, 1], [], []>} : vector<16x32xf32>, vector<32x96xf32>, vector<16x96xf32> -> vector<16x96xf32>
    %c2 = arith.constant 2 : index
    %c0_26 = arith.constant 0 : index
    %44 = vector.load %arg4[%c2, %c0_26] : memref<32x128xf32, #tpu.memory_space<vmem>>, vector<1x96xf32>
    %45 = vector.broadcast %44 : vector<1x96xf32> to vector<16x96xf32>
    %46 = arith.addf %43, %45 : vector<16x96xf32>
    %47 = vector.extract_strided_slice %46 {offsets = [0, 0], sizes = [16, 32], strides = [1, 1]} : vector<16x96xf32> to vector<16x32xf32>
    %48 = vector.shape_cast %47 : vector<16x32xf32> to vector<2x8x32xf32>
    %49 = vector.extract_strided_slice %48 {offsets = [0, 0, 0], sizes = [2, 8, 8], strides = [1, 1, 1]} : vector<2x8x32xf32> to vector<2x8x8xf32>
    %50 = vector.extract_strided_slice %48 {offsets = [0, 0, 8], sizes = [2, 8, 8], strides = [1, 1, 1]} : vector<2x8x32xf32> to vector<2x8x8xf32>
    %51 = vector.extract_strided_slice %48 {offsets = [0, 0, 16], sizes = [2, 8, 8], strides = [1, 1, 1]} : vector<2x8x32xf32> to vector<2x8x8xf32>
    %52 = vector.extract_strided_slice %48 {offsets = [0, 0, 24], sizes = [2, 8, 8], strides = [1, 1, 1]} : vector<2x8x32xf32> to vector<2x8x8xf32>
    %53 = tpu.concatenate %49, %50, %51, %52 in 0 : vector<2x8x8xf32>, vector<2x8x8xf32>, vector<2x8x8xf32>, vector<2x8x8xf32> -> vector<8x8x8xf32>
    %54 = vector.extract_strided_slice %46 {offsets = [0, 32], sizes = [16, 32], strides = [1, 1]} : vector<16x96xf32> to vector<16x32xf32>
    %55 = vector.shape_cast %54 : vector<16x32xf32> to vector<2x8x32xf32>
    %56 = vector.extract_strided_slice %55 {offsets = [0, 0, 0], sizes = [2, 8, 8], strides = [1, 1, 1]} : vector<2x8x32xf32> to vector<2x8x8xf32>
    %57 = vector.extract_strided_slice %55 {offsets = [0, 0, 8], sizes = [2, 8, 8], strides = [1, 1, 1]} : vector<2x8x32xf32> to vector<2x8x8xf32>
    %58 = vector.extract_strided_slice %55 {offsets = [0, 0, 16], sizes = [2, 8, 8], strides = [1, 1, 1]} : vector<2x8x32xf32> to vector<2x8x8xf32>
    %59 = vector.extract_strided_slice %55 {offsets = [0, 0, 24], sizes = [2, 8, 8], strides = [1, 1, 1]} : vector<2x8x32xf32> to vector<2x8x8xf32>
    %60 = tpu.concatenate %56, %57, %58, %59 in 0 : vector<2x8x8xf32>, vector<2x8x8xf32>, vector<2x8x8xf32>, vector<2x8x8xf32> -> vector<8x8x8xf32>
    %61 = vector.extract_strided_slice %46 {offsets = [0, 64], sizes = [16, 32], strides = [1, 1]} : vector<16x96xf32> to vector<16x32xf32>
    %62 = vector.shape_cast %61 : vector<16x32xf32> to vector<2x8x32xf32>
    %63 = vector.extract_strided_slice %62 {offsets = [0, 0, 0], sizes = [2, 8, 8], strides = [1, 1, 1]} : vector<2x8x32xf32> to vector<2x8x8xf32>
    %64 = vector.extract_strided_slice %62 {offsets = [0, 0, 8], sizes = [2, 8, 8], strides = [1, 1, 1]} : vector<2x8x32xf32> to vector<2x8x8xf32>
    %65 = vector.extract_strided_slice %62 {offsets = [0, 0, 16], sizes = [2, 8, 8], strides = [1, 1, 1]} : vector<2x8x32xf32> to vector<2x8x8xf32>
    %66 = vector.extract_strided_slice %62 {offsets = [0, 0, 24], sizes = [2, 8, 8], strides = [1, 1, 1]} : vector<2x8x32xf32> to vector<2x8x8xf32>
    %67 = tpu.concatenate %63, %64, %65, %66 in 0 : vector<2x8x8xf32>, vector<2x8x8xf32>, vector<2x8x8xf32>, vector<2x8x8xf32> -> vector<8x8x8xf32>
    "tpu.trace_start"() <{level = 10 : i32, message = "gqd,gkd->gqk"}> : () -> ()
    %cst_27 = arith.constant dense<0.000000e+00> : vector<8x8x8xf32>
    %68 = tpu.matmul %53, %60, %cst_27 {dimension_numbers = #tpu.dot_dimension_numbers<[2], [2], [1], [1], [0, 0, 0, 1, 1, 1], [0], [0]>} : vector<8x8x8xf32>, vector<8x8x8xf32>, vector<8x8x8xf32> -> vector<8x8x8xf32>
    "tpu.trace_stop"() : () -> ()
    %69 = arith.addf %68, %16 : vector<8x8x8xf32>
    %cst_28 = arith.constant dense<0xFF800000> : vector<8x8xf32>
    %70 = vector.multi_reduction <maximumf>, %69, %cst_28 [2] : vector<8x8x8xf32> to vector<8x8xf32>
    %71 = vector.shape_cast %70 : vector<8x8xf32> to vector<8x8x1xf32>
    %72 = vector.broadcast %71 : vector<8x8x1xf32> to vector<8x8x8xf32>
    %73 = arith.subf %69, %72 : vector<8x8x8xf32>
    %74 = math.exp %73 : vector<8x8x8xf32>
    %cst_29 = arith.constant dense<0.000000e+00> : vector<8x8xf32>
    %75 = vector.multi_reduction <add>, %74, %cst_29 [2] : vector<8x8x8xf32> to vector<8x8xf32>
    %76 = vector.shape_cast %75 : vector<8x8xf32> to vector<8x8x1xf32>
    %77 = tpu.reciprocal %76 {approx = true} : vector<8x8x1xf32> -> vector<8x8x1xf32>
    %78 = vector.broadcast %77 : vector<8x8x1xf32> to vector<8x8x8xf32>
    %79 = arith.mulf %74, %78 : vector<8x8x8xf32>
    "tpu.trace_start"() <{level = 10 : i32, message = "gqk,gkd->gqd"}> : () -> ()
    %cst_30 = arith.constant dense<0.000000e+00> : vector<8x8x8xf32>
    %80 = tpu.matmul %79, %67, %cst_30 {dimension_numbers = #tpu.dot_dimension_numbers<[2], [1], [1], [2], [0, 0, 0, 1, 1, 2], [0], [0]>} : vector<8x8x8xf32>, vector<8x8x8xf32>, vector<8x8x8xf32> -> vector<8x8x8xf32>
    "tpu.trace_stop"() : () -> ()
    %81 = vector.extract_strided_slice %80 {offsets = [0, 0, 0], sizes = [2, 8, 8], strides = [1, 1, 1]} : vector<8x8x8xf32> to vector<2x8x8xf32>
    %82 = vector.extract_strided_slice %80 {offsets = [2, 0, 0], sizes = [2, 8, 8], strides = [1, 1, 1]} : vector<8x8x8xf32> to vector<2x8x8xf32>
    %83 = vector.extract_strided_slice %80 {offsets = [4, 0, 0], sizes = [2, 8, 8], strides = [1, 1, 1]} : vector<8x8x8xf32> to vector<2x8x8xf32>
    %84 = vector.extract_strided_slice %80 {offsets = [6, 0, 0], sizes = [2, 8, 8], strides = [1, 1, 1]} : vector<8x8x8xf32> to vector<2x8x8xf32>
    %85 = tpu.concatenate %81, %82, %83, %84 in 2 : vector<2x8x8xf32>, vector<2x8x8xf32>, vector<2x8x8xf32>, vector<2x8x8xf32> -> vector<2x8x32xf32>
    %86 = vector.shape_cast %85 : vector<2x8x32xf32> to vector<16x32xf32>
    %c0_31 = arith.constant 0 : index
    %c0_32 = arith.constant 0 : index
    %87 = vector.load %arg6[%c0_31, %c0_32] : memref<32x32xf32, #tpu.memory_space<vmem>>, vector<32x32xf32>
    %cst_33 = arith.constant dense<0.000000e+00> : vector<16x32xf32>
    %88 = tpu.matmul %86, %87, %cst_33 {dimension_numbers = #tpu.dot_dimension_numbers<[1], [0], [0], [1], [0, 0, 1, 1], [], []>} : vector<16x32xf32>, vector<32x32xf32>, vector<16x32xf32> -> vector<16x32xf32>
    %89 = arith.addf %1, %88 : vector<16x32xf32>
    %c3 = arith.constant 3 : index
    %c0_34 = arith.constant 0 : index
    %90 = vector.load %arg4[%c3, %c0_34] : memref<32x128xf32, #tpu.memory_space<vmem>>, vector<1x32xf32>
    %91 = vector.broadcast %90 : vector<1x32xf32> to vector<16x32xf32>
    %92 = arith.addf %89, %91 : vector<16x32xf32>
    %c4 = arith.constant 4 : index
    %c0_35 = arith.constant 0 : index
    %93 = vector.load %arg4[%c4, %c0_35] : memref<32x128xf32, #tpu.memory_space<vmem>>, vector<1x32xf32>
    %c5 = arith.constant 5 : index
    %c0_36 = arith.constant 0 : index
    %94 = vector.load %arg4[%c5, %c0_36] : memref<32x128xf32, #tpu.memory_space<vmem>>, vector<1x32xf32>
    %cst_37 = arith.constant dense<0.000000e+00> : vector<16xf32>
    %95 = vector.multi_reduction <add>, %92, %cst_37 [1] : vector<16x32xf32> to vector<16xf32>
    %96 = vector.shape_cast %95 : vector<16xf32> to vector<16x1xf32>
    %cst_38 = arith.constant 3.200000e+01 : f32
    %97 = vector.broadcast %cst_38 : f32 to vector<16x1xf32>
    %98 = arith.divf %96, %97 : vector<16x1xf32>
    %99 = vector.broadcast %98 : vector<16x1xf32> to vector<16x32xf32>
    %100 = arith.subf %92, %99 : vector<16x32xf32>
    %101 = arith.mulf %100, %100 : vector<16x32xf32>
    %cst_39 = arith.constant dense<0.000000e+00> : vector<16xf32>
    %102 = vector.multi_reduction <add>, %101, %cst_39 [1] : vector<16x32xf32> to vector<16xf32>
    %103 = vector.shape_cast %102 : vector<16xf32> to vector<16x1xf32>
    %cst_40 = arith.constant 3.100000e+01 : f32
    %104 = vector.broadcast %cst_40 : f32 to vector<16x1xf32>
    %105 = arith.divf %103, %104 : vector<16x1xf32>
    %106 = vector.broadcast %98 : vector<16x1xf32> to vector<16x32xf32>
    %107 = arith.subf %92, %106 : vector<16x32xf32>
    %108 = vector.broadcast %93 : vector<1x32xf32> to vector<16x32xf32>
    %109 = arith.mulf %108, %107 : vector<16x32xf32>
    %110 = math.sqrt %105 : vector<16x1xf32>
    %cst_41 = arith.constant 9.99999997E-7 : f32
    %111 = vector.broadcast %cst_41 : f32 to vector<16x1xf32>
    %112 = arith.addf %110, %111 : vector<16x1xf32>
    %113 = vector.broadcast %112 : vector<16x1xf32> to vector<16x32xf32>
    %114 = arith.divf %109, %113 : vector<16x32xf32>
    %115 = vector.broadcast %94 : vector<1x32xf32> to vector<16x32xf32>
    %116 = arith.addf %114, %115 : vector<16x32xf32>
    %c0_42 = arith.constant 0 : index
    %c0_43 = arith.constant 0 : index
    %117 = vector.load %arg7[%c0_42, %c0_43] : memref<32x32xf32, #tpu.memory_space<vmem>>, vector<32x32xf32>
    %cst_44 = arith.constant dense<0.000000e+00> : vector<16x32xf32>
    %118 = tpu.matmul %116, %117, %cst_44 {dimension_numbers = #tpu.dot_dimension_numbers<[1], [0], [0], [1], [0, 0, 1, 1], [], []>} : vector<16x32xf32>, vector<32x32xf32>, vector<16x32xf32> -> vector<16x32xf32>
    %c6 = arith.constant 6 : index
    %c0_45 = arith.constant 0 : index
    %119 = vector.load %arg4[%c6, %c0_45] : memref<32x128xf32, #tpu.memory_space<vmem>>, vector<1x32xf32>
    %120 = vector.broadcast %119 : vector<1x32xf32> to vector<16x32xf32>
    %121 = arith.addf %118, %120 : vector<16x32xf32>
    %c0_46 = arith.constant 0 : index
    %c0_47 = arith.constant 0 : index
    %122 = vector.load %arg8[%c0_46, %c0_47] : memref<32x64xf32, #tpu.memory_space<vmem>>, vector<32x64xf32>
    %cst_48 = arith.constant dense<0.000000e+00> : vector<16x64xf32>
    %123 = tpu.matmul %3, %122, %cst_48 {dimension_numbers = #tpu.dot_dimension_numbers<[1], [0], [0], [1], [0, 0, 1, 1], [], []>} : vector<16x32xf32>, vector<32x64xf32>, vector<16x64xf32> -> vector<16x64xf32>
    %c7 = arith.constant 7 : index
    %c0_49 = arith.constant 0 : index
    %124 = vector.load %arg4[%c7, %c0_49] : memref<32x128xf32, #tpu.memory_space<vmem>>, vector<1x64xf32>
    %125 = vector.broadcast %124 : vector<1x64xf32> to vector<16x64xf32>
    %126 = arith.addf %123, %125 : vector<16x64xf32>
    %127 = vector.shape_cast %121 : vector<16x32xf32> to vector<2x8x32xf32>
    %128 = vector.extract_strided_slice %127 {offsets = [0, 0, 0], sizes = [2, 8, 8], strides = [1, 1, 1]} : vector<2x8x32xf32> to vector<2x8x8xf32>
    %129 = vector.extract_strided_slice %127 {offsets = [0, 0, 8], sizes = [2, 8, 8], strides = [1, 1, 1]} : vector<2x8x32xf32> to vector<2x8x8xf32>
    %130 = vector.extract_strided_slice %127 {offsets = [0, 0, 16], sizes = [2, 8, 8], strides = [1, 1, 1]} : vector<2x8x32xf32> to vector<2x8x8xf32>
    %131 = vector.extract_strided_slice %127 {offsets = [0, 0, 24], sizes = [2, 8, 8], strides = [1, 1, 1]} : vector<2x8x32xf32> to vector<2x8x8xf32>
    %132 = tpu.concatenate %128, %129, %130, %131 in 0 : vector<2x8x8xf32>, vector<2x8x8xf32>, vector<2x8x8xf32>, vector<2x8x8xf32> -> vector<8x8x8xf32>
    %133 = vector.extract_strided_slice %126 {offsets = [0, 0], sizes = [16, 32], strides = [1, 1]} : vector<16x64xf32> to vector<16x32xf32>
    %134 = vector.shape_cast %133 : vector<16x32xf32> to vector<2x8x32xf32>
    %135 = vector.extract_strided_slice %134 {offsets = [0, 0, 0], sizes = [2, 8, 8], strides = [1, 1, 1]} : vector<2x8x32xf32> to vector<2x8x8xf32>
    %136 = vector.extract_strided_slice %134 {offsets = [0, 0, 8], sizes = [2, 8, 8], strides = [1, 1, 1]} : vector<2x8x32xf32> to vector<2x8x8xf32>
    %137 = vector.extract_strided_slice %134 {offsets = [0, 0, 16], sizes = [2, 8, 8], strides = [1, 1, 1]} : vector<2x8x32xf32> to vector<2x8x8xf32>
    %138 = vector.extract_strided_slice %134 {offsets = [0, 0, 24], sizes = [2, 8, 8], strides = [1, 1, 1]} : vector<2x8x32xf32> to vector<2x8x8xf32>
    %139 = tpu.concatenate %135, %136, %137, %138 in 0 : vector<2x8x8xf32>, vector<2x8x8xf32>, vector<2x8x8xf32>, vector<2x8x8xf32> -> vector<8x8x8xf32>
    %140 = vector.extract_strided_slice %126 {offsets = [0, 32], sizes = [16, 32], strides = [1, 1]} : vector<16x64xf32> to vector<16x32xf32>
    %141 = vector.shape_cast %140 : vector<16x32xf32> to vector<2x8x32xf32>
    %142 = vector.extract_strided_slice %141 {offsets = [0, 0, 0], sizes = [2, 8, 8], strides = [1, 1, 1]} : vector<2x8x32xf32> to vector<2x8x8xf32>
    %143 = vector.extract_strided_slice %141 {offsets = [0, 0, 8], sizes = [2, 8, 8], strides = [1, 1, 1]} : vector<2x8x32xf32> to vector<2x8x8xf32>
    %144 = vector.extract_strided_slice %141 {offsets = [0, 0, 16], sizes = [2, 8, 8], strides = [1, 1, 1]} : vector<2x8x32xf32> to vector<2x8x8xf32>
    %145 = vector.extract_strided_slice %141 {offsets = [0, 0, 24], sizes = [2, 8, 8], strides = [1, 1, 1]} : vector<2x8x32xf32> to vector<2x8x8xf32>
    %146 = tpu.concatenate %142, %143, %144, %145 in 0 : vector<2x8x8xf32>, vector<2x8x8xf32>, vector<2x8x8xf32>, vector<2x8x8xf32> -> vector<8x8x8xf32>
    "tpu.trace_start"() <{level = 10 : i32, message = "gqd,gkd->gqk"}> : () -> ()
    %cst_50 = arith.constant dense<0.000000e+00> : vector<8x8x8xf32>
    %147 = tpu.matmul %132, %139, %cst_50 {dimension_numbers = #tpu.dot_dimension_numbers<[2], [2], [1], [1], [0, 0, 0, 1, 1, 1], [0], [0]>} : vector<8x8x8xf32>, vector<8x8x8xf32>, vector<8x8x8xf32> -> vector<8x8x8xf32>
    "tpu.trace_stop"() : () -> ()
    %148 = vector.broadcast %17 : vector<8x1x8xf32> to vector<8x8x8xf32>
    %149 = arith.addf %147, %148 : vector<8x8x8xf32>
    %cst_51 = arith.constant dense<0xFF800000> : vector<8x8xf32>
    %150 = vector.multi_reduction <maximumf>, %149, %cst_51 [2] : vector<8x8x8xf32> to vector<8x8xf32>
    %151 = vector.shape_cast %150 : vector<8x8xf32> to vector<8x8x1xf32>
    %152 = vector.broadcast %151 : vector<8x8x1xf32> to vector<8x8x8xf32>
    %153 = arith.subf %149, %152 : vector<8x8x8xf32>
    %154 = math.exp %153 : vector<8x8x8xf32>
    %cst_52 = arith.constant dense<0.000000e+00> : vector<8x8xf32>
    %155 = vector.multi_reduction <add>, %154, %cst_52 [2] : vector<8x8x8xf32> to vector<8x8xf32>
    %156 = vector.shape_cast %155 : vector<8x8xf32> to vector<8x8x1xf32>
    %157 = tpu.reciprocal %156 {approx = true} : vector<8x8x1xf32> -> vector<8x8x1xf32>
    %158 = vector.broadcast %157 : vector<8x8x1xf32> to vector<8x8x8xf32>
    %159 = arith.mulf %154, %158 : vector<8x8x8xf32>
    "tpu.trace_start"() <{level = 10 : i32, message = "gqk,gkd->gqd"}> : () -> ()
    %cst_53 = arith.constant dense<0.000000e+00> : vector<8x8x8xf32>
    %160 = tpu.matmul %159, %146, %cst_53 {dimension_numbers = #tpu.dot_dimension_numbers<[2], [1], [1], [2], [0, 0, 0, 1, 1, 2], [0], [0]>} : vector<8x8x8xf32>, vector<8x8x8xf32>, vector<8x8x8xf32> -> vector<8x8x8xf32>
    "tpu.trace_stop"() : () -> ()
    %161 = vector.extract_strided_slice %160 {offsets = [0, 0, 0], sizes = [2, 8, 8], strides = [1, 1, 1]} : vector<8x8x8xf32> to vector<2x8x8xf32>
    %162 = vector.extract_strided_slice %160 {offsets = [2, 0, 0], sizes = [2, 8, 8], strides = [1, 1, 1]} : vector<8x8x8xf32> to vector<2x8x8xf32>
    %163 = vector.extract_strided_slice %160 {offsets = [4, 0, 0], sizes = [2, 8, 8], strides = [1, 1, 1]} : vector<8x8x8xf32> to vector<2x8x8xf32>
    %164 = vector.extract_strided_slice %160 {offsets = [6, 0, 0], sizes = [2, 8, 8], strides = [1, 1, 1]} : vector<8x8x8xf32> to vector<2x8x8xf32>
    %165 = tpu.concatenate %161, %162, %163, %164 in 2 : vector<2x8x8xf32>, vector<2x8x8xf32>, vector<2x8x8xf32>, vector<2x8x8xf32> -> vector<2x8x32xf32>
    %166 = vector.shape_cast %165 : vector<2x8x32xf32> to vector<16x32xf32>
    %c0_54 = arith.constant 0 : index
    %c0_55 = arith.constant 0 : index
    %167 = vector.load %arg9[%c0_54, %c0_55] : memref<32x32xf32, #tpu.memory_space<vmem>>, vector<32x32xf32>
    %cst_56 = arith.constant dense<0.000000e+00> : vector<16x32xf32>
    %168 = tpu.matmul %166, %167, %cst_56 {dimension_numbers = #tpu.dot_dimension_numbers<[1], [0], [0], [1], [0, 0, 1, 1], [], []>} : vector<16x32xf32>, vector<32x32xf32>, vector<16x32xf32> -> vector<16x32xf32>
    %169 = arith.addf %92, %168 : vector<16x32xf32>
    %c8 = arith.constant 8 : index
    %c0_57 = arith.constant 0 : index
    %170 = vector.load %arg4[%c8, %c0_57] : memref<32x128xf32, #tpu.memory_space<vmem>>, vector<1x32xf32>
    %171 = vector.broadcast %170 : vector<1x32xf32> to vector<16x32xf32>
    %172 = arith.addf %169, %171 : vector<16x32xf32>
    %c9 = arith.constant 9 : index
    %c0_58 = arith.constant 0 : index
    %173 = vector.load %arg4[%c9, %c0_58] : memref<32x128xf32, #tpu.memory_space<vmem>>, vector<1x32xf32>
    %c10 = arith.constant 10 : index
    %c0_59 = arith.constant 0 : index
    %174 = vector.load %arg4[%c10, %c0_59] : memref<32x128xf32, #tpu.memory_space<vmem>>, vector<1x32xf32>
    %cst_60 = arith.constant dense<0.000000e+00> : vector<16xf32>
    %175 = vector.multi_reduction <add>, %172, %cst_60 [1] : vector<16x32xf32> to vector<16xf32>
    %176 = vector.shape_cast %175 : vector<16xf32> to vector<16x1xf32>
    %cst_61 = arith.constant 3.200000e+01 : f32
    %177 = vector.broadcast %cst_61 : f32 to vector<16x1xf32>
    %178 = arith.divf %176, %177 : vector<16x1xf32>
    %179 = vector.broadcast %178 : vector<16x1xf32> to vector<16x32xf32>
    %180 = arith.subf %172, %179 : vector<16x32xf32>
    %181 = arith.mulf %180, %180 : vector<16x32xf32>
    %cst_62 = arith.constant dense<0.000000e+00> : vector<16xf32>
    %182 = vector.multi_reduction <add>, %181, %cst_62 [1] : vector<16x32xf32> to vector<16xf32>
    %183 = vector.shape_cast %182 : vector<16xf32> to vector<16x1xf32>
    %cst_63 = arith.constant 3.100000e+01 : f32
    %184 = vector.broadcast %cst_63 : f32 to vector<16x1xf32>
    %185 = arith.divf %183, %184 : vector<16x1xf32>
    %186 = vector.broadcast %178 : vector<16x1xf32> to vector<16x32xf32>
    %187 = arith.subf %172, %186 : vector<16x32xf32>
    %188 = vector.broadcast %173 : vector<1x32xf32> to vector<16x32xf32>
    %189 = arith.mulf %188, %187 : vector<16x32xf32>
    %190 = math.sqrt %185 : vector<16x1xf32>
    %cst_64 = arith.constant 9.99999997E-7 : f32
    %191 = vector.broadcast %cst_64 : f32 to vector<16x1xf32>
    %192 = arith.addf %190, %191 : vector<16x1xf32>
    %193 = vector.broadcast %192 : vector<16x1xf32> to vector<16x32xf32>
    %194 = arith.divf %189, %193 : vector<16x32xf32>
    %195 = vector.broadcast %174 : vector<1x32xf32> to vector<16x32xf32>
    %196 = arith.addf %194, %195 : vector<16x32xf32>
    %c0_65 = arith.constant 0 : index
    %c0_66 = arith.constant 0 : index
    %197 = vector.load %arg10[%c0_65, %c0_66] : memref<32x64xf32, #tpu.memory_space<vmem>>, vector<32x64xf32>
    %cst_67 = arith.constant dense<0.000000e+00> : vector<16x64xf32>
    %198 = tpu.matmul %196, %197, %cst_67 {dimension_numbers = #tpu.dot_dimension_numbers<[1], [0], [0], [1], [0, 0, 1, 1], [], []>} : vector<16x32xf32>, vector<32x64xf32>, vector<16x64xf32> -> vector<16x64xf32>
    %c11 = arith.constant 11 : index
    %c0_68 = arith.constant 0 : index
    %199 = vector.load %arg4[%c11, %c0_68] : memref<32x128xf32, #tpu.memory_space<vmem>>, vector<1x64xf32>
    %200 = vector.broadcast %199 : vector<1x64xf32> to vector<16x64xf32>
    %201 = arith.addf %198, %200 : vector<16x64xf32>
    %cst_69 = arith.constant 0.000000e+00 : f32
    %202 = vector.broadcast %cst_69 : f32 to vector<16x64xf32>
    %203 = arith.maximumf %201, %202 : vector<16x64xf32>
    %c0_70 = arith.constant 0 : index
    %c0_71 = arith.constant 0 : index
    %204 = vector.load %arg11[%c0_70, %c0_71] : memref<64x32xf32, #tpu.memory_space<vmem>>, vector<64x32xf32>
    %cst_72 = arith.constant dense<0.000000e+00> : vector<16x32xf32>
    %205 = tpu.matmul %203, %204, %cst_72 {dimension_numbers = #tpu.dot_dimension_numbers<[1], [0], [0], [1], [0, 0, 1, 1], [], []>} : vector<16x64xf32>, vector<64x32xf32>, vector<16x32xf32> -> vector<16x32xf32>
    %206 = arith.addf %172, %205 : vector<16x32xf32>
    %c12 = arith.constant 12 : index
    %c0_73 = arith.constant 0 : index
    %207 = vector.load %arg4[%c12, %c0_73] : memref<32x128xf32, #tpu.memory_space<vmem>>, vector<1x32xf32>
    %208 = vector.broadcast %207 : vector<1x32xf32> to vector<16x32xf32>
    %209 = arith.addf %206, %208 : vector<16x32xf32>
    %c13 = arith.constant 13 : index
    %c0_74 = arith.constant 0 : index
    %210 = vector.load %arg4[%c13, %c0_74] : memref<32x128xf32, #tpu.memory_space<vmem>>, vector<1x32xf32>
    %c14 = arith.constant 14 : index
    %c0_75 = arith.constant 0 : index
    %211 = vector.load %arg4[%c14, %c0_75] : memref<32x128xf32, #tpu.memory_space<vmem>>, vector<1x32xf32>
    %cst_76 = arith.constant dense<0.000000e+00> : vector<16xf32>
    %212 = vector.multi_reduction <add>, %209, %cst_76 [1] : vector<16x32xf32> to vector<16xf32>
    %213 = vector.shape_cast %212 : vector<16xf32> to vector<16x1xf32>
    %cst_77 = arith.constant 3.200000e+01 : f32
    %214 = vector.broadcast %cst_77 : f32 to vector<16x1xf32>
    %215 = arith.divf %213, %214 : vector<16x1xf32>
    %216 = vector.broadcast %215 : vector<16x1xf32> to vector<16x32xf32>
    %217 = arith.subf %209, %216 : vector<16x32xf32>
    %218 = arith.mulf %217, %217 : vector<16x32xf32>
    %cst_78 = arith.constant dense<0.000000e+00> : vector<16xf32>
    %219 = vector.multi_reduction <add>, %218, %cst_78 [1] : vector<16x32xf32> to vector<16xf32>
    %220 = vector.shape_cast %219 : vector<16xf32> to vector<16x1xf32>
    %cst_79 = arith.constant 3.100000e+01 : f32
    %221 = vector.broadcast %cst_79 : f32 to vector<16x1xf32>
    %222 = arith.divf %220, %221 : vector<16x1xf32>
    %223 = vector.broadcast %215 : vector<16x1xf32> to vector<16x32xf32>
    %224 = arith.subf %209, %223 : vector<16x32xf32>
    %225 = vector.broadcast %210 : vector<1x32xf32> to vector<16x32xf32>
    %226 = arith.mulf %225, %224 : vector<16x32xf32>
    %227 = math.sqrt %222 : vector<16x1xf32>
    %cst_80 = arith.constant 9.99999997E-7 : f32
    %228 = vector.broadcast %cst_80 : f32 to vector<16x1xf32>
    %229 = arith.addf %227, %228 : vector<16x1xf32>
    %230 = vector.broadcast %229 : vector<16x1xf32> to vector<16x32xf32>
    %231 = arith.divf %226, %230 : vector<16x32xf32>
    %232 = vector.broadcast %211 : vector<1x32xf32> to vector<16x32xf32>
    %233 = arith.addf %231, %232 : vector<16x32xf32>
    %c0_81 = arith.constant 0 : index
    %c0_82 = arith.constant 0 : index
    %234 = vector.load %arg12[%c0_81, %c0_82] : memref<32x96xf32, #tpu.memory_space<vmem>>, vector<32x96xf32>
    %cst_83 = arith.constant dense<0.000000e+00> : vector<16x96xf32>
    %235 = tpu.matmul %233, %234, %cst_83 {dimension_numbers = #tpu.dot_dimension_numbers<[1], [0], [0], [1], [0, 0, 1, 1], [], []>} : vector<16x32xf32>, vector<32x96xf32>, vector<16x96xf32> -> vector<16x96xf32>
    %c15 = arith.constant 15 : index
    %c0_84 = arith.constant 0 : index
    %236 = vector.load %arg4[%c15, %c0_84] : memref<32x128xf32, #tpu.memory_space<vmem>>, vector<1x96xf32>
    %237 = vector.broadcast %236 : vector<1x96xf32> to vector<16x96xf32>
    %238 = arith.addf %235, %237 : vector<16x96xf32>
    %239 = vector.extract_strided_slice %238 {offsets = [0, 0], sizes = [16, 32], strides = [1, 1]} : vector<16x96xf32> to vector<16x32xf32>
    %240 = vector.shape_cast %239 : vector<16x32xf32> to vector<2x8x32xf32>
    %241 = vector.extract_strided_slice %240 {offsets = [0, 0, 0], sizes = [2, 8, 8], strides = [1, 1, 1]} : vector<2x8x32xf32> to vector<2x8x8xf32>
    %242 = vector.extract_strided_slice %240 {offsets = [0, 0, 8], sizes = [2, 8, 8], strides = [1, 1, 1]} : vector<2x8x32xf32> to vector<2x8x8xf32>
    %243 = vector.extract_strided_slice %240 {offsets = [0, 0, 16], sizes = [2, 8, 8], strides = [1, 1, 1]} : vector<2x8x32xf32> to vector<2x8x8xf32>
    %244 = vector.extract_strided_slice %240 {offsets = [0, 0, 24], sizes = [2, 8, 8], strides = [1, 1, 1]} : vector<2x8x32xf32> to vector<2x8x8xf32>
    %245 = tpu.concatenate %241, %242, %243, %244 in 0 : vector<2x8x8xf32>, vector<2x8x8xf32>, vector<2x8x8xf32>, vector<2x8x8xf32> -> vector<8x8x8xf32>
    %246 = vector.extract_strided_slice %238 {offsets = [0, 32], sizes = [16, 32], strides = [1, 1]} : vector<16x96xf32> to vector<16x32xf32>
    %247 = vector.shape_cast %246 : vector<16x32xf32> to vector<2x8x32xf32>
    %248 = vector.extract_strided_slice %247 {offsets = [0, 0, 0], sizes = [2, 8, 8], strides = [1, 1, 1]} : vector<2x8x32xf32> to vector<2x8x8xf32>
    %249 = vector.extract_strided_slice %247 {offsets = [0, 0, 8], sizes = [2, 8, 8], strides = [1, 1, 1]} : vector<2x8x32xf32> to vector<2x8x8xf32>
    %250 = vector.extract_strided_slice %247 {offsets = [0, 0, 16], sizes = [2, 8, 8], strides = [1, 1, 1]} : vector<2x8x32xf32> to vector<2x8x8xf32>
    %251 = vector.extract_strided_slice %247 {offsets = [0, 0, 24], sizes = [2, 8, 8], strides = [1, 1, 1]} : vector<2x8x32xf32> to vector<2x8x8xf32>
    %252 = tpu.concatenate %248, %249, %250, %251 in 0 : vector<2x8x8xf32>, vector<2x8x8xf32>, vector<2x8x8xf32>, vector<2x8x8xf32> -> vector<8x8x8xf32>
    %253 = vector.extract_strided_slice %238 {offsets = [0, 64], sizes = [16, 32], strides = [1, 1]} : vector<16x96xf32> to vector<16x32xf32>
    %254 = vector.shape_cast %253 : vector<16x32xf32> to vector<2x8x32xf32>
    %255 = vector.extract_strided_slice %254 {offsets = [0, 0, 0], sizes = [2, 8, 8], strides = [1, 1, 1]} : vector<2x8x32xf32> to vector<2x8x8xf32>
    %256 = vector.extract_strided_slice %254 {offsets = [0, 0, 8], sizes = [2, 8, 8], strides = [1, 1, 1]} : vector<2x8x32xf32> to vector<2x8x8xf32>
    %257 = vector.extract_strided_slice %254 {offsets = [0, 0, 16], sizes = [2, 8, 8], strides = [1, 1, 1]} : vector<2x8x32xf32> to vector<2x8x8xf32>
    %258 = vector.extract_strided_slice %254 {offsets = [0, 0, 24], sizes = [2, 8, 8], strides = [1, 1, 1]} : vector<2x8x32xf32> to vector<2x8x8xf32>
    %259 = tpu.concatenate %255, %256, %257, %258 in 0 : vector<2x8x8xf32>, vector<2x8x8xf32>, vector<2x8x8xf32>, vector<2x8x8xf32> -> vector<8x8x8xf32>
    "tpu.trace_start"() <{level = 10 : i32, message = "gqd,gkd->gqk"}> : () -> ()
    %cst_85 = arith.constant dense<0.000000e+00> : vector<8x8x8xf32>
    %260 = tpu.matmul %245, %252, %cst_85 {dimension_numbers = #tpu.dot_dimension_numbers<[2], [2], [1], [1], [0, 0, 0, 1, 1, 1], [0], [0]>} : vector<8x8x8xf32>, vector<8x8x8xf32>, vector<8x8x8xf32> -> vector<8x8x8xf32>
    "tpu.trace_stop"() : () -> ()
    %261 = arith.addf %260, %16 : vector<8x8x8xf32>
    %cst_86 = arith.constant dense<0xFF800000> : vector<8x8xf32>
    %262 = vector.multi_reduction <maximumf>, %261, %cst_86 [2] : vector<8x8x8xf32> to vector<8x8xf32>
    %263 = vector.shape_cast %262 : vector<8x8xf32> to vector<8x8x1xf32>
    %264 = vector.broadcast %263 : vector<8x8x1xf32> to vector<8x8x8xf32>
    %265 = arith.subf %261, %264 : vector<8x8x8xf32>
    %266 = math.exp %265 : vector<8x8x8xf32>
    %cst_87 = arith.constant dense<0.000000e+00> : vector<8x8xf32>
    %267 = vector.multi_reduction <add>, %266, %cst_87 [2] : vector<8x8x8xf32> to vector<8x8xf32>
    %268 = vector.shape_cast %267 : vector<8x8xf32> to vector<8x8x1xf32>
    %269 = tpu.reciprocal %268 {approx = true} : vector<8x8x1xf32> -> vector<8x8x1xf32>
    %270 = vector.broadcast %269 : vector<8x8x1xf32> to vector<8x8x8xf32>
    %271 = arith.mulf %266, %270 : vector<8x8x8xf32>
    "tpu.trace_start"() <{level = 10 : i32, message = "gqk,gkd->gqd"}> : () -> ()
    %cst_88 = arith.constant dense<0.000000e+00> : vector<8x8x8xf32>
    %272 = tpu.matmul %271, %259, %cst_88 {dimension_numbers = #tpu.dot_dimension_numbers<[2], [1], [1], [2], [0, 0, 0, 1, 1, 2], [0], [0]>} : vector<8x8x8xf32>, vector<8x8x8xf32>, vector<8x8x8xf32> -> vector<8x8x8xf32>
    "tpu.trace_stop"() : () -> ()
    %273 = vector.extract_strided_slice %272 {offsets = [0, 0, 0], sizes = [2, 8, 8], strides = [1, 1, 1]} : vector<8x8x8xf32> to vector<2x8x8xf32>
    %274 = vector.extract_strided_slice %272 {offsets = [2, 0, 0], sizes = [2, 8, 8], strides = [1, 1, 1]} : vector<8x8x8xf32> to vector<2x8x8xf32>
    %275 = vector.extract_strided_slice %272 {offsets = [4, 0, 0], sizes = [2, 8, 8], strides = [1, 1, 1]} : vector<8x8x8xf32> to vector<2x8x8xf32>
    %276 = vector.extract_strided_slice %272 {offsets = [6, 0, 0], sizes = [2, 8, 8], strides = [1, 1, 1]} : vector<8x8x8xf32> to vector<2x8x8xf32>
    %277 = tpu.concatenate %273, %274, %275, %276 in 2 : vector<2x8x8xf32>, vector<2x8x8xf32>, vector<2x8x8xf32>, vector<2x8x8xf32> -> vector<2x8x32xf32>
    %278 = vector.shape_cast %277 : vector<2x8x32xf32> to vector<16x32xf32>
    %c0_89 = arith.constant 0 : index
    %c0_90 = arith.constant 0 : index
    %279 = vector.load %arg13[%c0_89, %c0_90] : memref<32x32xf32, #tpu.memory_space<vmem>>, vector<32x32xf32>
    %cst_91 = arith.constant dense<0.000000e+00> : vector<16x32xf32>
    %280 = tpu.matmul %278, %279, %cst_91 {dimension_numbers = #tpu.dot_dimension_numbers<[1], [0], [0], [1], [0, 0, 1, 1], [], []>} : vector<16x32xf32>, vector<32x32xf32>, vector<16x32xf32> -> vector<16x32xf32>
    %281 = arith.addf %209, %280 : vector<16x32xf32>
    %c16 = arith.constant 16 : index
    %c0_92 = arith.constant 0 : index
    %282 = vector.load %arg4[%c16, %c0_92] : memref<32x128xf32, #tpu.memory_space<vmem>>, vector<1x32xf32>
    %283 = vector.broadcast %282 : vector<1x32xf32> to vector<16x32xf32>
    %284 = arith.addf %281, %283 : vector<16x32xf32>
    %c17 = arith.constant 17 : index
    %c0_93 = arith.constant 0 : index
    %285 = vector.load %arg4[%c17, %c0_93] : memref<32x128xf32, #tpu.memory_space<vmem>>, vector<1x32xf32>
    %c18 = arith.constant 18 : index
    %c0_94 = arith.constant 0 : index
    %286 = vector.load %arg4[%c18, %c0_94] : memref<32x128xf32, #tpu.memory_space<vmem>>, vector<1x32xf32>
    %cst_95 = arith.constant dense<0.000000e+00> : vector<16xf32>
    %287 = vector.multi_reduction <add>, %284, %cst_95 [1] : vector<16x32xf32> to vector<16xf32>
    %288 = vector.shape_cast %287 : vector<16xf32> to vector<16x1xf32>
    %cst_96 = arith.constant 3.200000e+01 : f32
    %289 = vector.broadcast %cst_96 : f32 to vector<16x1xf32>
    %290 = arith.divf %288, %289 : vector<16x1xf32>
    %291 = vector.broadcast %290 : vector<16x1xf32> to vector<16x32xf32>
    %292 = arith.subf %284, %291 : vector<16x32xf32>
    %293 = arith.mulf %292, %292 : vector<16x32xf32>
    %cst_97 = arith.constant dense<0.000000e+00> : vector<16xf32>
    %294 = vector.multi_reduction <add>, %293, %cst_97 [1] : vector<16x32xf32> to vector<16xf32>
    %295 = vector.shape_cast %294 : vector<16xf32> to vector<16x1xf32>
    %cst_98 = arith.constant 3.100000e+01 : f32
    %296 = vector.broadcast %cst_98 : f32 to vector<16x1xf32>
    %297 = arith.divf %295, %296 : vector<16x1xf32>
    %298 = vector.broadcast %290 : vector<16x1xf32> to vector<16x32xf32>
    %299 = arith.subf %284, %298 : vector<16x32xf32>
    %300 = vector.broadcast %285 : vector<1x32xf32> to vector<16x32xf32>
    %301 = arith.mulf %300, %299 : vector<16x32xf32>
    %302 = math.sqrt %297 : vector<16x1xf32>
    %cst_99 = arith.constant 9.99999997E-7 : f32
    %303 = vector.broadcast %cst_99 : f32 to vector<16x1xf32>
    %304 = arith.addf %302, %303 : vector<16x1xf32>
    %305 = vector.broadcast %304 : vector<16x1xf32> to vector<16x32xf32>
    %306 = arith.divf %301, %305 : vector<16x32xf32>
    %307 = vector.broadcast %286 : vector<1x32xf32> to vector<16x32xf32>
    %308 = arith.addf %306, %307 : vector<16x32xf32>
    %c0_100 = arith.constant 0 : index
    %c0_101 = arith.constant 0 : index
    %309 = vector.load %arg14[%c0_100, %c0_101] : memref<32x32xf32, #tpu.memory_space<vmem>>, vector<32x32xf32>
    %cst_102 = arith.constant dense<0.000000e+00> : vector<16x32xf32>
    %310 = tpu.matmul %308, %309, %cst_102 {dimension_numbers = #tpu.dot_dimension_numbers<[1], [0], [0], [1], [0, 0, 1, 1], [], []>} : vector<16x32xf32>, vector<32x32xf32>, vector<16x32xf32> -> vector<16x32xf32>
    %c19 = arith.constant 19 : index
    %c0_103 = arith.constant 0 : index
    %311 = vector.load %arg4[%c19, %c0_103] : memref<32x128xf32, #tpu.memory_space<vmem>>, vector<1x32xf32>
    %312 = vector.broadcast %311 : vector<1x32xf32> to vector<16x32xf32>
    %313 = arith.addf %310, %312 : vector<16x32xf32>
    %c0_104 = arith.constant 0 : index
    %c0_105 = arith.constant 0 : index
    %314 = vector.load %arg15[%c0_104, %c0_105] : memref<32x64xf32, #tpu.memory_space<vmem>>, vector<32x64xf32>
    %cst_106 = arith.constant dense<0.000000e+00> : vector<16x64xf32>
    %315 = tpu.matmul %3, %314, %cst_106 {dimension_numbers = #tpu.dot_dimension_numbers<[1], [0], [0], [1], [0, 0, 1, 1], [], []>} : vector<16x32xf32>, vector<32x64xf32>, vector<16x64xf32> -> vector<16x64xf32>
    %c20 = arith.constant 20 : index
    %c0_107 = arith.constant 0 : index
    %316 = vector.load %arg4[%c20, %c0_107] : memref<32x128xf32, #tpu.memory_space<vmem>>, vector<1x64xf32>
    %317 = vector.broadcast %316 : vector<1x64xf32> to vector<16x64xf32>
    %318 = arith.addf %315, %317 : vector<16x64xf32>
    %319 = vector.shape_cast %313 : vector<16x32xf32> to vector<2x8x32xf32>
    %320 = vector.extract_strided_slice %319 {offsets = [0, 0, 0], sizes = [2, 8, 8], strides = [1, 1, 1]} : vector<2x8x32xf32> to vector<2x8x8xf32>
    %321 = vector.extract_strided_slice %319 {offsets = [0, 0, 8], sizes = [2, 8, 8], strides = [1, 1, 1]} : vector<2x8x32xf32> to vector<2x8x8xf32>
    %322 = vector.extract_strided_slice %319 {offsets = [0, 0, 16], sizes = [2, 8, 8], strides = [1, 1, 1]} : vector<2x8x32xf32> to vector<2x8x8xf32>
    %323 = vector.extract_strided_slice %319 {offsets = [0, 0, 24], sizes = [2, 8, 8], strides = [1, 1, 1]} : vector<2x8x32xf32> to vector<2x8x8xf32>
    %324 = tpu.concatenate %320, %321, %322, %323 in 0 : vector<2x8x8xf32>, vector<2x8x8xf32>, vector<2x8x8xf32>, vector<2x8x8xf32> -> vector<8x8x8xf32>
    %325 = vector.extract_strided_slice %318 {offsets = [0, 0], sizes = [16, 32], strides = [1, 1]} : vector<16x64xf32> to vector<16x32xf32>
    %326 = vector.shape_cast %325 : vector<16x32xf32> to vector<2x8x32xf32>
    %327 = vector.extract_strided_slice %326 {offsets = [0, 0, 0], sizes = [2, 8, 8], strides = [1, 1, 1]} : vector<2x8x32xf32> to vector<2x8x8xf32>
    %328 = vector.extract_strided_slice %326 {offsets = [0, 0, 8], sizes = [2, 8, 8], strides = [1, 1, 1]} : vector<2x8x32xf32> to vector<2x8x8xf32>
    %329 = vector.extract_strided_slice %326 {offsets = [0, 0, 16], sizes = [2, 8, 8], strides = [1, 1, 1]} : vector<2x8x32xf32> to vector<2x8x8xf32>
    %330 = vector.extract_strided_slice %326 {offsets = [0, 0, 24], sizes = [2, 8, 8], strides = [1, 1, 1]} : vector<2x8x32xf32> to vector<2x8x8xf32>
    %331 = tpu.concatenate %327, %328, %329, %330 in 0 : vector<2x8x8xf32>, vector<2x8x8xf32>, vector<2x8x8xf32>, vector<2x8x8xf32> -> vector<8x8x8xf32>
    %332 = vector.extract_strided_slice %318 {offsets = [0, 32], sizes = [16, 32], strides = [1, 1]} : vector<16x64xf32> to vector<16x32xf32>
    %333 = vector.shape_cast %332 : vector<16x32xf32> to vector<2x8x32xf32>
    %334 = vector.extract_strided_slice %333 {offsets = [0, 0, 0], sizes = [2, 8, 8], strides = [1, 1, 1]} : vector<2x8x32xf32> to vector<2x8x8xf32>
    %335 = vector.extract_strided_slice %333 {offsets = [0, 0, 8], sizes = [2, 8, 8], strides = [1, 1, 1]} : vector<2x8x32xf32> to vector<2x8x8xf32>
    %336 = vector.extract_strided_slice %333 {offsets = [0, 0, 16], sizes = [2, 8, 8], strides = [1, 1, 1]} : vector<2x8x32xf32> to vector<2x8x8xf32>
    %337 = vector.extract_strided_slice %333 {offsets = [0, 0, 24], sizes = [2, 8, 8], strides = [1, 1, 1]} : vector<2x8x32xf32> to vector<2x8x8xf32>
    %338 = tpu.concatenate %334, %335, %336, %337 in 0 : vector<2x8x8xf32>, vector<2x8x8xf32>, vector<2x8x8xf32>, vector<2x8x8xf32> -> vector<8x8x8xf32>
    "tpu.trace_start"() <{level = 10 : i32, message = "gqd,gkd->gqk"}> : () -> ()
    %cst_108 = arith.constant dense<0.000000e+00> : vector<8x8x8xf32>
    %339 = tpu.matmul %324, %331, %cst_108 {dimension_numbers = #tpu.dot_dimension_numbers<[2], [2], [1], [1], [0, 0, 0, 1, 1, 1], [0], [0]>} : vector<8x8x8xf32>, vector<8x8x8xf32>, vector<8x8x8xf32> -> vector<8x8x8xf32>
    "tpu.trace_stop"() : () -> ()
    %340 = vector.broadcast %17 : vector<8x1x8xf32> to vector<8x8x8xf32>
    %341 = arith.addf %339, %340 : vector<8x8x8xf32>
    %cst_109 = arith.constant dense<0xFF800000> : vector<8x8xf32>
    %342 = vector.multi_reduction <maximumf>, %341, %cst_109 [2] : vector<8x8x8xf32> to vector<8x8xf32>
    %343 = vector.shape_cast %342 : vector<8x8xf32> to vector<8x8x1xf32>
    %344 = vector.broadcast %343 : vector<8x8x1xf32> to vector<8x8x8xf32>
    %345 = arith.subf %341, %344 : vector<8x8x8xf32>
    %346 = math.exp %345 : vector<8x8x8xf32>
    %cst_110 = arith.constant dense<0.000000e+00> : vector<8x8xf32>
    %347 = vector.multi_reduction <add>, %346, %cst_110 [2] : vector<8x8x8xf32> to vector<8x8xf32>
    %348 = vector.shape_cast %347 : vector<8x8xf32> to vector<8x8x1xf32>
    %349 = tpu.reciprocal %348 {approx = true} : vector<8x8x1xf32> -> vector<8x8x1xf32>
    %350 = vector.broadcast %349 : vector<8x8x1xf32> to vector<8x8x8xf32>
    %351 = arith.mulf %346, %350 : vector<8x8x8xf32>
    "tpu.trace_start"() <{level = 10 : i32, message = "gqk,gkd->gqd"}> : () -> ()
    %cst_111 = arith.constant dense<0.000000e+00> : vector<8x8x8xf32>
    %352 = tpu.matmul %351, %338, %cst_111 {dimension_numbers = #tpu.dot_dimension_numbers<[2], [1], [1], [2], [0, 0, 0, 1, 1, 2], [0], [0]>} : vector<8x8x8xf32>, vector<8x8x8xf32>, vector<8x8x8xf32> -> vector<8x8x8xf32>
    "tpu.trace_stop"() : () -> ()
    %353 = vector.extract_strided_slice %352 {offsets = [0, 0, 0], sizes = [2, 8, 8], strides = [1, 1, 1]} : vector<8x8x8xf32> to vector<2x8x8xf32>
    %354 = vector.extract_strided_slice %352 {offsets = [2, 0, 0], sizes = [2, 8, 8], strides = [1, 1, 1]} : vector<8x8x8xf32> to vector<2x8x8xf32>
    %355 = vector.extract_strided_slice %352 {offsets = [4, 0, 0], sizes = [2, 8, 8], strides = [1, 1, 1]} : vector<8x8x8xf32> to vector<2x8x8xf32>
    %356 = vector.extract_strided_slice %352 {offsets = [6, 0, 0], sizes = [2, 8, 8], strides = [1, 1, 1]} : vector<8x8x8xf32> to vector<2x8x8xf32>
    %357 = tpu.concatenate %353, %354, %355, %356 in 2 : vector<2x8x8xf32>, vector<2x8x8xf32>, vector<2x8x8xf32>, vector<2x8x8xf32> -> vector<2x8x32xf32>
    %358 = vector.shape_cast %357 : vector<2x8x32xf32> to vector<16x32xf32>
    %c0_112 = arith.constant 0 : index
    %c0_113 = arith.constant 0 : index
    %359 = vector.load %arg16[%c0_112, %c0_113] : memref<32x32xf32, #tpu.memory_space<vmem>>, vector<32x32xf32>
    %cst_114 = arith.constant dense<0.000000e+00> : vector<16x32xf32>
    %360 = tpu.matmul %358, %359, %cst_114 {dimension_numbers = #tpu.dot_dimension_numbers<[1], [0], [0], [1], [0, 0, 1, 1], [], []>} : vector<16x32xf32>, vector<32x32xf32>, vector<16x32xf32> -> vector<16x32xf32>
    %361 = arith.addf %284, %360 : vector<16x32xf32>
    %c21 = arith.constant 21 : index
    %c0_115 = arith.constant 0 : index
    %362 = vector.load %arg4[%c21, %c0_115] : memref<32x128xf32, #tpu.memory_space<vmem>>, vector<1x32xf32>
    %363 = vector.broadcast %362 : vector<1x32xf32> to vector<16x32xf32>
    %364 = arith.addf %361, %363 : vector<16x32xf32>
    %c22 = arith.constant 22 : index
    %c0_116 = arith.constant 0 : index
    %365 = vector.load %arg4[%c22, %c0_116] : memref<32x128xf32, #tpu.memory_space<vmem>>, vector<1x32xf32>
    %c23 = arith.constant 23 : index
    %c0_117 = arith.constant 0 : index
    %366 = vector.load %arg4[%c23, %c0_117] : memref<32x128xf32, #tpu.memory_space<vmem>>, vector<1x32xf32>
    %cst_118 = arith.constant dense<0.000000e+00> : vector<16xf32>
    %367 = vector.multi_reduction <add>, %364, %cst_118 [1] : vector<16x32xf32> to vector<16xf32>
    %368 = vector.shape_cast %367 : vector<16xf32> to vector<16x1xf32>
    %cst_119 = arith.constant 3.200000e+01 : f32
    %369 = vector.broadcast %cst_119 : f32 to vector<16x1xf32>
    %370 = arith.divf %368, %369 : vector<16x1xf32>
    %371 = vector.broadcast %370 : vector<16x1xf32> to vector<16x32xf32>
    %372 = arith.subf %364, %371 : vector<16x32xf32>
    %373 = arith.mulf %372, %372 : vector<16x32xf32>
    %cst_120 = arith.constant dense<0.000000e+00> : vector<16xf32>
    %374 = vector.multi_reduction <add>, %373, %cst_120 [1] : vector<16x32xf32> to vector<16xf32>
    %375 = vector.shape_cast %374 : vector<16xf32> to vector<16x1xf32>
    %cst_121 = arith.constant 3.100000e+01 : f32
    %376 = vector.broadcast %cst_121 : f32 to vector<16x1xf32>
    %377 = arith.divf %375, %376 : vector<16x1xf32>
    %378 = vector.broadcast %370 : vector<16x1xf32> to vector<16x32xf32>
    %379 = arith.subf %364, %378 : vector<16x32xf32>
    %380 = vector.broadcast %365 : vector<1x32xf32> to vector<16x32xf32>
    %381 = arith.mulf %380, %379 : vector<16x32xf32>
    %382 = math.sqrt %377 : vector<16x1xf32>
    %cst_122 = arith.constant 9.99999997E-7 : f32
    %383 = vector.broadcast %cst_122 : f32 to vector<16x1xf32>
    %384 = arith.addf %382, %383 : vector<16x1xf32>
    %385 = vector.broadcast %384 : vector<16x1xf32> to vector<16x32xf32>
    %386 = arith.divf %381, %385 : vector<16x32xf32>
    %387 = vector.broadcast %366 : vector<1x32xf32> to vector<16x32xf32>
    %388 = arith.addf %386, %387 : vector<16x32xf32>
    %c0_123 = arith.constant 0 : index
    %c0_124 = arith.constant 0 : index
    %389 = vector.load %arg17[%c0_123, %c0_124] : memref<32x64xf32, #tpu.memory_space<vmem>>, vector<32x64xf32>
    %cst_125 = arith.constant dense<0.000000e+00> : vector<16x64xf32>
    %390 = tpu.matmul %388, %389, %cst_125 {dimension_numbers = #tpu.dot_dimension_numbers<[1], [0], [0], [1], [0, 0, 1, 1], [], []>} : vector<16x32xf32>, vector<32x64xf32>, vector<16x64xf32> -> vector<16x64xf32>
    %c24 = arith.constant 24 : index
    %c0_126 = arith.constant 0 : index
    %391 = vector.load %arg4[%c24, %c0_126] : memref<32x128xf32, #tpu.memory_space<vmem>>, vector<1x64xf32>
    %392 = vector.broadcast %391 : vector<1x64xf32> to vector<16x64xf32>
    %393 = arith.addf %390, %392 : vector<16x64xf32>
    %cst_127 = arith.constant 0.000000e+00 : f32
    %394 = vector.broadcast %cst_127 : f32 to vector<16x64xf32>
    %395 = arith.maximumf %393, %394 : vector<16x64xf32>
    %c0_128 = arith.constant 0 : index
    %c0_129 = arith.constant 0 : index
    %396 = vector.load %arg18[%c0_128, %c0_129] : memref<64x32xf32, #tpu.memory_space<vmem>>, vector<64x32xf32>
    %cst_130 = arith.constant dense<0.000000e+00> : vector<16x32xf32>
    %397 = tpu.matmul %395, %396, %cst_130 {dimension_numbers = #tpu.dot_dimension_numbers<[1], [0], [0], [1], [0, 0, 1, 1], [], []>} : vector<16x64xf32>, vector<64x32xf32>, vector<16x32xf32> -> vector<16x32xf32>
    %398 = arith.addf %364, %397 : vector<16x32xf32>
    %c25 = arith.constant 25 : index
    %c0_131 = arith.constant 0 : index
    %399 = vector.load %arg4[%c25, %c0_131] : memref<32x128xf32, #tpu.memory_space<vmem>>, vector<1x32xf32>
    %400 = vector.broadcast %399 : vector<1x32xf32> to vector<16x32xf32>
    %401 = arith.addf %398, %400 : vector<16x32xf32>
    %c26 = arith.constant 26 : index
    %c0_132 = arith.constant 0 : index
    %402 = vector.load %arg4[%c26, %c0_132] : memref<32x128xf32, #tpu.memory_space<vmem>>, vector<1x32xf32>
    %c27 = arith.constant 27 : index
    %c0_133 = arith.constant 0 : index
    %403 = vector.load %arg4[%c27, %c0_133] : memref<32x128xf32, #tpu.memory_space<vmem>>, vector<1x32xf32>
    %cst_134 = arith.constant dense<0.000000e+00> : vector<16xf32>
    %404 = vector.multi_reduction <add>, %401, %cst_134 [1] : vector<16x32xf32> to vector<16xf32>
    %405 = vector.shape_cast %404 : vector<16xf32> to vector<16x1xf32>
    %cst_135 = arith.constant 3.200000e+01 : f32
    %406 = vector.broadcast %cst_135 : f32 to vector<16x1xf32>
    %407 = arith.divf %405, %406 : vector<16x1xf32>
    %408 = vector.broadcast %407 : vector<16x1xf32> to vector<16x32xf32>
    %409 = arith.subf %401, %408 : vector<16x32xf32>
    %410 = arith.mulf %409, %409 : vector<16x32xf32>
    %cst_136 = arith.constant dense<0.000000e+00> : vector<16xf32>
    %411 = vector.multi_reduction <add>, %410, %cst_136 [1] : vector<16x32xf32> to vector<16xf32>
    %412 = vector.shape_cast %411 : vector<16xf32> to vector<16x1xf32>
    %cst_137 = arith.constant 3.100000e+01 : f32
    %413 = vector.broadcast %cst_137 : f32 to vector<16x1xf32>
    %414 = arith.divf %412, %413 : vector<16x1xf32>
    %415 = vector.broadcast %407 : vector<16x1xf32> to vector<16x32xf32>
    %416 = arith.subf %401, %415 : vector<16x32xf32>
    %417 = vector.broadcast %402 : vector<1x32xf32> to vector<16x32xf32>
    %418 = arith.mulf %417, %416 : vector<16x32xf32>
    %419 = math.sqrt %414 : vector<16x1xf32>
    %cst_138 = arith.constant 9.99999997E-7 : f32
    %420 = vector.broadcast %cst_138 : f32 to vector<16x1xf32>
    %421 = arith.addf %419, %420 : vector<16x1xf32>
    %422 = vector.broadcast %421 : vector<16x1xf32> to vector<16x32xf32>
    %423 = arith.divf %418, %422 : vector<16x32xf32>
    %424 = vector.broadcast %403 : vector<1x32xf32> to vector<16x32xf32>
    %425 = arith.addf %423, %424 : vector<16x32xf32>
    %c0_139 = arith.constant 0 : index
    %c0_140 = arith.constant 0 : index
    %426 = vector.load %arg19[%c0_139, %c0_140] : memref<32x128xf32, #tpu.memory_space<vmem>>, vector<32x128xf32>
    %cst_141 = arith.constant dense<0.000000e+00> : vector<16x128xf32>
    %427 = tpu.matmul %425, %426, %cst_141 {dimension_numbers = #tpu.dot_dimension_numbers<[1], [0], [0], [1], [0, 0, 1, 1], [], []>} : vector<16x32xf32>, vector<32x128xf32>, vector<16x128xf32> -> vector<16x128xf32>
    %c28 = arith.constant 28 : index
    %c0_142 = arith.constant 0 : index
    %428 = vector.load %arg4[%c28, %c0_142] : memref<32x128xf32, #tpu.memory_space<vmem>>, vector<1x128xf32>
    %429 = vector.broadcast %428 : vector<1x128xf32> to vector<16x128xf32>
    %430 = arith.addf %427, %429 : vector<16x128xf32>
    %cst_143 = arith.constant dense<0xFF800000> : vector<16xf32>
    %431 = vector.multi_reduction <maximumf>, %430, %cst_143 [1] : vector<16x128xf32> to vector<16xf32>
    %432 = vector.shape_cast %431 : vector<16xf32> to vector<16x1xf32>
    %433 = vector.broadcast %432 : vector<16x1xf32> to vector<16x128xf32>
    %434 = arith.subf %430, %433 : vector<16x128xf32>
    %435 = math.exp %434 : vector<16x128xf32>
    %cst_144 = arith.constant dense<0.000000e+00> : vector<16xf32>
    %436 = vector.multi_reduction <add>, %435, %cst_144 [1] : vector<16x128xf32> to vector<16xf32>
    %437 = vector.shape_cast %436 : vector<16xf32> to vector<16x1xf32>
    %438 = math.log %437 : vector<16x1xf32>
    %439 = vector.broadcast %438 : vector<16x1xf32> to vector<16x128xf32>
    %440 = arith.subf %434, %439 : vector<16x128xf32>
    %441 = vector.shape_cast %440 : vector<16x128xf32> to vector<2x8x128xf32>
    %c0_145 = arith.constant 0 : index
    %c0_146 = arith.constant 0 : index
    %c0_147 = arith.constant 0 : index
    %442 = vector.load %arg20[%c0_145, %c0_146, %c0_147] : memref<2x8x128xf32, #tpu.memory_space<vmem>>, vector<2x8x128xf32>
    tpu.vector_store %arg20[%c0_145, %c0_146, %c0_147], %441 {strides = array<i32>} : memref<2x8x128xf32, #tpu.memory_space<vmem>>, vector<2x8x128xf32>,
    return
  }
}

</mosaic_0001>

<bundles_post_ra>
// kernel: tpu_custom_call.1
= control target key start
LH: loop header
LB: loop body
LE: loop exit
PB: predicated region body
PF: predicated region fallthrough
CT: control target
= control target key end

     0   :  { %s10417_s0 = inlined_call_operand.hbm [shape: f32[2,8,32], index: 0, kind: input, shape index: {}]   ;;  %s10418_s1 = inlined_call_operand.hbm [shape: f32[2,8,32], index: 1, kind: input, shape index: {}]   ;;  %s10419_s2 = inlined_call_operand.hbm [shape: s32[2,1,8], index: 2, kind: input, shape index: {}]   ;;  %s10420_s3 = inlined_call_operand.hbm [shape: s32[2,8,8], index: 3, kind: input, shape index: {}]   ;;  %s10421_s4 = inlined_call_operand.vmem [shape: f32[32,128], index: 4, kind: input, shape index: {}]   ;;  %s10422_s5 = inlined_call_operand.vmem [shape: f32[32,96], index: 5, kind: input, shape index: {}]   ;;  %s10423_s6 = inlined_call_operand.vmem [shape: f32[32,32], index: 6, kind: input, shape index: {}]   ;;  %s10424_s7 = inlined_call_operand.vmem [shape: f32[32,32], index: 7, kind: input, shape index: {}]   ;;  %s10425_s8 = inlined_call_operand.vmem [shape: f32[32,64], index: 8, kind: input, shape index: {}]   ;;  %s10426_s9 = inlined_call_operand.hbm [shape: f32[32,32], index: 9, kind: input, shape index: {}]   ;;  %s10427_s10 = inlined_call_operand.hbm [shape: f32[32,64], index: 10, kind: input, shape index: {}]   ;;  %s10428_s11 = inlined_call_operand.vmem [shape: f32[64,32], index: 11, kind: input, shape index: {}]   ;;  %s10429_s12 = inlined_call_operand.hbm [shape: f32[32,96], index: 12, kind: input, shape index: {}]   ;;  %s10430_s13 = inlined_call_operand.hbm [shape: f32[32,32], index: 13, kind: input, shape index: {}]   ;;  %s10431_s14 = inlined_call_operand.hbm [shape: f32[32,32], index: 14, kind: input, shape index: {}]   ;;  %s10432_s15 = inlined_call_operand.hbm [shape: f32[32,64], index: 15, kind: input, shape index: {}]   ;;  %s10433_s16 = inlined_call_operand.hbm [shape: f32[32,32], index: 16, kind: input, shape index: {}]   ;;  %s10434_s17 = inlined_call_operand.vmem [shape: f32[32,64], index: 17, kind: input, shape index: {}]   ;;  %s10435_s18 = inlined_call_operand.vmem [shape: f32[64,32], index: 18, kind: input, shape index: {}]   ;;  %s10436_s19 = inlined_call_operand.hbm [shape: f32[32,128], index: 19, kind: input, shape index: {}]   ;;  %s10437_s20 = inlined_call_operand.hbm [shape: f32[2,8,128], index: 20, kind: output, shape index: {}]  }
   0x1   :  { %10445 = sst [smem:[#allocation31_spill]] %s10417_s0 }
   0x2   :  { %10446 = sst [smem:[#allocation32_spill]] %s10418_s1 }
   0x3   :  { %10447 = sst [smem:[#allocation33_spill]] %s10419_s2 }
   0x4   :  { %10448 = sst [smem:[#allocation34_spill]] %s10420_s3 }
   0x5   :  { %10449 = sst [smem:[#allocation35_spill]] %s10421_s4 }
   0x6   :  { %10450 = sst [smem:[#allocation36_spill]] %s10435_s18 }
   0x7   :  { %10451 = sst [smem:[#allocation37_spill]] %s10437_s20 }
   0x8   :  { %25 = vsyncpa [#allocation3], 0 }
   0x9   :  { %26 = vsyncpa [#allocation6], 0 }
   0xa   :  { %27 = vsyncpa [#allocation9], 0 }
   0xb   :  { %28 = vsyncpa [#allocation12], 0 }
   0xc   :  { %29 = vsyncpa [#allocation15], 0 }
   0xd   :  { %30 = vsyncpa [#allocation18], 0 }
   0xe   :  { %31 = vsyncpa [#allocation21], 0 }
   0xf   :  { %32 = vsyncpa [#allocation4], 0  ;;  %s8994_s1 = smov [#allocation5]   ;;  %s8995_s23 = smov [#allocation8]  }
  0x10   :  { %s50_s22 = sshll.u32 %s8994_s1, 4  ;;  %s74_s24 = sshll.u32 %s8995_s23, 4  ;;  %s51_s22 = int_to_ptr.vmem [resolvable:$true] %s50_s22  ;;  %s9124_s24 = int_to_ptr.vmem [resolvable:$true] %s74_s24 }
  0x11   :  { %s10452_s3 = sld [smem:[#allocation32_spill]] }
  0x17   :  { %s8692_s26 = scalar_lea.hbm %s10452_s3, 256 }
  0x18   :  { %p8693_p0 = scmp.ne.s32.totalorder %s10452_s3, %s8692_s26  ;;  %p8696_p1 = scmp.lt.u32.totalorder %s8692_s26, %s10452_s3 }
  0x1a   :  { %p8698_p2 = pnand %p8696_p1, %p8693_p0 }
  0x1c   :  { %8701 = shalt.err (!%p8698_p2)
}
  0x1d   :  { %s8702_s30 = scalar_lea.vmem %s51_s22, 256  ;;  %p8707_p4 = scmp.lt.s32.totalorder %s51_s22, %s51_s22 }
  0x1e   :  { %p8703_p3 = scmp.ne.s32.totalorder %s51_s22, %s8702_s30  ;;  %p8708_p5 = scmp.lt.s32.totalorder %s8702_s30, %s8702_s30 }
  0x20   :  { %p8709_p6 = por %p8708_p5, %p8707_p4 }
  0x22   :  { %p8710_p7 = pnand %p8709_p6, %p8703_p3 }
  0x24   :  { %8713 = shalt.err (!%p8710_p7)
}
  0x25   :  { %s8996_s0 = smov 128   ;;  %s8997_s21 = smov 8  }
  0x26   :  { %56 = dma.hbm_to_vmem [thread:$0]  %s10452_s3, 256, %s51_s22, [#allocation6], %s8996_s0, %s8996_s0, %s8997_s21  }
  0x27   :  { %s10453_s26 = sld [smem:[#allocation34_spill]] }
  0x2d   :  { %s8714_s27 = scalar_lea.hbm %s10453_s26, 256 }
  0x2e   :  { %p8715_p8 = scmp.ne.s32.totalorder %s10453_s26, %s8714_s27  ;;  %p8718_p9 = scmp.lt.u32.totalorder %s8714_s27, %s10453_s26 }
  0x30   :  { %p8720_p10 = pnand %p8718_p9, %p8715_p8 }
  0x32   :  { %8723 = shalt.err (!%p8720_p10)
}
  0x33   :  { %s8724_s20 = scalar_lea.vmem %s9124_s24, 256  ;;  %p8729_p12 = scmp.lt.s32.totalorder %s9124_s24, %s9124_s24 }
  0x34   :  { %p8725_p11 = scmp.ne.s32.totalorder %s9124_s24, %s8724_s20  ;;  %p8730_p13 = scmp.lt.s32.totalorder %s8724_s20, %s8724_s20 }
  0x36   :  { %p8731_p0 = por %p8730_p13, %p8729_p12 }
  0x38   :  { %p8732_p1 = pnand %p8731_p0, %p8725_p11 }
  0x3a   :  { %8735 = shalt.err (!%p8732_p1)
}
  0x3b   :  { %80 = dma.hbm_to_vmem [thread:$0]  %s10453_s26, 256, %s9124_s24, [#allocation9], %s8996_s0, %s8996_s0, %s8997_s21  }
  0x3c   :  { %s8998_s1 = smov [#allocation11]   ;;  %s8999_s2 = smov [#allocation14]  }
  0x3d   :  { %s108_s23 = sshll.u32 %s8998_s1, 4  ;;  %s134_s25 = sshll.u32 %s8999_s2, 4  ;;  %s109_s23 = int_to_ptr.vmem [resolvable:$true] %s108_s23  ;;  %s9161_s25 = int_to_ptr.vmem [resolvable:$true] %s134_s25 }
  0x3e   :  { %s8736_s28 = scalar_lea.hbm %s10427_s10, 512 }
  0x3f   :  { %p8737_p2 = scmp.ne.s32.totalorder %s10427_s10, %s8736_s28  ;;  %p8740_p3 = scmp.lt.u32.totalorder %s8736_s28, %s10427_s10 }
  0x41   :  { %p8742_p4 = pnand %p8740_p3, %p8737_p2 }
  0x43   :  { %8745 = shalt.err (!%p8742_p4)
}
  0x44   :  { %s8746_s24 = scalar_lea.vmem %s109_s23, 512  ;;  %p8751_p6 = scmp.lt.s32.totalorder %s109_s23, %s109_s23 }
  0x45   :  { %p8747_p5 = scmp.ne.s32.totalorder %s109_s23, %s8746_s24  ;;  %p8752_p7 = scmp.lt.s32.totalorder %s8746_s24, %s8746_s24 }
  0x47   :  { %p8753_p8 = por %p8752_p7, %p8751_p6 }
  0x49   :  { %p8754_p9 = pnand %p8753_p8, %p8747_p5 }
  0x4b   :  { %8757 = shalt.err (!%p8754_p9)
}
  0x4c   :  { %114 = dma.hbm_to_vmem [thread:$0]  %s10427_s10, 512, %s109_s23, [#allocation12], %s8996_s0, %s8996_s0, %s8997_s21  }
  0x4d   :  { %s8758_s18 = scalar_lea.hbm %s10430_s13, 512 }
  0x4e   :  { %p8759_p10 = scmp.ne.s32.totalorder %s10430_s13, %s8758_s18  ;;  %p8762_p11 = scmp.lt.u32.totalorder %s8758_s18, %s10430_s13 }
  0x50   :  { %p8764_p12 = pnand %p8762_p11, %p8759_p10 }
  0x52   :  { %8767 = shalt.err (!%p8764_p12)
}
  0x53   :  { %s8768_s4 = scalar_lea.vmem %s9161_s25, 512  ;;  %p8773_p0 = scmp.lt.s32.totalorder %s9161_s25, %s9161_s25 }
  0x54   :  { %p8769_p13 = scmp.ne.s32.totalorder %s9161_s25, %s8768_s4  ;;  %p8774_p1 = scmp.lt.s32.totalorder %s8768_s4, %s8768_s4 }
  0x56   :  { %p8775_p2 = por %p8774_p1, %p8773_p0 }
  0x58   :  { %p8776_p3 = pnand %p8775_p2, %p8769_p13 }
  0x5a   :  { %8779 = shalt.err (!%p8776_p3)
}
  0x5b   :  { %140 = dma.hbm_to_vmem [thread:$0]  %s10430_s13, 512, %s9161_s25, [#allocation15], %s8996_s0, %s8996_s0, %s8997_s21  }
  0x5c   :  { %s9000_s29 = smov [#allocation17]   ;;  %s9001_s24 = smov [#allocation2]  }
  0x5d   :  { %s158_s30 = sshll.u32 %s9000_s29, 4  ;;  %s38_s26 = sshll.u32 %s9001_s24, 4  ;;  %s159_s30 = int_to_ptr.vmem [resolvable:$true] %s158_s30  ;;  %s9198_s26 = int_to_ptr.vmem [resolvable:$true] %s38_s26 }
  0x5e   :  { %s8780_s1 = scalar_lea.hbm %s10432_s15, 512 }
  0x5f   :  { %p8781_p4 = scmp.ne.s32.totalorder %s10432_s15, %s8780_s1  ;;  %p8784_p5 = scmp.lt.u32.totalorder %s8780_s1, %s10432_s15 }
  0x61   :  { %p8786_p6 = pnand %p8784_p5, %p8781_p4 }
  0x63   :  { %8789 = shalt.err (!%p8786_p6)
}
  0x64   :  { %s8790_s13 = scalar_lea.vmem %s159_s30, 512  ;;  %p8795_p8 = scmp.lt.s32.totalorder %s159_s30, %s159_s30 }
  0x65   :  { %p8791_p7 = scmp.ne.s32.totalorder %s159_s30, %s8790_s13  ;;  %p8796_p9 = scmp.lt.s32.totalorder %s8790_s13, %s8790_s13 }
  0x67   :  { %p8797_p10 = por %p8796_p9, %p8795_p8 }
  0x69   :  { %p8798_p11 = pnand %p8797_p10, %p8791_p7 }
  0x6b   :  { %8801 = shalt.err (!%p8798_p11)
}
  0x6c   :  { %164 = dma.hbm_to_vmem [thread:$0]  %s10432_s15, 512, %s159_s30, [#allocation18], %s8996_s0, %s8996_s0, %s8997_s21  }
  0x6d   :  { %s10454_s23 = sld [smem:[#allocation31_spill]] }
  0x73   :  { %s8802_s29 = scalar_lea.hbm %s10454_s23, 256 }
  0x74   :  { %p8803_p12 = scmp.ne.s32.totalorder %s10454_s23, %s8802_s29  ;;  %p8806_p13 = scmp.lt.u32.totalorder %s8802_s29, %s10454_s23 }
  0x76   :  { %p8808_p0 = pnand %p8806_p13, %p8803_p12 }
  0x78   :  { %8811 = shalt.err (!%p8808_p0)
}
  0x79   :  { %s8812_s18 = scalar_lea.vmem %s9198_s26, 256  ;;  %p8817_p2 = scmp.lt.s32.totalorder %s9198_s26, %s9198_s26 }
  0x7a   :  { %p8813_p1 = scmp.ne.s32.totalorder %s9198_s26, %s8812_s18  ;;  %p8818_p3 = scmp.lt.s32.totalorder %s8812_s18, %s8812_s18 }
  0x7c   :  { %p8819_p4 = por %p8818_p3, %p8817_p2 }
  0x7e   :  { %p8820_p5 = pnand %p8819_p4, %p8813_p1 }
  0x80   :  { %8823 = shalt.err (!%p8820_p5)
}
  0x81   :  { %44 = dma.hbm_to_vmem [thread:$0]  %s10454_s23, 256, %s9198_s26, [#allocation3], %s8996_s0, %s8996_s0, %s8997_s21  }
  0x82   :  { %s9002_s2 = smov [#allocation7]   ;;  %s10455_s25 = sld [smem:[#allocation33_spill]] }
  0x83   :  { %s62_s27 = sshll.u32 %s9002_s2, 4  ;;  %s63_s27 = int_to_ptr.vmem [resolvable:$true] %s62_s27 }
  0x88   :  { %s8824_s28 = scalar_lea.hbm %s10455_s25, 32 }
  0x89   :  { %p8825_p6 = scmp.ne.s32.totalorder %s10455_s25, %s8824_s28  ;;  %p8828_p7 = scmp.lt.u32.totalorder %s8824_s28, %s10455_s25 }
  0x8b   :  { %p8830_p8 = pnand %p8828_p7, %p8825_p6 }
  0x8d   :  { %8833 = shalt.err (!%p8830_p8)
}
  0x8e   :  { %s8834_s22 = scalar_lea.vmem %s63_s27, 32  ;;  %p8839_p10 = scmp.lt.s32.totalorder %s63_s27, %s63_s27 }
  0x8f   :  { %p8835_p9 = scmp.ne.s32.totalorder %s63_s27, %s8834_s22  ;;  %p8840_p11 = scmp.lt.s32.totalorder %s8834_s22, %s8834_s22 }
  0x91   :  { %p8841_p12 = por %p8840_p11, %p8839_p10 }
  0x93   :  { %p8842_p13 = pnand %p8841_p12, %p8835_p9 }
  0x95   :  { %8845 = shalt.err (!%p8842_p13)
}
  0x96   :  { %s9003_s26 = smov 16   ;;  %s9004_s23 = smov 1  }
  0x97   :  { %68 = dma.hbm_to_vmem [thread:$0]  %s10455_s25, 32, %s63_s27, [#allocation6], %s9003_s26, %s9003_s26, %s9004_s23  }
  0x98   :  { %s9005_s18 = smov [#allocation10]   ;;  %s9006_s30 = smov [#allocation13]  }
  0x99   :  { %s96_s15 = sshll.u32 %s9005_s18, 4  ;;  %s122_s2 = sshll.u32 %s9006_s30, 4  ;;  %s97_s15 = int_to_ptr.vmem [resolvable:$true] %s96_s15  ;;  %s123_s2 = int_to_ptr.vmem [resolvable:$true] %s122_s2 }
  0x9a   :  { %s8846_s28 = scalar_lea.hbm %s10426_s9, 512 }
  0x9b   :  { %p8847_p0 = scmp.ne.s32.totalorder %s10426_s9, %s8846_s28  ;;  %p8850_p1 = scmp.lt.u32.totalorder %s8846_s28, %s10426_s9 }
  0x9d   :  { %p8852_p2 = pnand %p8850_p1, %p8847_p0 }
  0x9f   :  { %8855 = shalt.err (!%p8852_p2)
}
  0xa0   :  { %s8856_s27 = scalar_lea.vmem %s97_s15, 512  ;;  %p8861_p4 = scmp.lt.s32.totalorder %s97_s15, %s97_s15 }
  0xa1   :  { %p8857_p3 = scmp.ne.s32.totalorder %s97_s15, %s8856_s27  ;;  %p8862_p5 = scmp.lt.s32.totalorder %s8856_s27, %s8856_s27 }
  0xa3   :  { %p8863_p6 = por %p8862_p5, %p8861_p4 }
  0xa5   :  { %p8864_p7 = pnand %p8863_p6, %p8857_p3 }
  0xa7   :  { %8867 = shalt.err (!%p8864_p7)
}
  0xa8   :  { %102 = dma.hbm_to_vmem [thread:$0]  %s10426_s9, 512, %s97_s15, [#allocation9], %s8996_s0, %s8996_s0, %s8997_s21  }
  0xa9   :  { %s8868_s1 = scalar_lea.hbm %s10429_s12, 512 }
  0xaa   :  { %p8869_p8 = scmp.ne.s32.totalorder %s10429_s12, %s8868_s1  ;;  %p8872_p9 = scmp.lt.u32.totalorder %s8868_s1, %s10429_s12 }
  0xac   :  { %p8874_p10 = pnand %p8872_p9, %p8869_p8 }
  0xae   :  { %8877 = shalt.err (!%p8874_p10)
}
  0xaf   :  { %s8878_s28 = scalar_lea.vmem %s123_s2, 512  ;;  %p8883_p12 = scmp.lt.s32.totalorder %s123_s2, %s123_s2 }
  0xb0   :  { %p8879_p11 = scmp.ne.s32.totalorder %s123_s2, %s8878_s28  ;;  %p8884_p13 = scmp.lt.s32.totalorder %s8878_s28, %s8878_s28 }
  0xb2   :  { %p8885_p0 = por %p8884_p13, %p8883_p12 }
  0xb4   :  { %p8886_p1 = pnand %p8885_p0, %p8879_p11 }
  0xb6   :  { %8889 = shalt.err (!%p8886_p1)
}
  0xb7   :  { %128 = dma.hbm_to_vmem [thread:$0]  %s10429_s12, 512, %s123_s2, [#allocation12], %s8996_s0, %s8996_s0, %s8997_s21  }
  0xb8   :  { %s9007_s4 = smov [#allocation16]   ;;  %s9008_s29 = smov [#allocation19]  }
  0xb9   :  { %s146_s10 = sshll.u32 %s9007_s4, 4  ;;  %s170_s24 = sshll.u32 %s9008_s29, 4  ;;  %s147_s10 = int_to_ptr.vmem [resolvable:$true] %s146_s10  ;;  %s171_s24 = int_to_ptr.vmem [resolvable:$true] %s170_s24 }
  0xba   :  { %s8890_s22 = scalar_lea.hbm %s10431_s14, 512 }
  0xbb   :  { %p8891_p2 = scmp.ne.s32.totalorder %s10431_s14, %s8890_s22  ;;  %p8894_p3 = scmp.lt.u32.totalorder %s8890_s22, %s10431_s14 }
  0xbd   :  { %p8896_p4 = pnand %p8894_p3, %p8891_p2 }
  0xbf   :  { %8899 = shalt.err (!%p8896_p4)
}
  0xc0   :  { %s8900_s12 = scalar_lea.vmem %s147_s10, 512  ;;  %p8905_p6 = scmp.lt.s32.totalorder %s147_s10, %s147_s10 }
  0xc1   :  { %p8901_p5 = scmp.ne.s32.totalorder %s147_s10, %s8900_s12  ;;  %p8906_p7 = scmp.lt.s32.totalorder %s8900_s12, %s8900_s12 }
  0xc3   :  { %p8907_p8 = por %p8906_p7, %p8905_p6 }
  0xc5   :  { %p8908_p9 = pnand %p8907_p8, %p8901_p5 }
  0xc7   :  { %8911 = shalt.err (!%p8908_p9)
}
  0xc8   :  { %152 = dma.hbm_to_vmem [thread:$0]  %s10431_s14, 512, %s147_s10, [#allocation15], %s8996_s0, %s8996_s0, %s8997_s21  }
  0xc9   :  { %s8912_s28 = scalar_lea.hbm %s10433_s16, 512 }
  0xca   :  { %p8913_p10 = scmp.ne.s32.totalorder %s10433_s16, %s8912_s28  ;;  %p8916_p11 = scmp.lt.u32.totalorder %s8912_s28, %s10433_s16 }
  0xcc   :  { %p8918_p12 = pnand %p8916_p11, %p8913_p10 }
  0xce   :  { %8921 = shalt.err (!%p8918_p12)
}
  0xcf   :  { %s8922_s27 = scalar_lea.vmem %s171_s24, 512  ;;  %p8927_p0 = scmp.lt.s32.totalorder %s171_s24, %s171_s24 }
  0xd0   :  { %p8923_p13 = scmp.ne.s32.totalorder %s171_s24, %s8922_s27  ;;  %p8928_p1 = scmp.lt.s32.totalorder %s8922_s27, %s8922_s27 }
  0xd2   :  { %p8929_p2 = por %p8928_p1, %p8927_p0 }
  0xd4   :  { %p8930_p3 = pnand %p8929_p2, %p8923_p13 }
  0xd6   :  { %8933 = shalt.err (!%p8930_p3)
}
  0xd7   :  { %176 = dma.hbm_to_vmem [thread:$0]  %s10433_s16, 512, %s171_s24, [#allocation18], %s8996_s0, %s8996_s0, %s8997_s21  }
  0xd8   :  { %s9009_s25 = smov [#allocation20]   ;;  %s8934_s1 = scalar_lea.hbm %s10436_s19, 512 }
  0xd9   :  { %s186_s22 = sshll.u32 %s9009_s25, 4  ;;  %p8935_p4 = scmp.ne.s32.totalorder %s10436_s19, %s8934_s1  ;;  %s187_s22 = int_to_ptr.vmem [resolvable:$true] %s186_s22 }
  0xda   :  { %p8938_p5 = scmp.lt.u32.totalorder %s8934_s1, %s10436_s19 }
  0xdc   :  { %p8940_p6 = pnand %p8938_p5, %p8935_p4 }
  0xde   :  { %8943 = shalt.err (!%p8940_p6)
}
  0xdf   :  { %s8944_s20 = scalar_lea.vmem %s187_s22, 512  ;;  %p8949_p8 = scmp.lt.s32.totalorder %s187_s22, %s187_s22 }
  0xe0   :  { %p8945_p7 = scmp.ne.s32.totalorder %s187_s22, %s8944_s20  ;;  %p8950_p9 = scmp.lt.s32.totalorder %s8944_s20, %s8944_s20 }
  0xe2   :  { %p8951_p10 = por %p8950_p9, %p8949_p8 }
  0xe4   :  { %p8952_p11 = pnand %p8951_p10, %p8945_p7 }
  0xe6   :  { %8955 = shalt.err (!%p8952_p11)
}
  0xe7   :  { %192 = dma.hbm_to_vmem [thread:$0]  %s10436_s19, 512, %s187_s22, [#allocation21], %s8996_s0, %s8996_s0, %s8997_s21  }
  0xe8   :  { %8978 = dma.done.wait [#allocation3], 256  }
  0xe9   :  { %8979 = vsyncadd [#allocation3], 4294967040 }
  0xea   :  { %8980 = dma.done.wait [#allocation6], 288  }
  0xeb   :  { %8981 = vsyncadd [#allocation6], 4294967008 }
  0xec   :  { %8982 = dma.done.wait [#allocation9], 768  }
  0xed   :  { %8983 = vsyncadd [#allocation9], 4294966528 }
  0xee   :  { %8984 = dma.done.wait [#allocation12], 1024  }
  0xef   :  { %8985 = vsyncadd [#allocation12], 4294966272 }
  0xf0   :  { %8986 = dma.done.wait [#allocation15], 1024  }
  0xf1   :  { %8987 = vsyncadd [#allocation15], 4294966272 }
  0xf2   :  { %8988 = dma.done.wait [#allocation18], 1024  }
  0xf3   :  { %8989 = vsyncadd [#allocation18], 4294966272 }
  0xf4   :  { %8990 = dma.done.wait [#allocation21], 512  }
  0xf5   :  { %8991 = vsyncadd [#allocation21], 4294966784  ;;  %vm247_vm0 = vcmask 261120   ;;  %v9324_v0 = vld [vmem:[#allocation2] sm:$0xff]  ;;  %v9326_v1 = vld [vmem:[#allocation2 + $0x8] sm:$0xff]  ;;  %s10456_s10 = sld [smem:[#allocation35_spill]] }
  0xf6   :  { %v248_v2 = vsel %vm247_vm0, %v9324_v0, 0.0  ;;  %v251_v3 = vsel %vm247_vm0, %v9326_v1, 0.0  ;;  %v302_v14 = vld [vmem:[%s10422_s5] sm:$0xff]  ;;  %v303_v15 = vld [vmem:[%s10422_s5 + $0x8] sm:$0xff]  ;;  %v304_v16 = vld [vmem:[%s10422_s5 + $0x10] sm:$0xff]  ;;  %v9010_v47 = vmov 0.0  }
  0xf7   :  { %249 = vadd.xlane.f32.xlu0 %v248_v2  ;;  %v8337_v17 = vpack.c.bf16 %v303_v15, %v302_v14  ;;  %v305_v18 = vld [vmem:[%s10422_s5 + $0x18] sm:$0xff]  ;;  %7847 = vmatprep.subr.mxu1 %v9010_v47  ;;  %vm9011_vm5 = vmmov 0   ;;  %s9012_s1 = smov 120   ;;  %s9013_s18 = smov 112   ;;  %vm408_vm6 = vcmask 64512   ;;  %vm1737_vm9 = vcmask 130048  }
  0xf8   :  { %v8341_v19 = vpack.c.bf16 %v305_v18, %v304_v16  ;;  %7849 = vmatprep.mubr.msk.f32.mxu1 %vm9011_vm5, %v9010_v47  ;;  %s9014_s12 = smov 104   ;;  %s9015_s2 = smov 96   ;;  %vm1740_vm10 = vcmask 195584  }
  0xf9   :  { %8338 = vmatprep.subr.bf16.mxu0 %v8337_v17  ;;  %s9016_s30 = smov 64  }
  0xfa   :  { %8340 = vmatpush3.bf16.msra.mxu0 %v8337_v17 }
  0xfb   :  { %252 = vadd.xlane.f32.xlu0 %v251_v3  ;;  %8342 = vmatprep.subr.bf16.mxu0 %v8341_v19  ;;  %v7455_v36 = vld [vmem:[%s10456_s10] ss:$0 sm:$0xff]  ;;  %v7456_v39 = vld [vmem:[%s10456_s10 + $0x1] ss:$0 sm:$0xff]  ;;  %v7457_v46 = vld [vmem:[%s10456_s10 + $0x2] ss:$0 sm:$0xff] }
  0xfe   :  { %8344 = vmatpush3.bf16.msra.mxu0 %v8341_v19 }
  0xff   :  { %7867 = vmatprep.subr.mxu0 %v9010_v47 }
 0x184   :  { %v250_v4 = vpop.xlane.xlu0 %249 }
 0x185   :  { %v255_v5 = vmul.f32 0.03125, %v250_v4  ;;  %v233_v4 = vld [vmem:[#allocation8] sm:$0xff] }
 0x186   :  { %vm235_vm7 = vcmp.eq.s32.totalorder %v233_v4, 0 }
 0x187   :  { %v257_v6 = vsub.f32 %v9324_v0, %v255_v5  ;;  %v9458_v5 = vsel %vm235_vm7, -1e+09, %v9010_v47 }
 0x188   :  { %v253_v7 = vpop.xlane.xlu0 %252 }
 0x189   :  { %v256_v8 = vmul.f32 0.03125, %v253_v7  ;;  %v259_v9 = vmul.f32 %v257_v6, %v257_v6  ;;  %v274_v37 = vmul.f32 %v7455_v36, %v257_v6  ;;  %v234_v6 = vld [vmem:[#allocation8 + $0x8] sm:$0xff] }
 0x18a   :  { %vm236_vm8 = vcmp.eq.s32.totalorder %v234_v6, 0 }
 0x18b   :  { %v258_v10 = vsub.f32 %v9326_v1, %v256_v8  ;;  %v261_v11 = vsel %vm247_vm0, %v259_v9, 0.0 }
 0x18c   :  { %262 = vadd.xlane.f32.xlu1 %v261_v11  ;;  %v9463_v11 = vsel %vm236_vm8, -1e+09, %v9010_v47  ;;  %vm3677_vm8 = vcmask 523264  }
 0x18d   :  { %v260_v12 = vmul.f32 %v258_v10, %v258_v10  ;;  %v275_v41 = vmul.f32 %v7455_v36, %v258_v10 }
 0x18f   :  { %v264_v13 = vsel %vm247_vm0, %v260_v12, 0.0 }
 0x190   :  { %265 = vadd.xlane.f32.xlu1 %v264_v13 }
 0x219   :  { %v263_v20 = vpop.xlane.xlu1 %262 }
 0x21a   :  { %v268_v21 = vmul.f32 0.032258064, %v263_v20 }
 0x21c   :  { %8498 = vrsqrt.f32 %v268_v21  ;;  %vm278_vm1 = vcmp.eq.f32.partialorder %v268_v21, inf  ;;  %v281_v26 = vand.u32 2147483648, %v268_v21  ;;  %vm280_vm2 = vcmp.eq.f32.partialorder %v268_v21, 0.0 }
 0x21d   :  { %v266_v22 = vpop.xlane.xlu1 %265 }
 0x21e   :  { %v269_v23 = vmul.f32 0.032258064, %v266_v22 }
 0x220   :  { %8500 = vrsqrt.f32 %v269_v23  ;;  %vm285_vm3 = vcmp.eq.f32.partialorder %v269_v23, inf  ;;  %v288_v32 = vand.u32 2147483648, %v269_v23  ;;  %vm287_vm4 = vcmp.eq.f32.partialorder %v269_v23, 0.0 }
 0x226   :  { %v8499_v24 = vpop.eup %8498 }
 0x227   :  { %v277_v25 = vmul.f32 %v8499_v24, %v268_v21 }
 0x229   :  { %v279_v27 = vsel %vm278_vm1, %v268_v21, %v277_v25 }
 0x22a   :  { %v8501_v28 = vpop.eup %8500  ;;  %v282_v29 = vsel %vm280_vm2, %v281_v26, %v279_v27 }
 0x22b   :  { %v284_v30 = vmul.f32 %v8501_v28, %v269_v23  ;;  %v290_v31 = vadd.f32 1e-06, %v282_v29 }
 0x22d   :  { %v286_v33 = vsel %vm285_vm3, %v269_v23, %v284_v30  ;;  %8502 = vrcp.f32 %v290_v31 }
 0x22e   :  { %v289_v34 = vsel %vm287_vm4, %v288_v32, %v286_v33 }
 0x22f   :  { %v291_v35 = vadd.f32 1e-06, %v289_v34 }
 0x231   :  { %8504 = vrcp.f32 %v291_v35 }
 0x237   :  { %v8503_v38 = vpop.eup %8502 }
 0x238   :  { %v293_v40 = vmul.f32 %v8503_v38, %v274_v37 }
 0x23a   :  { %v300_v42 = vadd.f32 %v7456_v39, %v293_v40 }
 0x23b   :  { %v8505_v43 = vpop.eup %8504 }
 0x23c   :  { %v295_v44 = vmul.f32 %v8505_v43, %v275_v41  ;;  %7844 = vmatprep.mubr.msk.f32.mxu0 %vm247_vm0, %v300_v42 }
 0x23e   :  { %v301_v45 = vadd.f32 %v7456_v39, %v295_v44 }
 0x240   :  { %7845 = vmatmul.mubr.msk.f32.vlgmr.msra.gmra.mrb[0].mxu0 %vm247_vm0, %v301_v45 }
 0x241   :  { %7869 = vmatprep.mubr.msk.f32.mxu0 %vm9011_vm5, %v9010_v47 }
 0x313   :  { %v7846_v48 = vpop.f32.mrb[0].mxu0 }
 0x314   :  { %v9365_v49 = vadd.f32 %v7846_v48, %v7457_v46  ;;  %v383_v50 = vpop.f32.mrb[1].mxu0 }
 0x315   :  { %v9367_v51 = vadd.f32 %v7457_v46, %v383_v50 }
 0x316   :  { %396 = vrot.lane.b32.xlu1 %v9365_v49, %s9012_s1 }
 0x317   :  { %394 = vrot.lane.b32.xlu0 %v9367_v51, %s9012_s1 }
 0x31a   :  { %398 = vrot.lane.b32.xlu1 %v9367_v51, %s9013_s18 }
 0x31b   :  { %402 = vrot.lane.b32.xlu0 %v9367_v51, %s9014_s12 }
 0x31e   :  { %400 = vrot.lane.b32.xlu1 %v9365_v49, %s9013_s18 }
 0x31f   :  { %406 = vrot.lane.b32.xlu0 %v9367_v51, %s9015_s2 }
 0x322   :  { %404 = vrot.lane.b32.xlu1 %v9365_v49, %s9014_s12 }
 0x326   :  { %483 = vrot.lane.b32.xlu1 %v9365_v49, %s9015_s2 }
 0x388   :  { %v9385_v52 = vpop.permute.xlu1 %396 }
 0x389   :  { %635 = vrot.lane.b32.xlu1 %v9385_v52, %s9015_s2  ;;  %v9389_v53 = vpop.permute.xlu0 %394 }
 0x38a   :  { %559 = vrot.lane.b32.xlu0 %v9389_v53, %s9015_s2 }
 0x38c   :  { %v9393_v54 = vpop.permute.xlu1 %398 }
 0x38d   :  { %v9395_v55 = vpop.permute.xlu0 %402 }
 0x38e   :  { %711 = vrot.lane.b32.xlu0 %v9393_v54, %s9015_s2 }
 0x390   :  { %v9399_v56 = vpop.permute.xlu1 %400 }
 0x391   :  { %787 = vrot.lane.b32.xlu1 %v9399_v56, %s9015_s2  ;;  %v407_v57 = vpop.permute.xlu0 %406 }
 0x392   :  { %863 = vrot.lane.b32.xlu0 %v9395_v55, %s9015_s2  ;;  %7848 = vmatpush3.xpose.msk.msra.mxu1 %vm408_vm6, %v407_v57 }
 0x393   :  { %7852 = vmatprep.subr.mxu1 %v9010_v47 }
 0x394   :  { %v9407_v58 = vpop.permute.xlu1 %404 }
 0x395   :  { %939 = vrot.lane.b32.xlu1 %v9407_v58, %s9015_s2  ;;  %7850 = vmatmul.mubr.msk.f32.vlgmr.msra.gmra.mrb[0].mxu1 %vm408_vm6, %v9367_v51 }
 0x396   :  { %7854 = vmatprep.mubr.msk.f32.mxu1 %vm9011_vm5, %v9010_v47 }
 0x398   :  { %v484_v59 = vpop.permute.xlu1 %483 }
 0x399   :  { %7853 = vmatpush3.xpose.msk.msra.mxu1 %vm408_vm6, %v484_v59 }
 0x39a   :  { %7857 = vmatprep.subr.mxu1 %v9010_v47 }
 0x39c   :  { %7855 = vmatmul.mubr.msk.f32.vlgmr.msra.gmra.mrb[2].mxu1 %vm408_vm6, %v9365_v49 }
 0x39d   :  { %7859 = vmatprep.mubr.msk.f32.mxu1 %vm9011_vm5, %v9010_v47 }
 0x3fb   :  { %v636_v61 = vpop.permute.xlu1 %635 }
 0x3fc   :  { %v560_v60 = vpop.permute.xlu0 %559 }
 0x3fd   :  { %7858 = vmatpush3.xpose.msk.msra.mxu1 %vm408_vm6, %v560_v60 }
 0x3fe   :  { %7862 = vmatprep.subr.mxu1 %v9010_v47 }
 0x400   :  { %7860 = vmatmul.mubr.msk.f32.vlgmr.msra.gmra.mrb[4].mxu1 %vm408_vm6, %v9389_v53  ;;  %v712_v62 = vpop.permute.xlu0 %711 }
 0x401   :  { %7863 = vmatpush3.xpose.msk.msra.mxu1 %vm408_vm6, %v636_v61  ;;  %7868 = vmatpush3.xpose.msk.msra.mxu0 %vm408_vm6, %v712_v62 }
 0x402   :  { %7864 = vmatprep.mubr.msk.f32.mxu1 %vm9011_vm5, %v9010_v47  ;;  %7872 = vmatprep.subr.mxu1 %v9010_v47 }
 0x403   :  { %v788_v63 = vpop.permute.xlu1 %787  ;;  %7877 = vmatprep.subr.mxu0 %v9010_v47 }
 0x404   :  { %7865 = vmatmul.mubr.msk.f32.vlgmr.msra.gmra.mrb[6].mxu1 %vm408_vm6, %v9385_v52  ;;  %7870 = vmatmul.mubr.msk.f32.vlgmr.msra.gmra.mrb[2].mxu0 %vm408_vm6, %v9393_v54  ;;  %v864_v2 = vpop.permute.xlu0 %863 }
 0x405   :  { %7873 = vmatpush3.xpose.msk.msra.mxu1 %vm408_vm6, %v788_v63  ;;  %7878 = vmatpush3.xpose.msk.msra.mxu0 %vm408_vm6, %v864_v2 }
 0x406   :  { %7874 = vmatprep.mubr.msk.f32.mxu1 %vm9011_vm5, %v9010_v47  ;;  %7879 = vmatprep.mubr.msk.f32.mxu0 %vm9011_vm5, %v9010_v47 }
 0x407   :  { %v940_v3 = vpop.permute.xlu1 %939  ;;  %7882 = vmatprep.subr.mxu1 %v9010_v47  ;;  %7887 = vmatprep.subr.mxu0 %v9010_v47 }
 0x408   :  { %7875 = vmatmul.mubr.msk.f32.vlgmr.msra.gmra.mrb[8].mxu1 %vm408_vm6, %v9399_v56  ;;  %7880 = vmatmul.mubr.msk.f32.vlgmr.msra.gmra.mrb[4].mxu0 %vm408_vm6, %v9395_v55 }
 0x409   :  { %7883 = vmatpush3.xpose.msk.msra.mxu1 %vm408_vm6, %v940_v3  ;;  %7884 = vmatprep.mubr.msk.f32.mxu1 %vm9011_vm5, %v9010_v47 }
 0x40a   :  { %7892 = vmatprep.subr.mxu1 %v9010_v47  ;;  %7889 = vmatprep.mubr.msk.f32.mxu0 %vm9011_vm5, %v9010_v47 }
 0x40c   :  { %7885 = vmatmul.mubr.msk.f32.vlgmr.msra.gmra.mrb[10].mxu1 %vm408_vm6, %v9407_v58 }
 0x40d   :  { %7894 = vmatprep.mubr.msk.f32.mxu1 %vm9011_vm5, %v9010_v47 }
 0x468   :  { %v479_v7 = vpop.f32.mrb[0].mxu1 }
 0x469   :  { %v480_v8 = vadd.f32 %v479_v7, %v9458_v5  ;;  %v7851_v9 = vpop.f32.mrb[1].mxu1 }
 0x46b   :  { %v1015_v10 = vsel %vm408_vm6, %v480_v8, -inf }
 0x46c   :  { %1016 = vmax.xlane.f32.xlu0 %v1015_v10 }
 0x46f   :  { %v555_v12 = vpop.f32.mrb[2].mxu1 }
 0x470   :  { %v556_v13 = vadd.f32 %v555_v12, %v9463_v11  ;;  %v7856_v14 = vpop.f32.mrb[3].mxu1 }
 0x472   :  { %v1018_v15 = vsel %vm408_vm6, %v556_v13, -inf }
 0x473   :  { %1019 = vmax.xlane.f32.xlu1 %v1018_v15 }
 0x4d3   :  { %v631_v16 = vpop.f32.mrb[4].mxu1 }
 0x4d4   :  { %v632_v17 = vadd.f32 %v631_v16, %v9458_v5  ;;  %v7861_v18 = vpop.f32.mrb[5].mxu1 }
 0x4d6   :  { %v1021_v19 = vsel %vm408_vm6, %v632_v17, -inf }
 0x4d7   :  { %1022 = vmax.xlane.f32.xlu0 %v1021_v19  ;;  %v707_v20 = vpop.f32.mrb[6].mxu1  ;;  %v783_v21 = vpop.f32.mrb[2].mxu0 }
 0x4d8   :  { %v708_v22 = vadd.f32 %v707_v20, %v9463_v11  ;;  %v7866_v23 = vpop.f32.mrb[7].mxu1  ;;  %v7871_v24 = vpop.f32.mrb[3].mxu0  ;;  %v784_v25 = vadd.f32 %v783_v21, %v9458_v5 }
 0x4da   :  { %v1024_v26 = vsel %vm408_vm6, %v708_v22, -inf  ;;  %v1027_v34 = vsel %vm408_vm6, %v784_v25, -inf }
 0x4db   :  { %1025 = vmax.xlane.f32.xlu0 %v1024_v26  ;;  %v859_v27 = vpop.f32.mrb[8].mxu1  ;;  %v935_v28 = vpop.f32.mrb[4].mxu0 }
 0x4dc   :  { %v860_v29 = vadd.f32 %v859_v27, %v9463_v11  ;;  %v7876_v30 = vpop.f32.mrb[9].mxu1  ;;  %v7881_v31 = vpop.f32.mrb[5].mxu0  ;;  %v936_v32 = vadd.f32 %v935_v28, %v9458_v5 }
 0x4de   :  { %v1030_v33 = vsel %vm408_vm6, %v860_v29, -inf  ;;  %v1033_v39 = vsel %vm408_vm6, %v936_v32, -inf }
 0x4df   :  { %1031 = vmax.xlane.f32.xlu1 %v1030_v33  ;;  %v1011_v35 = vpop.f32.mrb[10].mxu1  ;;  %1028 = vmax.xlane.f32.xlu0 %v1027_v34 }
 0x4e0   :  { %v1012_v36 = vadd.f32 %v1011_v35, %v9463_v11  ;;  %v7886_v37 = vpop.f32.mrb[11].mxu1 }
 0x4e2   :  { %v1036_v38 = vsel %vm408_vm6, %v1012_v36, -inf }
 0x4e3   :  { %1037 = vmax.xlane.f32.xlu1 %v1036_v38  ;;  %1034 = vmax.xlane.f32.xlu0 %v1033_v39 }
 0x4f4   :  { %1179 = vrot.lane.b32.xlu1 %v9365_v49, %s9016_s30 }
 0x4f8   :  { %1255 = vrot.lane.b32.xlu1 %v9389_v53, %s9016_s30 }
 0x4f9   :  { %1103 = vrot.lane.b32.xlu0 %v9367_v51, %s9016_s30  ;;  %v1017_v40 = vpop.xlane.xlu0 %1016 }
 0x4fa   :  { %v1039_v41 = vsub.f32 %v480_v8, %v1017_v40 }
 0x4fc   :  { %1331 = vrot.lane.b32.xlu1 %v9385_v52, %s9016_s30  ;;  %v1047_v42 = vmul.f32 1.442695, %v1039_v41 }
 0x4fd   :  { %1407 = vrot.lane.b32.xlu0 %v9393_v54, %s9016_s30 }
 0x4fe   :  { %8506 = vpow2.f32 %v1047_v42 }
 0x500   :  { %1483 = vrot.lane.b32.xlu1 %v9399_v56, %s9016_s30  ;;  %v1020_v43 = vpop.xlane.xlu1 %1019 }
 0x501   :  { %v1040_v44 = vsub.f32 %v556_v13, %v1020_v43 }
 0x503   :  { %v1049_v45 = vmul.f32 1.442695, %v1040_v44 }
 0x505   :  { %8508 = vpow2.f32 %v1049_v45 }
 0x508   :  { %v9491_v46 = vpop.eup %8506 }
 0x509   :  { %v1063_v48 = vsel %vm408_vm6, %v9491_v46, 0.0 }
 0x50f   :  { %v9495_v49 = vpop.eup %8508 }
 0x510   :  { %v1066_v50 = vsel %vm408_vm6, %v9495_v49, 0.0 }
 0x51c   :  { %1064 = vadd.xlane.f32.xlu0 %v1063_v48 }
 0x524   :  { %1067 = vadd.xlane.f32.xlu1 %v1066_v50 }
 0x564   :  { %v1023_v51 = vpop.xlane.xlu0 %1022 }
 0x565   :  { %v1041_v52 = vsub.f32 %v632_v17, %v1023_v51 }
 0x567   :  { %v1051_v53 = vmul.f32 1.442695, %v1041_v52 }
 0x568   :  { %v1026_v54 = vpop.xlane.xlu0 %1025 }
 0x569   :  { %8510 = vpow2.f32 %v1051_v53  ;;  %v1042_v56 = vsub.f32 %v708_v22, %v1026_v54 }
 0x56b   :  { %v1053_v57 = vmul.f32 1.442695, %v1042_v56 }
 0x56c   :  { %v1032_v59 = vpop.xlane.xlu1 %1031  ;;  %v1029_v60 = vpop.xlane.xlu0 %1028 }
 0x56d   :  { %8512 = vpow2.f32 %v1053_v57  ;;  %v1044_v61 = vsub.f32 %v860_v29, %v1032_v59  ;;  %v1043_v62 = vsub.f32 %v784_v25, %v1029_v60  ;;  %v1743_v60 = vld [vmem:[%s10423_s6] sm:$0xff] }
 0x56f   :  { %v1057_v63 = vmul.f32 1.442695, %v1044_v61  ;;  %v1055_v2 = vmul.f32 1.442695, %v1043_v62  ;;  %v1744_v61 = vld [vmem:[%s10423_s6 + $0x8] sm:$0xff] }
 0x570   :  { %v1038_v3 = vpop.xlane.xlu1 %1037  ;;  %v1035_v4 = vpop.xlane.xlu0 %1034  ;;  %v8345_v62 = vpack.c.bf16 %v1744_v61, %v1743_v60  ;;  %v1894_v60 = vld [vmem:[%s10424_s7 + $0x18] sm:$0xff] }
 0x571   :  { %8514 = vpow2.f32 %v1057_v63  ;;  %v1046_v6 = vsub.f32 %v1012_v36, %v1038_v3  ;;  %v1045_v7 = vsub.f32 %v936_v32, %v1035_v4  ;;  %v1745_v63 = vld [vmem:[%s10423_s6 + $0x10] sm:$0xff] }
 0x572   :  { %8516 = vpow2.f32 %v1055_v2  ;;  %v1746_v2 = vld [vmem:[%s10423_s6 + $0x18] sm:$0xff]  ;;  %s9017_s6 = smov 24  }
 0x573   :  { %v8511_v8 = vpop.eup %8510  ;;  %v1061_v9 = vmul.f32 1.442695, %v1046_v6  ;;  %v1059_v10 = vmul.f32 1.442695, %v1045_v7  ;;  %v8349_v3 = vpack.c.bf16 %v1746_v2, %v1745_v63 }
 0x574   :  { %v1180_v12 = vpop.permute.xlu1 %1179  ;;  %v1104_v13 = vpop.permute.xlu0 %1103  ;;  %v1069_v14 = vsel %vm408_vm6, %v8511_v8, 0.0 }
 0x575   :  { %8518 = vpow2.f32 %v1061_v9  ;;  %7893 = vmatpush3.msra.mxu1 %v1180_v12  ;;  %1070 = vadd.xlane.f32.xlu0 %v1069_v14 }
 0x576   :  { %8520 = vpow2.f32 %v1059_v10  ;;  %7888 = vmatpush3.msra.mxu0 %v1104_v13  ;;  %7902 = vmatprep.subr.mxu1 %v9010_v47 }
 0x577   :  { %v8513_v15 = vpop.eup %8512  ;;  %7897 = vmatprep.subr.mxu0 %v9010_v47 }
 0x578   :  { %v1072_v16 = vsel %vm408_vm6, %v8513_v15, 0.0  ;;  %v1256_v25 = vpop.permute.xlu1 %1255  ;;  %v1408_v26 = vpop.permute.xlu0 %1407 }
 0x579   :  { %1073 = vadd.xlane.f32.xlu1 %v1072_v16 }
 0x57b   :  { %v8515_v17 = vpop.eup %8514 }
 0x57c   :  { %v8517_v18 = vpop.eup %8516  ;;  %v1078_v19 = vsel %vm408_vm6, %v8515_v17, 0.0  ;;  %v1332_v27 = vpop.permute.xlu1 %1331 }
 0x57d   :  { %1079 = vadd.xlane.f32.xlu1 %v1078_v19  ;;  %v1075_v20 = vsel %vm408_vm6, %v8517_v18, 0.0 }
 0x57e   :  { %1076 = vadd.xlane.f32.xlu0 %v1075_v20 }
 0x57f   :  { %v9505_v21 = vpop.eup %8518 }
 0x580   :  { %v9507_v22 = vpop.eup %8520  ;;  %v1084_v23 = vsel %vm408_vm6, %v9505_v21, 0.0  ;;  %v1484_v29 = vpop.permute.xlu1 %1483 }
 0x581   :  { %1085 = vadd.xlane.f32.xlu1 %v1084_v23  ;;  %v1081_v24 = vsel %vm408_vm6, %v9507_v22, 0.0 }
 0x582   :  { %1082 = vadd.xlane.f32.xlu0 %v1081_v24 }
 0x592   :  { %1635 = vrot.lane.b32.xlu1 %v9407_v58, %s9016_s30 }
 0x598   :  { %1559 = vrot.lane.b32.xlu0 %v9395_v55, %s9016_s30 }
 0x5a9   :  { %v1065_v28 = vpop.xlane.xlu0 %1064 }
 0x5aa   :  { %8522 = vrcp.f32 %v1065_v28 }
 0x5b1   :  { %v1068_v30 = vpop.xlane.xlu1 %1067 }
 0x5b2   :  { %8524 = vrcp.f32 %v1068_v30 }
 0x5b4   :  { %v8523_v31 = vpop.eup %8522 }
 0x5b5   :  { %v1095_v32 = vmul.f32 %v8523_v31, %v9491_v46  ;;  %v7486_v31 = vld [vmem:[%s10456_s10 + $0x3] ss:$0 sm:$0xff] }
 0x5b7   :  { %7890 = vmatmul.mubr.msk.f32.vlgmr.msra.gmra.mrb[6].mxu0 %vm408_vm6, %v1095_v32 }
 0x5b8   :  { %7898 = vmatpush3.msra.mxu0 %v1256_v25  ;;  %7899 = vmatprep.mubr.msk.f32.mxu0 %vm9011_vm5, %v9010_v47 }
 0x5b9   :  { %7907 = vmatprep.subr.mxu0 %v9010_v47 }
 0x5bc   :  { %v8525_v55 = vpop.eup %8524 }
 0x5bd   :  { %v1096_v58 = vmul.f32 %v8525_v55, %v9495_v49 }
 0x5bf   :  { %7895 = vmatmul.mubr.msk.f32.vlgmr.msra.gmra.mrb[12].mxu1 %vm408_vm6, %v1096_v58 }
 0x5c0   :  { %7903 = vmatpush3.msra.mxu1 %v1332_v27  ;;  %7904 = vmatprep.mubr.msk.f32.mxu1 %vm9011_vm5, %v9010_v47 }
 0x5c1   :  { %7912 = vmatprep.subr.mxu1 %v9010_v47 }
 0x602   :  { %v1071_v33 = vpop.xlane.xlu0 %1070 }
 0x603   :  { %8526 = vrcp.f32 %v1071_v33 }
 0x606   :  { %v1074_v34 = vpop.xlane.xlu1 %1073 }
 0x607   :  { %8528 = vrcp.f32 %v1074_v34 }
 0x60a   :  { %v1080_v35 = vpop.xlane.xlu1 %1079 }
 0x60b   :  { %8530 = vrcp.f32 %v1080_v35  ;;  %v1077_v36 = vpop.xlane.xlu0 %1076 }
 0x60c   :  { %8532 = vrcp.f32 %v1077_v36 }
 0x60d   :  { %v8527_v37 = vpop.eup %8526 }
 0x60e   :  { %v1086_v38 = vpop.xlane.xlu1 %1085  ;;  %v1097_v39 = vmul.f32 %v8527_v37, %v8511_v8 }
 0x60f   :  { %8534 = vrcp.f32 %v1086_v38  ;;  %v1083_v40 = vpop.xlane.xlu0 %1082 }
 0x610   :  { %8536 = vrcp.f32 %v1083_v40  ;;  %7900 = vmatmul.mubr.msk.f32.vlgmr.msra.gmra.mrb[8].mxu0 %vm408_vm6, %v1097_v39 }
 0x611   :  { %v8529_v41 = vpop.eup %8528  ;;  %7908 = vmatpush3.msra.mxu0 %v1408_v26  ;;  %7909 = vmatprep.mubr.msk.f32.mxu0 %vm9011_vm5, %v9010_v47 }
 0x612   :  { %v1098_v42 = vmul.f32 %v8529_v41, %v8513_v15  ;;  %7917 = vmatprep.subr.mxu0 %v9010_v47  ;;  %v1636_v48 = vpop.permute.xlu1 %1635 }
 0x613   :  { %v1560_v50 = vpop.permute.xlu0 %1559 }
 0x614   :  { %7905 = vmatmul.mubr.msk.f32.vlgmr.msra.gmra.mrb[14].mxu1 %vm408_vm6, %v1098_v42 }
 0x615   :  { %v8531_v43 = vpop.eup %8530  ;;  %7913 = vmatpush3.msra.mxu1 %v1484_v29  ;;  %7914 = vmatprep.mubr.msk.f32.mxu1 %vm9011_vm5, %v9010_v47 }
 0x616   :  { %v8533_v44 = vpop.eup %8532  ;;  %7922 = vmatprep.subr.mxu1 %v9010_v47  ;;  %v1100_v45 = vmul.f32 %v8531_v43, %v8515_v17 }
 0x617   :  { %v1099_v46 = vmul.f32 %v8533_v44, %v8517_v18 }
 0x618   :  { %7915 = vmatmul.mubr.msk.f32.vlgmr.msra.gmra.mrb[16].mxu1 %vm408_vm6, %v1100_v45  ;;  %v1981_v45 = vld [vmem:[%s10425_s8] sm:$0xff] }
 0x619   :  { %v8535_v49 = vpop.eup %8534  ;;  %7910 = vmatmul.mubr.msk.f32.vlgmr.msra.gmra.mrb[10].mxu0 %vm408_vm6, %v1099_v46  ;;  %7923 = vmatpush3.msra.mxu1 %v1636_v48  ;;  %v1982_v46 = vld [vmem:[%s10425_s8 + $0x8] sm:$0xff] }
 0x61a   :  { %v8537_v51 = vpop.eup %8536  ;;  %7918 = vmatpush3.msra.mxu0 %v1560_v50  ;;  %7919 = vmatprep.mubr.msk.f32.mxu0 %vm9011_vm5, %v9010_v47  ;;  %v1102_v52 = vmul.f32 %v8535_v49, %v9505_v21  ;;  %v8361_v48 = vpack.c.bf16 %v1982_v46, %v1981_v45  ;;  %v1983_v49 = vld [vmem:[%s10425_s8 + $0x10] sm:$0xff]  ;;  %v1984_v50 = vld [vmem:[%s10425_s8 + $0x18] sm:$0xff]  ;;  %s10457_s8 = sld [smem:[#allocation36_spill]] }
 0x61b   :  { %7924 = vmatprep.mubr.msk.f32.mxu1 %vm9011_vm5, %v9010_v47  ;;  %v1101_v53 = vmul.f32 %v8537_v51, %v9507_v22  ;;  %8346 = vmatprep.subr.bf16.mxu0 %v8345_v62  ;;  %v8365_v51 = vpack.c.bf16 %v1984_v50, %v1983_v49  ;;  %v2101_v49 = vlaneseq  ;;  %v239_v50 = vld [vmem:[#allocation7] sm:$0x1] }
 0x61c   :  { %7925 = vmatmul.mubr.msk.f32.vlgmr.msra.gmra.mrb[18].mxu1 %vm408_vm6, %v1102_v52  ;;  %v231_v52 = vld [vmem:[#allocation5] sm:$0xff]  ;;  %vm241_vm15 = vcmp.eq.s32.totalorder %v239_v50, 0 }
 0x61d   :  { %7920 = vmatmul.mubr.msk.f32.vlgmr.msra.gmra.mrb[12].mxu0 %vm408_vm6, %v1101_v53  ;;  %v232_v53 = vld [vmem:[#allocation5 + $0x8] sm:$0xff] }
 0x61e   :  { %8348 = vmatpush3.bf16.msra.mxu0 %v8345_v62 }
 0x61f   :  { %8350 = vmatprep.subr.bf16.mxu0 %v8349_v3 }
 0x622   :  { %8352 = vmatpush3.bf16.msra.mxu0 %v8349_v3 }
 0x623   :  { %8362 = vmatprep.subr.bf16.mxu0 %v8361_v48 }
 0x68a   :  { %v1175_v54 = vpop.f32.mrb[6].mxu0 }
 0x68b   :  { %v7891_v56 = vpop.f32.mrb[7].mxu0 }
 0x68c   :  { %v1892_v56 = vld [vmem:[%s10424_s7 + $0x8] sm:$0xff] }
 0x692   :  { %v1251_v57 = vpop.f32.mrb[12].mxu1 }
 0x693   :  { %v7896_v59 = vpop.f32.mrb[13].mxu1 }
 0x694   :  { %v1893_v59 = vld [vmem:[%s10424_s7 + $0x10] sm:$0xff] }
 0x695   :  { %v8357_v61 = vpack.c.bf16 %v1894_v60, %v1893_v59 }
 0x6e3   :  { %v1327_v4 = vpop.f32.mrb[8].mxu0 }
 0x6e4   :  { %1713 = vrot.lane.b32.xlu0 %v1327_v4, %s8997_s21  ;;  %v7901_v6 = vpop.f32.mrb[9].mxu0 }
 0x6e7   :  { %v1403_v7 = vpop.f32.mrb[14].mxu1 }
 0x6e8   :  { %1715 = vrot.lane.b32.xlu1 %v1403_v7, %s8997_s21  ;;  %v7906_v8 = vpop.f32.mrb[15].mxu1 }
 0x6eb   :  { %v1555_v9 = vpop.f32.mrb[16].mxu1 }
 0x6ec   :  { %v1479_v10 = vpop.f32.mrb[10].mxu0  ;;  %1723 = vrot.lane.b32.xlu1 %v1555_v9, %s9003_s26  ;;  %v7916_v12 = vpop.f32.mrb[17].mxu1 }
 0x6ed   :  { %1721 = vrot.lane.b32.xlu0 %v1479_v10, %s9003_s26  ;;  %v7911_v13 = vpop.f32.mrb[11].mxu0 }
 0x6ef   :  { %v1707_v14 = vpop.f32.mrb[18].mxu1 }
 0x6f0   :  { %v1631_v15 = vpop.f32.mrb[12].mxu0  ;;  %1731 = vrot.lane.b32.xlu1 %v1707_v14, %s9017_s6  ;;  %v7926_v16 = vpop.f32.mrb[19].mxu1 }
 0x6f1   :  { %1729 = vrot.lane.b32.xlu0 %v1631_v15, %s9017_s6  ;;  %v7921_v17 = vpop.f32.mrb[13].mxu0 }
 0x756   :  { %v1714_v19 = vpop.permute.xlu0 %1713 }
 0x757   :  { %v1735_v23 = vsel %vm408_vm6, %v1175_v54, %v1714_v19  ;;  %v1891_v54 = vld [vmem:[%s10424_s7] sm:$0xff] }
 0x75a   :  { %v1716_v18 = vpop.permute.xlu1 %1715 }
 0x75b   :  { %v1736_v22 = vsel %vm408_vm6, %v1251_v57, %v1716_v18  ;;  %v8353_v57 = vpack.c.bf16 %v1892_v56, %v1891_v54  ;;  %v7487_v18 = vld [vmem:[%s10456_s10 + $0x4] ss:$0 sm:$0xff]  ;;  %v243_v54 = vsel %vm241_vm15, -1e+09, %v9010_v47 }
 0x75d   :  { %8354 = vmatprep.subr.bf16.mxu1 %v8353_v57 }
 0x75e   :  { %v1724_v20 = vpop.permute.xlu1 %1723  ;;  %8356 = vmatpush3.bf16.msra.mxu1 %v8353_v57 }
 0x75f   :  { %v1722_v21 = vpop.permute.xlu0 %1721  ;;  %v1739_v24 = vsel %vm1737_vm9, %v1736_v22, %v1724_v20  ;;  %8358 = vmatprep.subr.bf16.mxu1 %v8357_v61 }
 0x760   :  { %v1738_v26 = vsel %vm1737_vm9, %v1735_v23, %v1722_v21  ;;  %v7488_v21 = vld [vmem:[%s10456_s10 + $0x5] ss:$0 sm:$0xff] }
 0x762   :  { %v1732_v25 = vpop.permute.xlu1 %1731  ;;  %8360 = vmatpush3.bf16.msra.mxu1 %v8357_v61 }
 0x763   :  { %v1742_v27 = vsel %vm1740_vm10, %v1739_v24, %v1732_v25  ;;  %v1730_v28 = vpop.permute.xlu0 %1729  ;;  %7960 = vmatprep.subr.mxu1 %v9010_v47 }
 0x764   :  { %v1741_v29 = vsel %vm1740_vm10, %v1738_v26, %v1730_v28  ;;  %v7492_v28 = vld [vmem:[%s10456_s10 + $0x7] ss:$0 sm:$0xff] }
 0x765   :  { %7935 = vmatprep.mubr.msk.f32.mxu0 %vm247_vm0, %v1741_v29 }
 0x766   :  { %7936 = vmatmul.mubr.msk.f32.vlgmr.msra.gmra.mrb[14].mxu0 %vm247_vm0, %v1742_v27 }
 0x767   :  { %8364 = vmatpush3.bf16.msra.mxu0 %v8361_v48  ;;  %7957 = vmatprep.mubr.msk.f32.mxu0 %vm247_vm0, %v231_v52  ;;  %v240_v52 = vld [vmem:[#allocation7 + $0x1] sm:$0x1] }
 0x768   :  { %8366 = vmatprep.subr.bf16.mxu0 %v8365_v51  ;;  %vm242_vm1 = vcmp.eq.s32.totalorder %v240_v52, 0 }
 0x769   :  { %v244_v57 = vsel %vm242_vm1, -1e+09, %v9010_v47 }
 0x76b   :  { %8368 = vmatpush3.bf16.msra.mxu0 %v8365_v51  ;;  %v2102_v51 = vshrl.u32 %v2101_v49, 7 }
 0x76c   :  { %7970 = vmatprep.subr.mxu0 %v9010_v47 }
 0x76e   :  { %7958 = vmatmul.mubr.msk.f32.vlgmr.msra.gmra.mrb[16].mxu0 %vm247_vm0, %v232_v53  ;;  %v2103_v53 = vsub.s32 0, %v2102_v51 }
 0x76f   :  { %7972 = vmatprep.mubr.msk.f32.mxu0 %vm9011_vm5, %v9010_v47 }
 0x770   :  { %v9722_v56 = vrot.slane %v243_v54, %v2103_v53 }
 0x839   :  { %v7937_v30 = vpop.f32.mrb[14].mxu0 }
 0x83a   :  { %v1829_v32 = vadd.f32 %v7937_v30, %v9326_v1  ;;  %v1819_v55 = vpop.f32.mrb[15].mxu0 }
 0x83b   :  { %v1828_v58 = vadd.f32 %v1819_v55, %v9324_v0 }
 0x83c   :  { %v9576_v33 = vadd.f32 %v7486_v31, %v1829_v32 }
 0x83d   :  { %v9578_v34 = vadd.f32 %v7486_v31, %v1828_v58  ;;  %v7489_v58 = vld [vmem:[%s10456_s10 + $0x6] ss:$0 sm:$0xff] }
 0x83e   :  { %v1842_v35 = vsel %vm247_vm0, %v9576_v33, 0.0 }
 0x83f   :  { %1843 = vadd.xlane.f32.xlu1 %v1842_v35  ;;  %v1839_v36 = vsel %vm247_vm0, %v9578_v34, 0.0 }
 0x840   :  { %1840 = vadd.xlane.f32.xlu0 %v1839_v36 }
 0x841   :  { %v7959_v29 = vpop.f32.mrb[16].mxu0 }
 0x842   :  { %v9636_v30 = vadd.f32 %v7959_v29, %v7492_v28  ;;  %v2062_v31 = vpop.f32.mrb[17].mxu0 }
 0x843   :  { %v9638_v32 = vadd.f32 %v7492_v28, %v2062_v31 }
 0x850   :  { %2089 = vrot.lane.b32.xlu1 %v9636_v30, %s9012_s1 }
 0x854   :  { %2093 = vrot.lane.b32.xlu1 %v9636_v30, %s9013_s18 }
 0x8cc   :  { %v1844_v37 = vpop.xlane.xlu1 %1843 }
 0x8cd   :  { %v1846_v38 = vmul.f32 0.03125, %v1844_v37  ;;  %v1841_v39 = vpop.xlane.xlu0 %1840 }
 0x8ce   :  { %v1845_v40 = vmul.f32 0.03125, %v1841_v39 }
 0x8cf   :  { %v9585_v1 = vsub.f32 %v9576_v33, %v1846_v38 }
 0x8d0   :  { %v1847_v0 = vsub.f32 %v9578_v34, %v1845_v40  ;;  %v9672_v39 = vpop.permute.xlu1 %2089 }
 0x8d1   :  { %v1850_v43 = vmul.f32 %v9585_v1, %v9585_v1  ;;  %v1864_v23 = vmul.f32 %v7487_v18, %v9585_v1 }
 0x8d2   :  { %v1849_v41 = vmul.f32 %v1847_v0, %v1847_v0  ;;  %v1863_v19 = vmul.f32 %v7487_v18, %v1847_v0 }
 0x8d3   :  { %v1854_v44 = vsel %vm247_vm0, %v1850_v43, 0.0 }
 0x8d4   :  { %v1851_v42 = vsel %vm247_vm0, %v1849_v41, 0.0  ;;  %v9685_v1 = vpop.permute.xlu1 %2093 }
 0x8d5   :  { %1852 = vadd.xlane.f32.xlu0 %v1851_v42 }
 0x8d9   :  { %1855 = vadd.xlane.f32.xlu0 %v1854_v44 }
 0x8ef   :  { %2087 = vrot.lane.b32.xlu0 %v9638_v32, %s9012_s1 }
 0x8f3   :  { %2091 = vrot.lane.b32.xlu0 %v9638_v32, %s9013_s18 }
 0x8f7   :  { %2095 = vrot.lane.b32.xlu0 %v9638_v32, %s9014_s12 }
 0x962   :  { %v1853_v62 = vpop.xlane.xlu0 %1852 }
 0x963   :  { %v1857_v63 = vmul.f32 0.032258064, %v1853_v62  ;;  %v9726_v62 = vrot.slane %v244_v57, %v2103_v53 }
 0x965   :  { %8538 = vrsqrt.f32 %v1857_v63  ;;  %vm1867_vm11 = vcmp.eq.f32.partialorder %v1857_v63, inf  ;;  %v1870_v7 = vand.u32 2147483648, %v1857_v63  ;;  %vm1869_vm12 = vcmp.eq.f32.partialorder %v1857_v63, 0.0 }
 0x966   :  { %v1856_v2 = vpop.xlane.xlu0 %1855 }
 0x967   :  { %v1858_v3 = vmul.f32 0.032258064, %v1856_v2 }
 0x969   :  { %8540 = vrsqrt.f32 %v1858_v3  ;;  %vm1874_vm13 = vcmp.eq.f32.partialorder %v1858_v3, inf  ;;  %v1877_v14 = vand.u32 2147483648, %v1858_v3  ;;  %vm1876_vm14 = vcmp.eq.f32.partialorder %v1858_v3, 0.0 }
 0x96a   :  { %v9653_v55 = vpop.permute.xlu0 %2087 }
 0x96b   :  { %7971 = vmatpush3.xpose.msk.msra.mxu0 %vm408_vm6, %v9653_v55 }
 0x96c   :  { %7980 = vmatprep.subr.mxu0 %v9010_v47 }
 0x96e   :  { %v9683_v40 = vpop.permute.xlu0 %2091 }
 0x96f   :  { %v8539_v4 = vpop.eup %8538 }
 0x970   :  { %v1866_v6 = vmul.f32 %v8539_v4, %v1857_v63 }
 0x972   :  { %v1868_v8 = vsel %vm1867_vm11, %v1857_v63, %v1866_v6  ;;  %v9688_v41 = vpop.permute.xlu0 %2095 }
 0x973   :  { %v8541_v9 = vpop.eup %8540  ;;  %v1871_v10 = vsel %vm1869_vm12, %v1870_v7, %v1868_v8 }
 0x974   :  { %v1873_v12 = vmul.f32 %v8541_v9, %v1858_v3  ;;  %v1879_v13 = vadd.f32 1e-06, %v1871_v10 }
 0x976   :  { %v1875_v15 = vsel %vm1874_vm13, %v1858_v3, %v1873_v12  ;;  %8542 = vrcp.f32 %v1879_v13 }
 0x977   :  { %v1878_v16 = vsel %vm1876_vm14, %v1877_v14, %v1875_v15 }
 0x978   :  { %v1880_v17 = vadd.f32 1e-06, %v1878_v16 }
 0x97a   :  { %8544 = vrcp.f32 %v1880_v17 }
 0x980   :  { %v8543_v20 = vpop.eup %8542 }
 0x981   :  { %v1882_v22 = vmul.f32 %v8543_v20, %v1863_v19 }
 0x983   :  { %v1889_v24 = vadd.f32 %v7488_v21, %v1882_v22 }
 0x984   :  { %v8545_v25 = vpop.eup %8544 }
 0x985   :  { %v1884_v26 = vmul.f32 %v8545_v25, %v1864_v23  ;;  %7946 = vmatprep.mubr.msk.f32.mxu1 %vm247_vm0, %v1889_v24 }
 0x987   :  { %v1890_v27 = vadd.f32 %v7488_v21, %v1884_v26 }
 0x989   :  { %7947 = vmatmul.mubr.msk.f32.vlgmr.msra.gmra.mrb[20].mxu1 %vm247_vm0, %v1890_v27 }
 0x98a   :  { %7962 = vmatprep.mubr.msk.f32.mxu1 %vm9011_vm5, %v9010_v47  ;;  %7961 = vmatpush3.xpose.msk.msra.mxu1 %vm408_vm6, %v9638_v32 }
 0x98b   :  { %7965 = vmatprep.subr.mxu1 %v9010_v47 }
 0xa5c   :  { %v7948_v35 = vpop.f32.mrb[20].mxu1 }
 0xa5d   :  { %v1978_v36 = vadd.f32 %v7948_v35, %v7489_v58  ;;  %v1972_v37 = vpop.f32.mrb[21].mxu1 }
 0xa5e   :  { %v1973_v38 = vadd.f32 %v7489_v58, %v1972_v37 }
 0xa5f   :  { %2075 = vrot.lane.b32.xlu1 %v1978_v36, %s9012_s1 }
 0xa60   :  { %2077 = vrot.lane.b32.xlu0 %v1973_v38, %s9013_s18  ;;  %7963 = vmatmul.mubr.msk.f32.vlgmr.msra.gmra.mrb[22].mxu1 %vm408_vm6, %v1973_v38 }
 0xa61   :  { %7966 = vmatpush3.xpose.msk.msra.mxu1 %vm408_vm6, %v9636_v30  ;;  %7967 = vmatprep.mubr.msk.f32.mxu1 %vm9011_vm5, %v9010_v47 }
 0xa62   :  { %7975 = vmatprep.subr.mxu1 %v9010_v47 }
 0xa63   :  { %2073 = vrot.lane.b32.xlu1 %v1973_v38, %s9012_s1 }
 0xa64   :  { %2081 = vrot.lane.b32.xlu0 %v1973_v38, %s9014_s12  ;;  %7968 = vmatmul.mubr.msk.f32.vlgmr.msra.gmra.mrb[24].mxu1 %vm408_vm6, %v1978_v36 }
 0xa65   :  { %7976 = vmatpush3.xpose.msk.msra.mxu1 %vm408_vm6, %v9672_v39  ;;  %7977 = vmatprep.mubr.msk.f32.mxu1 %vm9011_vm5, %v9010_v47 }
 0xa66   :  { %7985 = vmatprep.subr.mxu1 %v9010_v47 }
 0xa67   :  { %2079 = vrot.lane.b32.xlu1 %v1978_v36, %s9013_s18 }
 0xa6b   :  { %2097 = vrot.lane.b32.xlu1 %v9636_v30, %s9014_s12 }
 0xa6f   :  { %2083 = vrot.lane.b32.xlu1 %v1978_v36, %s9014_s12 }
 0xad1   :  { %v2076_v0 = vpop.permute.xlu1 %2075 }
 0xad2   :  { %7978 = vmatmul.mubr.msk.f32.vlgmr.msra.gmra.mrb[26].mxu1 %vm408_vm6, %v2076_v0  ;;  %v2078_v43 = vpop.permute.xlu0 %2077 }
 0xad3   :  { %7986 = vmatpush3.xpose.msk.msra.mxu1 %vm408_vm6, %v9685_v1  ;;  %7987 = vmatprep.mubr.msk.f32.mxu1 %vm9011_vm5, %v9010_v47 }
 0xad4   :  { %7995 = vmatprep.subr.mxu1 %v9010_v47 }
 0xad5   :  { %v2074_v42 = vpop.permute.xlu1 %2073 }
 0xad6   :  { %7973 = vmatmul.mubr.msk.f32.vlgmr.msra.gmra.mrb[18].mxu0 %vm408_vm6, %v2074_v42  ;;  %v2082_v45 = vpop.permute.xlu0 %2081 }
 0xad7   :  { %7981 = vmatpush3.xpose.msk.msra.mxu0 %vm408_vm6, %v9683_v40  ;;  %7982 = vmatprep.mubr.msk.f32.mxu0 %vm9011_vm5, %v9010_v47 }
 0xad8   :  { %7990 = vmatprep.subr.mxu0 %v9010_v47 }
 0xad9   :  { %v2080_v44 = vpop.permute.xlu1 %2079 }
 0xada   :  { %7983 = vmatmul.mubr.msk.f32.vlgmr.msra.gmra.mrb[20].mxu0 %vm408_vm6, %v2078_v43  ;;  %7988 = vmatmul.mubr.msk.f32.vlgmr.msra.gmra.mrb[28].mxu1 %vm408_vm6, %v2080_v44 }
 0xadb   :  { %7991 = vmatpush3.xpose.msk.msra.mxu0 %vm408_vm6, %v9688_v41  ;;  %7992 = vmatprep.mubr.msk.f32.mxu0 %vm9011_vm5, %v9010_v47 }
 0xadc   :  { %7997 = vmatprep.mubr.msk.f32.mxu1 %vm9011_vm5, %v9010_v47  ;;  %8000 = vmatprep.subr.mxu0 %v9010_v47 }
 0xadd   :  { %v9710_v46 = vpop.permute.xlu1 %2097 }
 0xade   :  { %7993 = vmatmul.mubr.msk.f32.vlgmr.msra.gmra.mrb[22].mxu0 %vm408_vm6, %v2082_v45  ;;  %7996 = vmatpush3.xpose.msk.msra.mxu1 %vm408_vm6, %v9710_v46 }
 0xadf   :  { %8005 = vmatprep.subr.mxu1 %v9010_v47  ;;  %8002 = vmatprep.mubr.msk.f32.mxu0 %vm9011_vm5, %v9010_v47 }
 0xae1   :  { %v2084_v48 = vpop.permute.xlu1 %2083 }
 0xae2   :  { %7998 = vmatmul.mubr.msk.f32.vlgmr.msra.gmra.mrb[30].mxu1 %vm408_vm6, %v2084_v48 }
 0xae3   :  { %8007 = vmatprep.mubr.msk.f32.mxu1 %vm9011_vm5, %v9010_v47 }
 0xb33   :  { %v2181_v59 = vpop.f32.mrb[22].mxu1 }
 0xb34   :  { %v2182_v60 = vadd.f32 %v2181_v59, %v9722_v56  ;;  %v7964_v61 = vpop.f32.mrb[23].mxu1 }
 0xb36   :  { %v2703_v63 = vsel %vm408_vm6, %v2182_v60, -inf }
 0xb37   :  { %2704 = vmax.xlane.f32.xlu0 %v2703_v63  ;;  %v2255_v2 = vpop.f32.mrb[24].mxu1 }
 0xb38   :  { %v2256_v3 = vadd.f32 %v2255_v2, %v9726_v62  ;;  %v7969_v4 = vpop.f32.mrb[25].mxu1 }
 0xb3a   :  { %v2706_v6 = vsel %vm408_vm6, %v2256_v3, -inf }
 0xb3b   :  { %2707 = vmax.xlane.f32.xlu1 %v2706_v6 }
 0xba5   :  { %v2403_v7 = vpop.f32.mrb[26].mxu1 }
 0xba6   :  { %v2404_v8 = vadd.f32 %v2403_v7, %v9726_v62  ;;  %v7979_v9 = vpop.f32.mrb[27].mxu1 }
 0xba8   :  { %v2712_v10 = vsel %vm408_vm6, %v2404_v8, -inf }
 0xba9   :  { %2713 = vmax.xlane.f32.xlu0 %v2712_v10  ;;  %v2329_v12 = vpop.f32.mrb[18].mxu0 }
 0xbaa   :  { %v2330_v13 = vadd.f32 %v2329_v12, %v9722_v56  ;;  %v7974_v14 = vpop.f32.mrb[19].mxu0 }
 0xbac   :  { %v2709_v15 = vsel %vm408_vm6, %v2330_v13, -inf }
 0xbad   :  { %v2551_v16 = vpop.f32.mrb[28].mxu1  ;;  %2710 = vmax.xlane.f32.xlu0 %v2709_v15  ;;  %v2477_v17 = vpop.f32.mrb[20].mxu0 }
 0xbae   :  { %v2552_v18 = vadd.f32 %v2551_v16, %v9726_v62  ;;  %v2478_v19 = vadd.f32 %v2477_v17, %v9722_v56  ;;  %v7984_v20 = vpop.f32.mrb[21].mxu0  ;;  %v7989_v21 = vpop.f32.mrb[29].mxu1 }
 0xbb0   :  { %v2718_v22 = vsel %vm408_vm6, %v2552_v18, -inf  ;;  %v2715_v23 = vsel %vm408_vm6, %v2478_v19, -inf }
 0xbb1   :  { %2719 = vmax.xlane.f32.xlu1 %v2718_v22  ;;  %2716 = vmax.xlane.f32.xlu0 %v2715_v23  ;;  %v2625_v24 = vpop.f32.mrb[22].mxu0 }
 0xbb2   :  { %v2626_v25 = vadd.f32 %v2625_v24, %v9722_v56  ;;  %v7994_v26 = vpop.f32.mrb[23].mxu0 }
 0xbb4   :  { %v2721_v27 = vsel %vm408_vm6, %v2626_v25, -inf }
 0xbb5   :  { %v2699_v28 = vpop.f32.mrb[30].mxu1  ;;  %2722 = vmax.xlane.f32.xlu0 %v2721_v27 }
 0xbb6   :  { %v2700_v29 = vadd.f32 %v2699_v28, %v9726_v62  ;;  %v7999_v31 = vpop.f32.mrb[31].mxu1 }
 0xbb8   :  { %v2724_v58 = vsel %vm408_vm6, %v2700_v29, -inf }
 0xbb9   :  { %2725 = vmax.xlane.f32.xlu1 %v2724_v58 }
 0xbc4   :  { %v2705_v35 = vpop.xlane.xlu0 %2704 }
 0xbc5   :  { %v2727_v36 = vsub.f32 %v2182_v60, %v2705_v35 }
 0xbc7   :  { %v2735_v37 = vmul.f32 1.442695, %v2727_v36 }
 0xbc9   :  { %8546 = vpow2.f32 %v2735_v37 }
 0xbca   :  { %2867 = vrot.lane.b32.xlu1 %v9636_v30, %s9015_s2  ;;  %v2708_v30 = vpop.xlane.xlu1 %2707 }
 0xbcb   :  { %2791 = vrot.lane.b32.xlu0 %v9638_v32, %s9015_s2  ;;  %v2728_v38 = vsub.f32 %v2256_v3, %v2708_v30 }
 0xbcd   :  { %v2737_v0 = vmul.f32 1.442695, %v2728_v38 }
 0xbce   :  { %2943 = vrot.lane.b32.xlu1 %v9653_v55, %s9015_s2 }
 0xbcf   :  { %3095 = vrot.lane.b32.xlu0 %v9683_v40, %s9015_s2  ;;  %8548 = vpow2.f32 %v2737_v0 }
 0xbd2   :  { %3019 = vrot.lane.b32.xlu1 %v9672_v39, %s9015_s2 }
 0xbd3   :  { %v9755_v32 = vpop.eup %8546 }
 0xbd4   :  { %v2751_v55 = vsel %vm408_vm6, %v9755_v32, 0.0 }
 0xbd6   :  { %3171 = vrot.lane.b32.xlu1 %v9685_v1, %s9015_s2 }
 0xbd9   :  { %v9759_v40 = vpop.eup %8548 }
 0xbda   :  { %v2754_v39 = vsel %vm408_vm6, %v9759_v40, 0.0 }
 0xbee   :  { %2752 = vadd.xlane.f32.xlu0 %v2751_v55 }
 0xbfa   :  { %2755 = vadd.xlane.f32.xlu1 %v2754_v39 }
 0xc36   :  { %v2714_v1 = vpop.xlane.xlu0 %2713 }
 0xc37   :  { %v2730_v42 = vsub.f32 %v2404_v8, %v2714_v1 }
 0xc39   :  { %v2741_v43 = vmul.f32 1.442695, %v2730_v42 }
 0xc3a   :  { %v2711_v44 = vpop.xlane.xlu0 %2710 }
 0xc3b   :  { %8550 = vpow2.f32 %v2741_v43  ;;  %v2729_v45 = vsub.f32 %v2330_v13, %v2711_v44 }
 0xc3d   :  { %v2739_v48 = vmul.f32 1.442695, %v2729_v45 }
 0xc3e   :  { %v2720_v49 = vpop.xlane.xlu1 %2719  ;;  %v2717_v50 = vpop.xlane.xlu0 %2716 }
 0xc3f   :  { %8552 = vpow2.f32 %v2739_v48  ;;  %v2732_v51 = vsub.f32 %v2552_v18, %v2720_v49  ;;  %v2731_v52 = vsub.f32 %v2478_v19, %v2717_v50 }
 0xc41   :  { %v2745_v53 = vmul.f32 1.442695, %v2732_v51  ;;  %v2743_v54 = vmul.f32 1.442695, %v2731_v52  ;;  %v3429_v52 = vld [vmem:[#allocation10] sm:$0xff] }
 0xc42   :  { %v2723_v57 = vpop.xlane.xlu0 %2722 }
 0xc43   :  { %8554 = vpow2.f32 %v2745_v53  ;;  %v2733_v59 = vsub.f32 %v2626_v25, %v2723_v57  ;;  %v3430_v53 = vld [vmem:[#allocation10 + $0x8] sm:$0xff] }
 0xc44   :  { %8556 = vpow2.f32 %v2743_v54  ;;  %v8369_v54 = vpack.c.bf16 %v3430_v53, %v3429_v52  ;;  %v3672_v52 = vld [vmem:[%s10428_s11 + $0x18] sm:$0xff] }
 0xc45   :  { %v8551_v60 = vpop.eup %8550  ;;  %v2747_v61 = vmul.f32 1.442695, %v2733_v59  ;;  %v3431_v59 = vld [vmem:[#allocation10 + $0x10] sm:$0xff] }
 0xc46   :  { %v2726_v63 = vpop.xlane.xlu1 %2725  ;;  %v2792_v2 = vpop.permute.xlu0 %2791  ;;  %v2760_v3 = vsel %vm408_vm6, %v8551_v60, 0.0 }
 0xc47   :  { %8558 = vpow2.f32 %v2747_v61  ;;  %v2734_v4 = vsub.f32 %v2700_v29, %v2726_v63  ;;  %2761 = vadd.xlane.f32.xlu1 %v2760_v3  ;;  %8001 = vmatpush3.msra.mxu0 %v2792_v2 }
 0xc48   :  { %8010 = vmatprep.subr.mxu0 %v9010_v47 }
 0xc49   :  { %v8553_v6 = vpop.eup %8552  ;;  %v2749_v7 = vmul.f32 1.442695, %v2734_v4 }
 0xc4a   :  { %v2868_v8 = vpop.permute.xlu1 %2867  ;;  %v2757_v9 = vsel %vm408_vm6, %v8553_v6, 0.0  ;;  %v3096_v19 = vpop.permute.xlu0 %3095 }
 0xc4b   :  { %8560 = vpow2.f32 %v2749_v7  ;;  %8006 = vmatpush3.msra.mxu1 %v2868_v8  ;;  %2758 = vadd.xlane.f32.xlu0 %v2757_v9 }
 0xc4c   :  { %8015 = vmatprep.subr.mxu1 %v9010_v47 }
 0xc4d   :  { %v8555_v10 = vpop.eup %8554 }
 0xc4e   :  { %v8557_v12 = vpop.eup %8556  ;;  %v2766_v13 = vsel %vm408_vm6, %v8555_v10, 0.0  ;;  %v2944_v20 = vpop.permute.xlu1 %2943 }
 0xc4f   :  { %2767 = vadd.xlane.f32.xlu1 %v2766_v13  ;;  %v2763_v14 = vsel %vm408_vm6, %v8557_v12, 0.0 }
 0xc50   :  { %2764 = vadd.xlane.f32.xlu0 %v2763_v14 }
 0xc51   :  { %v9769_v15 = vpop.eup %8558 }
 0xc52   :  { %v2769_v16 = vsel %vm408_vm6, %v9769_v15, 0.0  ;;  %v3020_v22 = vpop.permute.xlu1 %3019 }
 0xc54   :  { %2770 = vadd.xlane.f32.xlu0 %v2769_v16 }
 0xc55   :  { %v9773_v17 = vpop.eup %8560 }
 0xc56   :  { %v2772_v18 = vsel %vm408_vm6, %v9773_v17, 0.0  ;;  %v3172_v23 = vpop.permute.xlu1 %3171 }
 0xc57   :  { %2773 = vadd.xlane.f32.xlu1 %v2772_v18 }
 0xc68   :  { %3323 = vrot.lane.b32.xlu1 %v9710_v46, %s9015_s2 }
 0xc6a   :  { %3247 = vrot.lane.b32.xlu0 %v9688_v41, %s9015_s2 }
 0xc7b   :  { %v2753_v21 = vpop.xlane.xlu0 %2752 }
 0xc7c   :  { %8562 = vrcp.f32 %v2753_v21 }
 0xc86   :  { %v8563_v24 = vpop.eup %8562 }
 0xc87   :  { %v2756_v25 = vpop.xlane.xlu1 %2755  ;;  %v2783_v26 = vmul.f32 %v8563_v24, %v9755_v32 }
 0xc88   :  { %8564 = vrcp.f32 %v2756_v25 }
 0xc89   :  { %8003 = vmatmul.mubr.msk.f32.vlgmr.msra.gmra.mrb[24].mxu0 %vm408_vm6, %v2783_v26 }
 0xc8a   :  { %8011 = vmatpush3.msra.mxu0 %v2944_v20  ;;  %8012 = vmatprep.mubr.msk.f32.mxu0 %vm9011_vm5, %v9010_v47 }
 0xc8b   :  { %8020 = vmatprep.subr.mxu0 %v9010_v47 }
 0xc92   :  { %v8565_v41 = vpop.eup %8564 }
 0xc93   :  { %v2784_v46 = vmul.f32 %v8565_v41, %v9759_v40  ;;  %v7521_v41 = vld [vmem:[%s10456_s10 + $0x8] ss:$0 sm:$0xff] }
 0xc95   :  { %8008 = vmatmul.mubr.msk.f32.vlgmr.msra.gmra.mrb[32].mxu1 %vm408_vm6, %v2784_v46 }
 0xc96   :  { %8016 = vmatpush3.msra.mxu1 %v3020_v22  ;;  %8017 = vmatprep.mubr.msk.f32.mxu1 %vm9011_vm5, %v9010_v47 }
 0xc97   :  { %8025 = vmatprep.subr.mxu1 %v9010_v47 }
 0xcd4   :  { %v2762_v27 = vpop.xlane.xlu1 %2761 }
 0xcd5   :  { %8566 = vrcp.f32 %v2762_v27 }
 0xcd8   :  { %v2759_v28 = vpop.xlane.xlu0 %2758 }
 0xcd9   :  { %8568 = vrcp.f32 %v2759_v28 }
 0xcdc   :  { %v2768_v29 = vpop.xlane.xlu1 %2767 }
 0xcdd   :  { %8570 = vrcp.f32 %v2768_v29  ;;  %v2765_v31 = vpop.xlane.xlu0 %2764 }
 0xcde   :  { %8572 = vrcp.f32 %v2765_v31 }
 0xcdf   :  { %v8567_v58 = vpop.eup %8566 }
 0xce0   :  { %v2786_v35 = vmul.f32 %v8567_v58, %v8551_v60  ;;  %v3432_v60 = vld [vmem:[#allocation10 + $0x18] sm:$0xff] }
 0xce1   :  { %v2771_v36 = vpop.xlane.xlu0 %2770  ;;  %v8373_v63 = vpack.c.bf16 %v3432_v60, %v3431_v59 }
 0xce2   :  { %8574 = vrcp.f32 %v2771_v36  ;;  %8018 = vmatmul.mubr.msk.f32.vlgmr.msra.gmra.mrb[34].mxu1 %vm408_vm6, %v2786_v35 }
 0xce3   :  { %v8569_v37 = vpop.eup %8568  ;;  %8026 = vmatpush3.msra.mxu1 %v3172_v23  ;;  %8027 = vmatprep.mubr.msk.f32.mxu1 %vm9011_vm5, %v9010_v47 }
 0xce4   :  { %v2774_v30 = vpop.xlane.xlu1 %2773  ;;  %v2785_v38 = vmul.f32 %v8569_v37, %v8553_v6  ;;  %8035 = vmatprep.subr.mxu1 %v9010_v47 }
 0xce5   :  { %8576 = vrcp.f32 %v2774_v30  ;;  %v3248_v1 = vpop.permute.xlu0 %3247 }
 0xce6   :  { %8013 = vmatmul.mubr.msk.f32.vlgmr.msra.gmra.mrb[26].mxu0 %vm408_vm6, %v2785_v38 }
 0xce7   :  { %v8571_v0 = vpop.eup %8570  ;;  %8021 = vmatpush3.msra.mxu0 %v3096_v19  ;;  %8022 = vmatprep.mubr.msk.f32.mxu0 %vm9011_vm5, %v9010_v47 }
 0xce8   :  { %v8573_v32 = vpop.eup %8572  ;;  %v3324_v55 = vpop.permute.xlu1 %3323  ;;  %8030 = vmatprep.subr.mxu0 %v9010_v47  ;;  %v2788_v40 = vmul.f32 %v8571_v0, %v8555_v10 }
 0xce9   :  { %v2787_v39 = vmul.f32 %v8573_v32, %v8557_v12 }
 0xcea   :  { %8028 = vmatmul.mubr.msk.f32.vlgmr.msra.gmra.mrb[36].mxu1 %vm408_vm6, %v2788_v40 }
 0xceb   :  { %8023 = vmatmul.mubr.msk.f32.vlgmr.msra.gmra.mrb[28].mxu0 %vm408_vm6, %v2787_v39  ;;  %8036 = vmatpush3.msra.mxu1 %v3324_v55  ;;  %v3577_v39 = vld [vmem:[#allocation11] sm:$0xff] }
 0xcec   :  { %v8575_v42 = vpop.eup %8574  ;;  %8031 = vmatpush3.msra.mxu0 %v3248_v1  ;;  %8032 = vmatprep.mubr.msk.f32.mxu0 %vm9011_vm5, %v9010_v47  ;;  %v3578_v1 = vld [vmem:[#allocation11 + $0x8] sm:$0xff] }
 0xced   :  { %v2789_v43 = vmul.f32 %v8575_v42, %v9769_v15  ;;  %8037 = vmatprep.mubr.msk.f32.mxu1 %vm9011_vm5, %v9010_v47  ;;  %8370 = vmatprep.subr.bf16.mxu0 %v8369_v54  ;;  %v3579_v42 = vld [vmem:[#allocation11 + $0x10] sm:$0xff] }
 0xcef   :  { %v8577_v44 = vpop.eup %8576  ;;  %8033 = vmatmul.mubr.msk.f32.vlgmr.msra.gmra.mrb[30].mxu0 %vm408_vm6, %v2789_v43  ;;  %v8377_v43 = vpack.c.bf16 %v3578_v1, %v3577_v39 }
 0xcf0   :  { %v2790_v45 = vmul.f32 %v8577_v44, %v9773_v17  ;;  %8372 = vmatpush3.bf16.msra.mxu0 %v8369_v54  ;;  %v3580_v44 = vld [vmem:[#allocation11 + $0x18] sm:$0xff]  ;;  %v3673_v54 = vld [vmem:[%s10428_s11 + $0x20] sm:$0xff] }
 0xcf1   :  { %8374 = vmatprep.subr.bf16.mxu0 %v8373_v63  ;;  %8378 = vmatprep.subr.bf16.mxu1 %v8377_v43 }
 0xcf2   :  { %8038 = vmatmul.mubr.msk.f32.vlgmr.msra.gmra.mrb[38].mxu1 %vm408_vm6, %v2790_v45  ;;  %v8381_v45 = vpack.c.bf16 %v3580_v44, %v3579_v42 }
 0xcf3   :  { %8380 = vmatpush3.bf16.msra.mxu1 %v8377_v43 }
 0xcf4   :  { %8376 = vmatpush3.bf16.msra.mxu0 %v8373_v63  ;;  %8382 = vmatprep.subr.bf16.mxu1 %v8381_v45 }
 0xcf7   :  { %8384 = vmatpush3.bf16.msra.mxu1 %v8381_v45 }
 0xd5c   :  { %v2863_v48 = vpop.f32.mrb[24].mxu0 }
 0xd5d   :  { %v8004_v49 = vpop.f32.mrb[25].mxu0 }
 0xd5e   :  { %v3670_v49 = vld [vmem:[%s10428_s11 + $0x8] sm:$0xff] }
 0xd68   :  { %v2939_v50 = vpop.f32.mrb[32].mxu1 }
 0xd69   :  { %v8009_v51 = vpop.f32.mrb[33].mxu1 }
 0xdb5   :  { %v3091_v57 = vpop.f32.mrb[34].mxu1 }
 0xdb6   :  { %3403 = vrot.lane.b32.xlu1 %v3091_v57, %s8997_s21  ;;  %v8019_v61 = vpop.f32.mrb[35].mxu1  ;;  %v3674_v57 = vld [vmem:[%s10428_s11 + $0x28] sm:$0xff] }
 0xdb7   :  { %v8393_v59 = vpack.c.bf16 %v3674_v57, %v3673_v54  ;;  %v3823_v54 = vld [vmem:[#allocation13 + $0x8] sm:$0xff]  ;;  %v3824_v57 = vld [vmem:[#allocation13 + $0x10] sm:$0xff] }
 0xdb9   :  { %v3015_v2 = vpop.f32.mrb[26].mxu0 }
 0xdba   :  { %3401 = vrot.lane.b32.xlu0 %v3015_v2, %s8997_s21  ;;  %v8014_v3 = vpop.f32.mrb[27].mxu0 }
 0xdbd   :  { %v3243_v4 = vpop.f32.mrb[36].mxu1 }
 0xdbe   :  { %v3167_v6 = vpop.f32.mrb[28].mxu0  ;;  %3411 = vrot.lane.b32.xlu1 %v3243_v4, %s9003_s26  ;;  %v8029_v7 = vpop.f32.mrb[37].mxu1 }
 0xdbf   :  { %3409 = vrot.lane.b32.xlu0 %v3167_v6, %s9003_s26  ;;  %v8024_v8 = vpop.f32.mrb[29].mxu0 }
 0xdc2   :  { %v3319_v9 = vpop.f32.mrb[30].mxu0 }
 0xdc3   :  { %3417 = vrot.lane.b32.xlu0 %v3319_v9, %s9017_s6  ;;  %v8034_v10 = vpop.f32.mrb[31].mxu0 }
 0xdc5   :  { %v3395_v12 = vpop.f32.mrb[38].mxu1 }
 0xdc6   :  { %3419 = vrot.lane.b32.xlu1 %v3395_v12, %s9017_s6  ;;  %v8039_v13 = vpop.f32.mrb[39].mxu1 }
 0xe28   :  { %v3404_v15 = vpop.permute.xlu1 %3403 }
 0xe29   :  { %v3424_v22 = vsel %vm408_vm6, %v2939_v50, %v3404_v15  ;;  %v3671_v50 = vld [vmem:[%s10428_s11 + $0x10] sm:$0xff] }
 0xe2a   :  { %v8389_v53 = vpack.c.bf16 %v3672_v52, %v3671_v50 }
 0xe2c   :  { %v3402_v14 = vpop.permute.xlu0 %3401 }
 0xe2d   :  { %v3423_v17 = vsel %vm408_vm6, %v2863_v48, %v3402_v14  ;;  %v3669_v48 = vld [vmem:[%s10428_s11] sm:$0xff] }
 0xe2e   :  { %v8385_v51 = vpack.c.bf16 %v3670_v49, %v3669_v48 }
 0xe30   :  { %v3412_v18 = vpop.permute.xlu1 %3411  ;;  %8386 = vmatprep.subr.bf16.mxu0 %v8385_v51 }
 0xe31   :  { %v3410_v16 = vpop.permute.xlu0 %3409  ;;  %v3426_v23 = vsel %vm1737_vm9, %v3424_v22, %v3412_v18 }
 0xe32   :  { %v3425_v19 = vsel %vm1737_vm9, %v3423_v17, %v3410_v16  ;;  %v7522_v17 = vld [vmem:[%s10456_s10 + $0x9] ss:$0 sm:$0xff] }
 0xe35   :  { %v3418_v20 = vpop.permute.xlu0 %3417 }
 0xe36   :  { %v3427_v21 = vsel %vm1740_vm10, %v3425_v19, %v3418_v20  ;;  %v7523_v20 = vld [vmem:[%s10456_s10 + $0xa] ss:$0 sm:$0xff] }
 0xe37   :  { %8048 = vmatprep.mubr.msk.f32.mxu0 %vm247_vm0, %v3427_v21 }
 0xe38   :  { %v3420_v24 = vpop.permute.xlu1 %3419 }
 0xe39   :  { %v3428_v25 = vsel %vm1740_vm10, %v3426_v23, %v3420_v24 }
 0xe3a   :  { %8049 = vmatmul.mubr.msk.f32.vlgmr.msra.gmra.mrb[32].mxu0 %vm247_vm0, %v3428_v25 }
 0xe3b   :  { %8388 = vmatpush3.bf16.msra.mxu0 %v8385_v51 }
 0xe3c   :  { %8390 = vmatprep.subr.bf16.mxu0 %v8389_v53 }
 0xe3f   :  { %8392 = vmatpush3.bf16.msra.mxu0 %v8389_v53  ;;  %v3822_v53 = vld [vmem:[#allocation13] sm:$0xff] }
 0xe40   :  { %8394 = vmatprep.subr.bf16.mxu0 %v8393_v59 }
 0xe43   :  { %8396 = vmatpush3.bf16.msra.mxu0 %v8393_v59  ;;  %v8401_v59 = vpack.c.bf16 %v3823_v54, %v3822_v53 }
 0xe45   :  { %8402 = vmatprep.subr.bf16.mxu1 %v8401_v59 }
 0xf0d   :  { %v8050_v26 = vpop.f32.mrb[32].mxu0 }
 0xf0e   :  { %v3515_v46 = vadd.f32 %v8050_v26, %v9576_v33  ;;  %v3505_v27 = vpop.f32.mrb[33].mxu0 }
 0xf0f   :  { %v3514_v28 = vadd.f32 %v3505_v27, %v9578_v34 }
 0xf10   :  { %v9828_v29 = vadd.f32 %v7521_v41, %v3515_v46  ;;  %v3676_v46 = vld [vmem:[%s10428_s11 + $0x38] sm:$0xff] }
 0xf11   :  { %v9830_v31 = vadd.f32 %v7521_v41, %v3514_v28  ;;  %v3675_v41 = vld [vmem:[%s10428_s11 + $0x30] sm:$0xff]  ;;  %v7524_v28 = vld [vmem:[%s10456_s10 + $0xb] ss:$0 sm:$0xff] }
 0xf12   :  { %v3528_v58 = vsel %vm247_vm0, %v9828_v29, 0.0  ;;  %v8397_v27 = vpack.c.bf16 %v3676_v46, %v3675_v41 }
 0xf13   :  { %3529 = vadd.xlane.f32.xlu1 %v3528_v58  ;;  %v3525_v35 = vsel %vm247_vm0, %v9830_v31, 0.0 }
 0xf14   :  { %3526 = vadd.xlane.f32.xlu0 %v3525_v35  ;;  %8398 = vmatprep.subr.bf16.mxu0 %v8397_v27 }
 0xf15   :  { %8400 = vmatpush3.bf16.msra.mxu0 %v8397_v27  ;;  %v7532_v27 = vld [vmem:[%s10456_s10 + $0xf] ss:$0 sm:$0xff] }
 0xf16   :  { %8102 = vmatprep.subr.mxu0 %v9010_v47 }
 0xfa0   :  { %v3530_v36 = vpop.xlane.xlu1 %3529 }
 0xfa1   :  { %v3532_v37 = vmul.f32 0.03125, %v3530_v36  ;;  %v3527_v30 = vpop.xlane.xlu0 %3526 }
 0xfa2   :  { %v3531_v38 = vmul.f32 0.03125, %v3527_v30 }
 0xfa3   :  { %v3534_v33 = vsub.f32 %v9828_v29, %v3532_v37 }
 0xfa4   :  { %v3533_v34 = vsub.f32 %v9830_v31, %v3531_v38 }
 0xfa5   :  { %v3536_v55 = vmul.f32 %v3534_v33, %v3534_v33  ;;  %v3550_v22 = vmul.f32 %v7522_v17, %v3534_v33 }
 0xfa6   :  { %v3535_v0 = vmul.f32 %v3533_v34, %v3533_v34  ;;  %v3549_v18 = vmul.f32 %v7522_v17, %v3533_v34  ;;  %v7529_v34 = vld [vmem:[%s10456_s10 + $0xc] ss:$0 sm:$0xff] }
 0xfa7   :  { %v3540_v40 = vsel %vm247_vm0, %v3536_v55, 0.0 }
 0xfa8   :  { %v3537_v32 = vsel %vm247_vm0, %v3535_v0, 0.0 }
 0xfa9   :  { %3538 = vadd.xlane.f32.xlu0 %v3537_v32 }
 0xfad   :  { %3541 = vadd.xlane.f32.xlu0 %v3540_v40 }
0x1036   :  { %v3539_v60 = vpop.xlane.xlu0 %3538 }
0x1037   :  { %v3543_v61 = vmul.f32 0.032258064, %v3539_v60  ;;  %v3825_v60 = vld [vmem:[#allocation13 + $0x18] sm:$0xff] }
0x1039   :  { %8578 = vrsqrt.f32 %v3543_v61  ;;  %vm3553_vm2 = vcmp.eq.f32.partialorder %v3543_v61, inf  ;;  %v3556_v6 = vand.u32 2147483648, %v3543_v61  ;;  %vm3555_vm3 = vcmp.eq.f32.partialorder %v3543_v61, 0.0 }
0x103a   :  { %v3542_v63 = vpop.xlane.xlu0 %3541 }
0x103b   :  { %v3544_v2 = vmul.f32 0.032258064, %v3542_v63 }
0x103d   :  { %8580 = vrsqrt.f32 %v3544_v2  ;;  %vm3560_vm4 = vcmp.eq.f32.partialorder %v3544_v2, inf  ;;  %v3563_v13 = vand.u32 2147483648, %v3544_v2  ;;  %vm3562_vm7 = vcmp.eq.f32.partialorder %v3544_v2, 0.0 }
0x1043   :  { %v8579_v3 = vpop.eup %8578 }
0x1044   :  { %v3552_v4 = vmul.f32 %v8579_v3, %v3543_v61 }
0x1046   :  { %v3554_v7 = vsel %vm3553_vm2, %v3543_v61, %v3552_v4  ;;  %v8405_v61 = vpack.c.bf16 %v3825_v60, %v3824_v57 }
0x1047   :  { %v8581_v8 = vpop.eup %8580  ;;  %v3557_v9 = vsel %vm3555_vm3, %v3556_v6, %v3554_v7 }
0x1048   :  { %v3559_v10 = vmul.f32 %v8581_v8, %v3544_v2  ;;  %v3565_v12 = vadd.f32 1e-06, %v3557_v9 }
0x104a   :  { %v3561_v14 = vsel %vm3560_vm4, %v3544_v2, %v3559_v10  ;;  %8582 = vrcp.f32 %v3565_v12 }
0x104b   :  { %v3564_v15 = vsel %vm3562_vm7, %v3563_v13, %v3561_v14 }
0x104c   :  { %v3566_v16 = vadd.f32 1e-06, %v3564_v15 }
0x104e   :  { %8584 = vrcp.f32 %v3566_v16 }
0x1054   :  { %v8583_v19 = vpop.eup %8582 }
0x1055   :  { %v3568_v21 = vmul.f32 %v8583_v19, %v3549_v18  ;;  %v7530_v19 = vld [vmem:[%s10456_s10 + $0xd] ss:$0 sm:$0xff] }
0x1057   :  { %v3575_v23 = vadd.f32 %v7523_v20, %v3568_v21 }
0x1058   :  { %v8585_v24 = vpop.eup %8584 }
0x1059   :  { %v3570_v25 = vmul.f32 %v8585_v24, %v3550_v22  ;;  %8059 = vmatprep.mubr.msk.f32.mxu1 %vm247_vm0, %v3575_v23  ;;  %v7531_v24 = vld [vmem:[%s10456_s10 + $0xe] ss:$0 sm:$0xff] }
0x105b   :  { %v3576_v26 = vadd.f32 %v7523_v20, %v3570_v25 }
0x105d   :  { %8060 = vmatmul.mubr.msk.f32.vlgmr.msra.gmra.mrb[40].mxu1 %vm247_vm0, %v3576_v26 }
0x105e   :  { %8404 = vmatpush3.bf16.msra.mxu1 %v8401_v59 }
0x105f   :  { %8406 = vmatprep.subr.bf16.mxu1 %v8405_v61 }
0x1062   :  { %8408 = vmatpush3.bf16.msra.mxu1 %v8405_v61 }
0x1063   :  { %8092 = vmatprep.subr.mxu1 %v9010_v47 }
0x1130   :  { %v8061_v58 = vpop.f32.mrb[40].mxu1 }
0x1131   :  { %v3664_v35 = vadd.f32 %v8061_v58, %v7524_v28  ;;  %v3658_v36 = vpop.f32.mrb[41].mxu1 }
0x1132   :  { %v3659_v37 = vadd.f32 %v7524_v28, %v3658_v36 }
0x1133   :  { %v3668_v38 = vmax.f32 %v3664_v35, 0.0 }
0x1134   :  { %v3667_v30 = vmax.f32 %v3659_v37, 0.0 }
0x1136   :  { %8078 = vmatprep.mubr.msk.f32.mxu0 %vm3677_vm8, %v3667_v30 }
0x1137   :  { %8079 = vmatmul.mubr.msk.f32.vlgmr.msra.gmra.mrb[34].mxu0 %vm3677_vm8, %v3668_v38 }
0x1138   :  { %8104 = vmatprep.mubr.msk.f32.mxu0 %vm9011_vm5, %v9010_v47 }
0x120a   :  { %v8080_v33 = vpop.f32.mrb[34].mxu0 }
0x120b   :  { %v3760_v0 = vadd.f32 %v8080_v33, %v9828_v29  ;;  %v3750_v32 = vpop.f32.mrb[35].mxu0 }
0x120c   :  { %v3759_v55 = vadd.f32 %v3750_v32, %v9830_v31 }
0x120d   :  { %v9885_v40 = vadd.f32 %v7529_v34, %v3760_v0 }
0x120e   :  { %v9887_v39 = vadd.f32 %v7529_v34, %v3759_v55 }
0x120f   :  { %v3773_v1 = vsel %vm247_vm0, %v9885_v40, 0.0 }
0x1210   :  { %3774 = vadd.xlane.f32.xlu1 %v3773_v1  ;;  %v3770_v42 = vsel %vm247_vm0, %v9887_v39, 0.0 }
0x1211   :  { %3771 = vadd.xlane.f32.xlu0 %v3770_v42 }
0x129d   :  { %v3775_v43 = vpop.xlane.xlu1 %3774 }
0x129e   :  { %v3777_v44 = vmul.f32 0.03125, %v3775_v43  ;;  %v3772_v45 = vpop.xlane.xlu0 %3771 }
0x129f   :  { %v3776_v48 = vmul.f32 0.03125, %v3772_v45 }
0x12a0   :  { %v3779_v29 = vsub.f32 %v9885_v40, %v3777_v44 }
0x12a1   :  { %v3778_v31 = vsub.f32 %v9887_v39, %v3776_v48 }
0x12a2   :  { %v3781_v49 = vmul.f32 %v3779_v29, %v3779_v29  ;;  %v3795_v20 = vmul.f32 %v7530_v19, %v3779_v29 }
0x12a3   :  { %v3780_v50 = vmul.f32 %v3778_v31, %v3778_v31  ;;  %v3794_v22 = vmul.f32 %v7530_v19, %v3778_v31 }
0x12a4   :  { %v3785_v51 = vsel %vm247_vm0, %v3781_v49, 0.0 }
0x12a5   :  { %3786 = vadd.xlane.f32.xlu1 %v3785_v51  ;;  %v3782_v52 = vsel %vm247_vm0, %v3780_v50, 0.0 }
0x12a6   :  { %3783 = vadd.xlane.f32.xlu0 %v3782_v52 }
0x1332   :  { %v3787_v63 = vpop.xlane.xlu1 %3786 }
0x1333   :  { %v3789_v2 = vmul.f32 0.032258064, %v3787_v63  ;;  %v3784_v3 = vpop.xlane.xlu0 %3783 }
0x1334   :  { %v3788_v4 = vmul.f32 0.032258064, %v3784_v3 }
0x1335   :  { %8586 = vrsqrt.f32 %v3789_v2  ;;  %vm3805_vm11 = vcmp.eq.f32.partialorder %v3789_v2, inf  ;;  %v3808_v9 = vand.u32 2147483648, %v3789_v2  ;;  %vm3807_vm12 = vcmp.eq.f32.partialorder %v3789_v2, 0.0 }
0x1336   :  { %8588 = vrsqrt.f32 %v3788_v4  ;;  %vm3798_vm13 = vcmp.eq.f32.partialorder %v3788_v4, inf  ;;  %v3801_v13 = vand.u32 2147483648, %v3788_v4  ;;  %vm3800_vm14 = vcmp.eq.f32.partialorder %v3788_v4, 0.0 }
0x133f   :  { %v8587_v6 = vpop.eup %8586 }
0x1340   :  { %v8589_v7 = vpop.eup %8588  ;;  %v3804_v8 = vmul.f32 %v8587_v6, %v3789_v2 }
0x1341   :  { %v3797_v10 = vmul.f32 %v8589_v7, %v3788_v4 }
0x1342   :  { %v3806_v12 = vsel %vm3805_vm11, %v3789_v2, %v3804_v8 }
0x1343   :  { %v3809_v14 = vsel %vm3807_vm12, %v3808_v9, %v3806_v12  ;;  %v3799_v15 = vsel %vm3798_vm13, %v3788_v4, %v3797_v10 }
0x1344   :  { %v3811_v16 = vadd.f32 1e-06, %v3809_v14  ;;  %v3802_v17 = vsel %vm3800_vm14, %v3801_v13, %v3799_v15 }
0x1345   :  { %v3810_v18 = vadd.f32 1e-06, %v3802_v17 }
0x1346   :  { %8590 = vrcp.f32 %v3811_v16 }
0x1347   :  { %8592 = vrcp.f32 %v3810_v18 }
0x1350   :  { %v8591_v21 = vpop.eup %8590 }
0x1351   :  { %v8593_v23 = vpop.eup %8592  ;;  %v3815_v25 = vmul.f32 %v8591_v21, %v3795_v20 }
0x1352   :  { %v3813_v26 = vmul.f32 %v8593_v23, %v3794_v22 }
0x1353   :  { %v3821_v46 = vadd.f32 %v7531_v24, %v3815_v25 }
0x1354   :  { %v3820_v41 = vadd.f32 %v7531_v24, %v3813_v26 }
0x1356   :  { %8089 = vmatprep.mubr.msk.f32.mxu1 %vm247_vm0, %v3820_v41 }
0x1357   :  { %8090 = vmatmul.mubr.msk.f32.vlgmr.msra.gmra.mrb[42].mxu1 %vm247_vm0, %v3821_v46 }
0x1358   :  { %8094 = vmatprep.mubr.msk.f32.mxu1 %vm9011_vm5, %v9010_v47 }
0x142a   :  { %v8091_v28 = vpop.f32.mrb[42].mxu1 }
0x142b   :  { %v9911_v58 = vadd.f32 %v8091_v28, %v7532_v27  ;;  %v3903_v35 = vpop.f32.mrb[43].mxu1 }
0x142c   :  { %v9913_v36 = vadd.f32 %v7532_v27, %v3903_v35 }
0x142d   :  { %3916 = vrot.lane.b32.xlu1 %v9911_v58, %s9012_s1 }
0x142e   :  { %3914 = vrot.lane.b32.xlu0 %v9913_v36, %s9012_s1 }
0x1431   :  { %3918 = vrot.lane.b32.xlu1 %v9913_v36, %s9013_s18 }
0x1432   :  { %3922 = vrot.lane.b32.xlu0 %v9913_v36, %s9014_s12 }
0x1435   :  { %3920 = vrot.lane.b32.xlu1 %v9911_v58, %s9013_s18 }
0x1436   :  { %3926 = vrot.lane.b32.xlu0 %v9913_v36, %s9015_s2 }
0x1439   :  { %3924 = vrot.lane.b32.xlu1 %v9911_v58, %s9014_s12 }
0x143d   :  { %4002 = vrot.lane.b32.xlu1 %v9911_v58, %s9015_s2 }
0x149f   :  { %v9931_v37 = vpop.permute.xlu1 %3916 }
0x14a0   :  { %4154 = vrot.lane.b32.xlu1 %v9931_v37, %s9015_s2  ;;  %v9935_v30 = vpop.permute.xlu0 %3914 }
0x14a1   :  { %4078 = vrot.lane.b32.xlu0 %v9935_v30, %s9015_s2 }
0x14a3   :  { %v9939_v38 = vpop.permute.xlu1 %3918 }
0x14a4   :  { %v9941_v33 = vpop.permute.xlu0 %3922 }
0x14a5   :  { %4230 = vrot.lane.b32.xlu0 %v9939_v38, %s9015_s2 }
0x14a7   :  { %v9945_v34 = vpop.permute.xlu1 %3920 }
0x14a8   :  { %4306 = vrot.lane.b32.xlu1 %v9945_v34, %s9015_s2  ;;  %v3927_v0 = vpop.permute.xlu0 %3926 }
0x14a9   :  { %4382 = vrot.lane.b32.xlu0 %v9941_v33, %s9015_s2  ;;  %8093 = vmatpush3.xpose.msk.msra.mxu1 %vm408_vm6, %v3927_v0 }
0x14aa   :  { %8097 = vmatprep.subr.mxu1 %v9010_v47 }
0x14ab   :  { %v9953_v32 = vpop.permute.xlu1 %3924 }
0x14ac   :  { %4458 = vrot.lane.b32.xlu1 %v9953_v32, %s9015_s2  ;;  %8095 = vmatmul.mubr.msk.f32.vlgmr.msra.gmra.mrb[44].mxu1 %vm408_vm6, %v9913_v36 }
0x14ad   :  { %8099 = vmatprep.mubr.msk.f32.mxu1 %vm9011_vm5, %v9010_v47 }
0x14af   :  { %v4003_v55 = vpop.permute.xlu1 %4002 }
0x14b0   :  { %8098 = vmatpush3.xpose.msk.msra.mxu1 %vm408_vm6, %v4003_v55 }
0x14b1   :  { %8107 = vmatprep.subr.mxu1 %v9010_v47 }
0x14b3   :  { %8100 = vmatmul.mubr.msk.f32.vlgmr.msra.gmra.mrb[46].mxu1 %vm408_vm6, %v9911_v58 }
0x14b4   :  { %8109 = vmatprep.mubr.msk.f32.mxu1 %vm9011_vm5, %v9010_v47 }
0x1512   :  { %v4155_v1 = vpop.permute.xlu1 %4154 }
0x1513   :  { %8108 = vmatpush3.xpose.msk.msra.mxu1 %vm408_vm6, %v4155_v1  ;;  %v4079_v42 = vpop.permute.xlu0 %4078 }
0x1514   :  { %8103 = vmatpush3.xpose.msk.msra.mxu0 %vm408_vm6, %v4079_v42  ;;  %8117 = vmatprep.subr.mxu1 %v9010_v47 }
0x1515   :  { %8112 = vmatprep.subr.mxu0 %v9010_v47 }
0x1516   :  { %8110 = vmatmul.mubr.msk.f32.vlgmr.msra.gmra.mrb[48].mxu1 %vm408_vm6, %v9931_v37 }
0x1517   :  { %8105 = vmatmul.mubr.msk.f32.vlgmr.msra.gmra.mrb[36].mxu0 %vm408_vm6, %v9935_v30  ;;  %v4231_v43 = vpop.permute.xlu0 %4230  ;;  %8119 = vmatprep.mubr.msk.f32.mxu1 %vm9011_vm5, %v9010_v47 }
0x1518   :  { %8113 = vmatpush3.xpose.msk.msra.mxu0 %vm408_vm6, %v4231_v43  ;;  %8114 = vmatprep.mubr.msk.f32.mxu0 %vm9011_vm5, %v9010_v47 }
0x1519   :  { %8122 = vmatprep.subr.mxu0 %v9010_v47 }
0x151a   :  { %v4307_v44 = vpop.permute.xlu1 %4306 }
0x151b   :  { %8115 = vmatmul.mubr.msk.f32.vlgmr.msra.gmra.mrb[38].mxu0 %vm408_vm6, %v9939_v38  ;;  %8118 = vmatpush3.xpose.msk.msra.mxu1 %vm408_vm6, %v4307_v44  ;;  %v4383_v45 = vpop.permute.xlu0 %4382 }
0x151c   :  { %8123 = vmatpush3.xpose.msk.msra.mxu0 %vm408_vm6, %v4383_v45  ;;  %8124 = vmatprep.mubr.msk.f32.mxu0 %vm9011_vm5, %v9010_v47 }
0x151d   :  { %8127 = vmatprep.subr.mxu1 %v9010_v47  ;;  %8132 = vmatprep.subr.mxu0 %v9010_v47 }
0x151e   :  { %v4459_v48 = vpop.permute.xlu1 %4458  ;;  %8120 = vmatmul.mubr.msk.f32.vlgmr.msra.gmra.mrb[50].mxu1 %vm408_vm6, %v9945_v34 }
0x151f   :  { %8125 = vmatmul.mubr.msk.f32.vlgmr.msra.gmra.mrb[40].mxu0 %vm408_vm6, %v9941_v33  ;;  %8128 = vmatpush3.xpose.msk.msra.mxu1 %vm408_vm6, %v4459_v48 }
0x1520   :  { %8129 = vmatprep.mubr.msk.f32.mxu1 %vm9011_vm5, %v9010_v47  ;;  %8137 = vmatprep.subr.mxu1 %v9010_v47 }
0x1521   :  { %8134 = vmatprep.mubr.msk.f32.mxu0 %vm9011_vm5, %v9010_v47 }
0x1522   :  { %8130 = vmatmul.mubr.msk.f32.vlgmr.msra.gmra.mrb[52].mxu1 %vm408_vm6, %v9953_v32 }
0x1523   :  { %8139 = vmatprep.mubr.msk.f32.mxu1 %vm9011_vm5, %v9010_v47 }
0x157f   :  { %v3998_v29 = vpop.f32.mrb[44].mxu1 }
0x1580   :  { %v3999_v31 = vadd.f32 %v3998_v29, %v9458_v5  ;;  %v8096_v49 = vpop.f32.mrb[45].mxu1 }
0x1582   :  { %v4534_v50 = vsel %vm408_vm6, %v3999_v31, -inf }
0x1583   :  { %4535 = vmax.xlane.f32.xlu0 %v4534_v50 }
0x1586   :  { %v4074_v51 = vpop.f32.mrb[46].mxu1 }
0x1587   :  { %v4075_v52 = vadd.f32 %v4074_v51, %v9463_v11  ;;  %v8101_v53 = vpop.f32.mrb[47].mxu1 }
0x1589   :  { %v4537_v54 = vsel %vm408_vm6, %v4075_v52, -inf }
0x158a   :  { %4538 = vmax.xlane.f32.xlu1 %v4537_v54 }
0x15e9   :  { %v4226_v57 = vpop.f32.mrb[48].mxu1 }
0x15ea   :  { %v4227_v59 = vadd.f32 %v4226_v57, %v9463_v11  ;;  %v4150_v60 = vpop.f32.mrb[36].mxu0  ;;  %v8111_v61 = vpop.f32.mrb[49].mxu1 }
0x15eb   :  { %v8106_v63 = vpop.f32.mrb[37].mxu0  ;;  %v4151_v2 = vadd.f32 %v4150_v60, %v9458_v5 }
0x15ec   :  { %v4543_v3 = vsel %vm408_vm6, %v4227_v59, -inf }
0x15ed   :  { %4544 = vmax.xlane.f32.xlu0 %v4543_v3  ;;  %v4540_v8 = vsel %vm408_vm6, %v4151_v2, -inf }
0x15ee   :  { %v4302_v4 = vpop.f32.mrb[38].mxu0 }
0x15ef   :  { %v8116_v6 = vpop.f32.mrb[39].mxu0  ;;  %v4303_v7 = vadd.f32 %v4302_v4, %v9458_v5 }
0x15f1   :  { %v4378_v9 = vpop.f32.mrb[50].mxu1  ;;  %4541 = vmax.xlane.f32.xlu0 %v4540_v8  ;;  %v4546_v17 = vsel %vm408_vm6, %v4303_v7, -inf }
0x15f2   :  { %v4379_v10 = vadd.f32 %v4378_v9, %v9463_v11  ;;  %v8121_v12 = vpop.f32.mrb[51].mxu1  ;;  %v4454_v13 = vpop.f32.mrb[40].mxu0 }
0x15f3   :  { %v8126_v14 = vpop.f32.mrb[41].mxu0  ;;  %v4455_v15 = vadd.f32 %v4454_v13, %v9458_v5 }
0x15f4   :  { %v4549_v16 = vsel %vm408_vm6, %v4379_v10, -inf }
0x15f5   :  { %4550 = vmax.xlane.f32.xlu1 %v4549_v16  ;;  %v4530_v18 = vpop.f32.mrb[52].mxu1  ;;  %4547 = vmax.xlane.f32.xlu0 %v4546_v17  ;;  %v4552_v22 = vsel %vm408_vm6, %v4455_v15, -inf }
0x15f6   :  { %v4531_v19 = vadd.f32 %v4530_v18, %v9463_v11  ;;  %v8131_v20 = vpop.f32.mrb[53].mxu1 }
0x15f8   :  { %v4555_v21 = vsel %vm408_vm6, %v4531_v19, -inf }
0x15f9   :  { %4556 = vmax.xlane.f32.xlu1 %v4555_v21  ;;  %4553 = vmax.xlane.f32.xlu0 %v4552_v22 }
0x160a   :  { %4698 = vrot.lane.b32.xlu1 %v9911_v58, %s9016_s30 }
0x160e   :  { %4774 = vrot.lane.b32.xlu1 %v9935_v30, %s9016_s30 }
0x160f   :  { %4622 = vrot.lane.b32.xlu0 %v9913_v36, %s9016_s30 }
0x1610   :  { %v4536_v5 = vpop.xlane.xlu0 %4535 }
0x1611   :  { %v4558_v11 = vsub.f32 %v3999_v31, %v4536_v5 }
0x1612   :  { %4850 = vrot.lane.b32.xlu1 %v9931_v37, %s9016_s30 }
0x1613   :  { %4926 = vrot.lane.b32.xlu0 %v9939_v38, %s9016_s30  ;;  %v4566_v23 = vmul.f32 1.442695, %v4558_v11 }
0x1615   :  { %8594 = vpow2.f32 %v4566_v23 }
0x1616   :  { %5002 = vrot.lane.b32.xlu1 %v9945_v34, %s9016_s30 }
0x1617   :  { %v4539_v24 = vpop.xlane.xlu1 %4538 }
0x1618   :  { %v4559_v25 = vsub.f32 %v4075_v52, %v4539_v24 }
0x161a   :  { %v4568_v26 = vmul.f32 1.442695, %v4559_v25 }
0x161c   :  { %8596 = vpow2.f32 %v4568_v26 }
0x161f   :  { %v10031_v41 = vpop.eup %8594 }
0x1620   :  { %v4582_v46 = vsel %vm408_vm6, %v10031_v41, 0.0 }
0x1626   :  { %v10035_v27 = vpop.eup %8596 }
0x1627   :  { %v4585_v28 = vsel %vm408_vm6, %v10035_v27, 0.0 }
0x1632   :  { %4583 = vadd.xlane.f32.xlu0 %v4582_v46 }
0x163a   :  { %4586 = vadd.xlane.f32.xlu1 %v4585_v28 }
0x167a   :  { %v4545_v58 = vpop.xlane.xlu0 %4544 }
0x167b   :  { %v4561_v35 = vsub.f32 %v4227_v59, %v4545_v58 }
0x167d   :  { %v4572_v36 = vmul.f32 1.442695, %v4561_v35 }
0x167e   :  { %v4542_v37 = vpop.xlane.xlu0 %4541 }
0x167f   :  { %8598 = vpow2.f32 %v4572_v36  ;;  %v4560_v30 = vsub.f32 %v4151_v2, %v4542_v37 }
0x1681   :  { %v4570_v38 = vmul.f32 1.442695, %v4560_v30 }
0x1682   :  { %v4551_v34 = vpop.xlane.xlu1 %4550  ;;  %v4548_v0 = vpop.xlane.xlu0 %4547 }
0x1683   :  { %8600 = vpow2.f32 %v4570_v38  ;;  %v4563_v55 = vsub.f32 %v4379_v10, %v4551_v34  ;;  %v4562_v1 = vsub.f32 %v4303_v7, %v4548_v0  ;;  %v5260_v0 = vld [vmem:[#allocation14] sm:$0xff] }
0x1685   :  { %v4576_v42 = vmul.f32 1.442695, %v4563_v55  ;;  %v4574_v43 = vmul.f32 1.442695, %v4562_v1  ;;  %v5261_v55 = vld [vmem:[#allocation14 + $0x8] sm:$0xff] }
0x1686   :  { %v4557_v44 = vpop.xlane.xlu1 %4556  ;;  %v4554_v45 = vpop.xlane.xlu0 %4553  ;;  %v8409_v1 = vpack.c.bf16 %v5261_v55, %v5260_v0  ;;  %v5411_v0 = vld [vmem:[#allocation16 + $0x18] sm:$0xff] }
0x1687   :  { %8602 = vpow2.f32 %v4576_v42  ;;  %v4565_v48 = vsub.f32 %v4531_v19, %v4557_v44  ;;  %v4564_v29 = vsub.f32 %v4455_v15, %v4554_v45  ;;  %v5262_v42 = vld [vmem:[#allocation14 + $0x10] sm:$0xff] }
0x1688   :  { %8604 = vpow2.f32 %v4574_v43  ;;  %v5263_v43 = vld [vmem:[#allocation14 + $0x18] sm:$0xff] }
0x1689   :  { %v8599_v31 = vpop.eup %8598  ;;  %v4580_v49 = vmul.f32 1.442695, %v4565_v48  ;;  %v4578_v50 = vmul.f32 1.442695, %v4564_v29  ;;  %v8413_v44 = vpack.c.bf16 %v5263_v43, %v5262_v42 }
0x168a   :  { %v4699_v51 = vpop.permute.xlu1 %4698  ;;  %v4623_v52 = vpop.permute.xlu0 %4622  ;;  %v4591_v53 = vsel %vm408_vm6, %v8599_v31, 0.0 }
0x168b   :  { %8606 = vpow2.f32 %v4580_v49  ;;  %8138 = vmatpush3.msra.mxu1 %v4699_v51  ;;  %4592 = vadd.xlane.f32.xlu1 %v4591_v53 }
0x168c   :  { %8608 = vpow2.f32 %v4578_v50  ;;  %8133 = vmatpush3.msra.mxu0 %v4623_v52  ;;  %8147 = vmatprep.subr.mxu1 %v9010_v47 }
0x168d   :  { %v8601_v54 = vpop.eup %8600  ;;  %8142 = vmatprep.subr.mxu0 %v9010_v47 }
0x168e   :  { %v4588_v57 = vsel %vm408_vm6, %v8601_v54, 0.0  ;;  %v4775_v7 = vpop.permute.xlu1 %4774  ;;  %v4927_v8 = vpop.permute.xlu0 %4926 }
0x168f   :  { %4589 = vadd.xlane.f32.xlu0 %v4588_v57 }
0x1691   :  { %v8603_v59 = vpop.eup %8602 }
0x1692   :  { %v8605_v60 = vpop.eup %8604  ;;  %v4597_v61 = vsel %vm408_vm6, %v8603_v59, 0.0  ;;  %v4851_v9 = vpop.permute.xlu1 %4850 }
0x1693   :  { %4598 = vadd.xlane.f32.xlu1 %v4597_v61  ;;  %v4594_v63 = vsel %vm408_vm6, %v8605_v60, 0.0 }
0x1694   :  { %4595 = vadd.xlane.f32.xlu0 %v4594_v63 }
0x1695   :  { %v10045_v2 = vpop.eup %8606 }
0x1696   :  { %v10047_v3 = vpop.eup %8608  ;;  %v4603_v4 = vsel %vm408_vm6, %v10045_v2, 0.0  ;;  %v5003_v12 = vpop.permute.xlu1 %5002 }
0x1697   :  { %4604 = vadd.xlane.f32.xlu1 %v4603_v4  ;;  %v4600_v6 = vsel %vm408_vm6, %v10047_v3, 0.0 }
0x1698   :  { %4601 = vadd.xlane.f32.xlu0 %v4600_v6 }
0x16a8   :  { %5154 = vrot.lane.b32.xlu1 %v9953_v32, %s9016_s30 }
0x16ae   :  { %5078 = vrot.lane.b32.xlu0 %v9941_v33, %s9016_s30 }
0x16bf   :  { %v4584_v10 = vpop.xlane.xlu0 %4583 }
0x16c0   :  { %8610 = vrcp.f32 %v4584_v10 }
0x16c7   :  { %v4587_v13 = vpop.xlane.xlu1 %4586 }
0x16c8   :  { %8612 = vrcp.f32 %v4587_v13  ;;  %v8690_v13 = vld [vmem:[#allocation5] sm:$0xff] }
0x16ca   :  { %v8611_v14 = vpop.eup %8610 }
0x16cb   :  { %v4614_v15 = vmul.f32 %v8611_v14, %v10031_v41 }
0x16cd   :  { %8135 = vmatmul.mubr.msk.f32.vlgmr.msra.gmra.mrb[42].mxu0 %vm408_vm6, %v4614_v15  ;;  %v7561_v15 = vld [vmem:[%s10456_s10 + $0x10] ss:$0 sm:$0xff] }
0x16ce   :  { %8143 = vmatpush3.msra.mxu0 %v4775_v7  ;;  %8144 = vmatprep.mubr.msk.f32.mxu0 %vm9011_vm5, %v9010_v47 }
0x16cf   :  { %8152 = vmatprep.subr.mxu0 %v9010_v47 }
0x16d2   :  { %v8613_v33 = vpop.eup %8612 }
0x16d3   :  { %v4615_v32 = vmul.f32 %v8613_v33, %v10035_v27 }
0x16d5   :  { %8140 = vmatmul.mubr.msk.f32.vlgmr.msra.gmra.mrb[54].mxu1 %vm408_vm6, %v4615_v32 }
0x16d6   :  { %8148 = vmatpush3.msra.mxu1 %v4851_v9  ;;  %8149 = vmatprep.mubr.msk.f32.mxu1 %vm9011_vm5, %v9010_v47 }
0x16d7   :  { %8157 = vmatprep.subr.mxu1 %v9010_v47 }
0x1718   :  { %v4593_v16 = vpop.xlane.xlu1 %4592 }
0x1719   :  { %8614 = vrcp.f32 %v4593_v16 }
0x171c   :  { %v4590_v17 = vpop.xlane.xlu0 %4589 }
0x171d   :  { %8616 = vrcp.f32 %v4590_v17 }
0x1720   :  { %v4599_v18 = vpop.xlane.xlu1 %4598 }
0x1721   :  { %8618 = vrcp.f32 %v4599_v18  ;;  %v4596_v19 = vpop.xlane.xlu0 %4595 }
0x1722   :  { %8620 = vrcp.f32 %v4596_v19 }
0x1723   :  { %v8615_v20 = vpop.eup %8614 }
0x1724   :  { %v4617_v21 = vmul.f32 %v8615_v20, %v8599_v31  ;;  %v4605_v22 = vpop.xlane.xlu1 %4604 }
0x1725   :  { %8622 = vrcp.f32 %v4605_v22  ;;  %v4602_v5 = vpop.xlane.xlu0 %4601 }
0x1726   :  { %8624 = vrcp.f32 %v4602_v5  ;;  %8150 = vmatmul.mubr.msk.f32.vlgmr.msra.gmra.mrb[56].mxu1 %vm408_vm6, %v4617_v21 }
0x1727   :  { %v8617_v11 = vpop.eup %8616  ;;  %8158 = vmatpush3.msra.mxu1 %v5003_v12  ;;  %8159 = vmatprep.mubr.msk.f32.mxu1 %vm9011_vm5, %v9010_v47 }
0x1728   :  { %v4616_v23 = vmul.f32 %v8617_v11, %v8601_v54  ;;  %8167 = vmatprep.subr.mxu1 %v9010_v47  ;;  %v5155_v46 = vpop.permute.xlu1 %5154 }
0x1729   :  { %v5079_v28 = vpop.permute.xlu0 %5078 }
0x172a   :  { %8145 = vmatmul.mubr.msk.f32.vlgmr.msra.gmra.mrb[44].mxu0 %vm408_vm6, %v4616_v23 }
0x172b   :  { %v8619_v24 = vpop.eup %8618  ;;  %8153 = vmatpush3.msra.mxu0 %v4927_v8  ;;  %8154 = vmatprep.mubr.msk.f32.mxu0 %vm9011_vm5, %v9010_v47 }
0x172c   :  { %v8621_v25 = vpop.eup %8620  ;;  %v4619_v26 = vmul.f32 %v8619_v24, %v8603_v59  ;;  %8162 = vmatprep.subr.mxu0 %v9010_v47 }
0x172d   :  { %v4618_v41 = vmul.f32 %v8621_v25, %v8605_v60 }
0x172e   :  { %8160 = vmatmul.mubr.msk.f32.vlgmr.msra.gmra.mrb[58].mxu1 %vm408_vm6, %v4619_v26 }
0x172f   :  { %v8623_v27 = vpop.eup %8622  ;;  %8155 = vmatmul.mubr.msk.f32.vlgmr.msra.gmra.mrb[46].mxu0 %vm408_vm6, %v4618_v41  ;;  %8168 = vmatpush3.msra.mxu1 %v5155_v46  ;;  %v5498_v41 = vld [vmem:[#allocation17] sm:$0xff]  ;;  %v5499_v46 = vld [vmem:[#allocation17 + $0x8] sm:$0xff] }
0x1730   :  { %v8625_v58 = vpop.eup %8624  ;;  %v4621_v35 = vmul.f32 %v8623_v27, %v10045_v2  ;;  %8163 = vmatpush3.msra.mxu0 %v5079_v28  ;;  %8164 = vmatprep.mubr.msk.f32.mxu0 %vm9011_vm5, %v9010_v47  ;;  %v8425_v27 = vpack.c.bf16 %v5499_v46, %v5498_v41  ;;  %v5500_v28 = vld [vmem:[#allocation17 + $0x10] sm:$0xff] }
0x1731   :  { %v4620_v36 = vmul.f32 %v8625_v58, %v10047_v3  ;;  %8169 = vmatprep.mubr.msk.f32.mxu1 %vm9011_vm5, %v9010_v47  ;;  %8410 = vmatprep.subr.bf16.mxu0 %v8409_v1  ;;  %v5501_v58 = vld [vmem:[#allocation17 + $0x18] sm:$0xff] }
0x1732   :  { %8170 = vmatmul.mubr.msk.f32.vlgmr.msra.gmra.mrb[60].mxu1 %vm408_vm6, %v4621_v35  ;;  %v8429_v35 = vpack.c.bf16 %v5501_v58, %v5500_v28 }
0x1733   :  { %8165 = vmatmul.mubr.msk.f32.vlgmr.msra.gmra.mrb[48].mxu0 %vm408_vm6, %v4620_v36  ;;  %v8691_v36 = vld [vmem:[#allocation5 + $0x8] sm:$0xff] }
0x1734   :  { %8412 = vmatpush3.bf16.msra.mxu0 %v8409_v1 }
0x1735   :  { %8414 = vmatprep.subr.bf16.mxu0 %v8413_v44 }
0x1738   :  { %8416 = vmatpush3.bf16.msra.mxu0 %v8413_v44 }
0x1739   :  { %8426 = vmatprep.subr.bf16.mxu0 %v8425_v27 }
0x17a0   :  { %v4694_v37 = vpop.f32.mrb[42].mxu0 }
0x17a1   :  { %v8136_v30 = vpop.f32.mrb[43].mxu0 }
0x17a2   :  { %v5409_v30 = vld [vmem:[#allocation16 + $0x8] sm:$0xff] }
0x17a8   :  { %v4770_v38 = vpop.f32.mrb[54].mxu1 }
0x17a9   :  { %v8141_v34 = vpop.f32.mrb[55].mxu1 }
0x17f9   :  { %v4922_v45 = vpop.f32.mrb[56].mxu1 }
0x17fa   :  { %5234 = vrot.lane.b32.xlu1 %v4922_v45, %s8997_s21  ;;  %v8151_v48 = vpop.f32.mrb[57].mxu1 }
0x17fd   :  { %v4846_v29 = vpop.f32.mrb[44].mxu0 }
0x17fe   :  { %5232 = vrot.lane.b32.xlu0 %v4846_v29, %s8997_s21  ;;  %v8146_v31 = vpop.f32.mrb[45].mxu0 }
0x1801   :  { %v5074_v49 = vpop.f32.mrb[58].mxu1 }
0x1802   :  { %v4998_v50 = vpop.f32.mrb[46].mxu0  ;;  %5242 = vrot.lane.b32.xlu1 %v5074_v49, %s9003_s26  ;;  %v8161_v51 = vpop.f32.mrb[59].mxu1 }
0x1803   :  { %5240 = vrot.lane.b32.xlu0 %v4998_v50, %s9003_s26  ;;  %v8156_v52 = vpop.f32.mrb[47].mxu0 }
0x1805   :  { %v5226_v53 = vpop.f32.mrb[60].mxu1 }
0x1806   :  { %v5150_v54 = vpop.f32.mrb[48].mxu0  ;;  %5250 = vrot.lane.b32.xlu1 %v5226_v53, %s9017_s6  ;;  %v8171_v57 = vpop.f32.mrb[61].mxu1 }
0x1807   :  { %5248 = vrot.lane.b32.xlu0 %v5150_v54, %s9017_s6  ;;  %v8166_v59 = vpop.f32.mrb[49].mxu0 }
0x186c   :  { %v5235_v60 = vpop.permute.xlu1 %5234 }
0x186d   :  { %v5255_v3 = vsel %vm408_vm6, %v4770_v38, %v5235_v60  ;;  %v5410_v38 = vld [vmem:[#allocation16 + $0x10] sm:$0xff]  ;;  %v7562_v60 = vld [vmem:[%s10456_s10 + $0x11] ss:$0 sm:$0xff] }
0x186e   :  { %v8421_v55 = vpack.c.bf16 %v5411_v0, %v5410_v38 }
0x1870   :  { %v5233_v61 = vpop.permute.xlu0 %5232 }
0x1871   :  { %v5254_v4 = vsel %vm408_vm6, %v4694_v37, %v5233_v61  ;;  %v5408_v37 = vld [vmem:[#allocation16] sm:$0xff] }
0x1872   :  { %v8417_v34 = vpack.c.bf16 %v5409_v30, %v5408_v37 }
0x1874   :  { %v5243_v63 = vpop.permute.xlu1 %5242  ;;  %8418 = vmatprep.subr.bf16.mxu1 %v8417_v34 }
0x1875   :  { %v5241_v2 = vpop.permute.xlu0 %5240  ;;  %v5257_v6 = vsel %vm1737_vm9, %v5255_v3, %v5243_v63  ;;  %8420 = vmatpush3.bf16.msra.mxu1 %v8417_v34 }
0x1876   :  { %v5256_v8 = vsel %vm1737_vm9, %v5254_v4, %v5241_v2  ;;  %8422 = vmatprep.subr.bf16.mxu1 %v8421_v55  ;;  %v7563_v2 = vld [vmem:[%s10456_s10 + $0x12] ss:$0 sm:$0xff] }
0x1878   :  { %v5251_v7 = vpop.permute.xlu1 %5250 }
0x1879   :  { %v5259_v9 = vsel %vm1740_vm10, %v5257_v6, %v5251_v7  ;;  %v5249_v10 = vpop.permute.xlu0 %5248  ;;  %8424 = vmatpush3.bf16.msra.mxu1 %v8421_v55 }
0x187a   :  { %v5258_v12 = vsel %vm1740_vm10, %v5256_v8, %v5249_v10  ;;  %8205 = vmatprep.subr.mxu1 %v9010_v47  ;;  %v7567_v10 = vld [vmem:[%s10456_s10 + $0x14] ss:$0 sm:$0xff] }
0x187b   :  { %8180 = vmatprep.mubr.msk.f32.mxu0 %vm247_vm0, %v5258_v12 }
0x187c   :  { %8181 = vmatmul.mubr.msk.f32.vlgmr.msra.gmra.mrb[50].mxu0 %vm247_vm0, %v5259_v9 }
0x187d   :  { %8202 = vmatprep.mubr.msk.f32.mxu0 %vm247_vm0, %v8690_v13  ;;  %8428 = vmatpush3.bf16.msra.mxu0 %v8425_v27 }
0x187e   :  { %8430 = vmatprep.subr.bf16.mxu0 %v8429_v35 }
0x1881   :  { %8432 = vmatpush3.bf16.msra.mxu0 %v8429_v35 }
0x1882   :  { %8215 = vmatprep.subr.mxu0 %v9010_v47 }
0x1884   :  { %8203 = vmatmul.mubr.msk.f32.vlgmr.msra.gmra.mrb[52].mxu0 %vm247_vm0, %v8691_v36 }
0x1885   :  { %8217 = vmatprep.mubr.msk.f32.mxu0 %vm9011_vm5, %v9010_v47 }
0x194f   :  { %v8182_v14 = vpop.f32.mrb[50].mxu0 }
0x1950   :  { %v5346_v33 = vadd.f32 %v8182_v14, %v9885_v40  ;;  %v5336_v32 = vpop.f32.mrb[51].mxu0 }
0x1951   :  { %v5345_v16 = vadd.f32 %v5336_v32, %v9887_v39  ;;  %v7564_v32 = vld [vmem:[%s10456_s10 + $0x13] ss:$0 sm:$0xff] }
0x1952   :  { %v10105_v17 = vadd.f32 %v7561_v15, %v5346_v33 }
0x1953   :  { %v10107_v18 = vadd.f32 %v7561_v15, %v5345_v16 }
0x1954   :  { %v5359_v19 = vsel %vm247_vm0, %v10105_v17, 0.0 }
0x1955   :  { %5360 = vadd.xlane.f32.xlu1 %v5359_v19  ;;  %v5356_v20 = vsel %vm247_vm0, %v10107_v18, 0.0 }
0x1956   :  { %5357 = vadd.xlane.f32.xlu0 %v5356_v20 }
0x1957   :  { %v8204_v12 = vpop.f32.mrb[52].mxu0 }
0x1958   :  { %v10135_v13 = vadd.f32 %v8204_v12, %v7567_v10  ;;  %v5573_v14 = vpop.f32.mrb[53].mxu0 }
0x1959   :  { %v10137_v15 = vadd.f32 %v7567_v10, %v5573_v14 }
0x1966   :  { %5600 = vrot.lane.b32.xlu1 %v10135_v13, %s9012_s1 }
0x196a   :  { %5604 = vrot.lane.b32.xlu1 %v10135_v13, %s9013_s18 }
0x19e2   :  { %v5361_v21 = vpop.xlane.xlu1 %5360 }
0x19e3   :  { %v5363_v22 = vmul.f32 0.03125, %v5361_v21  ;;  %v5358_v5 = vpop.xlane.xlu0 %5357 }
0x19e4   :  { %v5362_v11 = vmul.f32 0.03125, %v5358_v5 }
0x19e5   :  { %v5365_v40 = vsub.f32 %v10105_v17, %v5363_v22 }
0x19e6   :  { %v5364_v39 = vsub.f32 %v10107_v18, %v5362_v11  ;;  %v10171_v22 = vpop.permute.xlu1 %5600 }
0x19e7   :  { %v5367_v25 = vmul.f32 %v5365_v40, %v5365_v40  ;;  %v5381_v4 = vmul.f32 %v7562_v60, %v5365_v40 }
0x19e8   :  { %v5366_v23 = vmul.f32 %v5364_v39, %v5364_v39  ;;  %v5380_v61 = vmul.f32 %v7562_v60, %v5364_v39 }
0x19e9   :  { %v5371_v26 = vsel %vm247_vm0, %v5367_v25, 0.0 }
0x19ea   :  { %v5368_v24 = vsel %vm247_vm0, %v5366_v23, 0.0  ;;  %v10184_v11 = vpop.permute.xlu1 %5604 }
0x19eb   :  { %5369 = vadd.xlane.f32.xlu0 %v5368_v24 }
0x19ef   :  { %5372 = vadd.xlane.f32.xlu0 %v5371_v26 }
0x1a05   :  { %5598 = vrot.lane.b32.xlu0 %v10137_v15, %s9012_s1 }
0x1a09   :  { %5602 = vrot.lane.b32.xlu0 %v10137_v15, %s9013_s18 }
0x1a0d   :  { %5606 = vrot.lane.b32.xlu0 %v10137_v15, %s9014_s12 }
0x1a78   :  { %v5370_v1 = vpop.xlane.xlu0 %5369 }
0x1a79   :  { %v5374_v42 = vmul.f32 0.032258064, %v5370_v1 }
0x1a7b   :  { %8626 = vrsqrt.f32 %v5374_v42  ;;  %vm5384_vm15 = vcmp.eq.f32.partialorder %v5374_v42, inf  ;;  %v5387_v29 = vand.u32 2147483648, %v5374_v42  ;;  %vm5386_vm1 = vcmp.eq.f32.partialorder %v5374_v42, 0.0 }
0x1a7c   :  { %v5373_v43 = vpop.xlane.xlu0 %5372 }
0x1a7d   :  { %v5375_v44 = vmul.f32 0.032258064, %v5373_v43 }
0x1a7f   :  { %8628 = vrsqrt.f32 %v5375_v44  ;;  %vm5391_vm2 = vcmp.eq.f32.partialorder %v5375_v44, inf  ;;  %v5394_v53 = vand.u32 2147483648, %v5375_v44  ;;  %vm5393_vm3 = vcmp.eq.f32.partialorder %v5375_v44, 0.0 }
0x1a80   :  { %v10152_v33 = vpop.permute.xlu0 %5598 }
0x1a81   :  { %8216 = vmatpush3.xpose.msk.msra.mxu0 %vm408_vm6, %v10152_v33 }
0x1a82   :  { %8225 = vmatprep.subr.mxu0 %v9010_v47 }
0x1a84   :  { %v10182_v5 = vpop.permute.xlu0 %5602 }
0x1a85   :  { %v8627_v45 = vpop.eup %8626 }
0x1a86   :  { %v5383_v48 = vmul.f32 %v8627_v45, %v5374_v42 }
0x1a88   :  { %v5385_v31 = vsel %vm5384_vm15, %v5374_v42, %v5383_v48  ;;  %v10187_v39 = vpop.permute.xlu0 %5606 }
0x1a89   :  { %v8629_v49 = vpop.eup %8628  ;;  %v5388_v50 = vsel %vm5386_vm1, %v5387_v29, %v5385_v31 }
0x1a8a   :  { %v5390_v51 = vmul.f32 %v8629_v49, %v5375_v44  ;;  %v5396_v52 = vadd.f32 1e-06, %v5388_v50 }
0x1a8c   :  { %v5392_v54 = vsel %vm5391_vm2, %v5375_v44, %v5390_v51  ;;  %8630 = vrcp.f32 %v5396_v52 }
0x1a8d   :  { %v5395_v57 = vsel %vm5393_vm3, %v5394_v53, %v5392_v54 }
0x1a8e   :  { %v5397_v59 = vadd.f32 1e-06, %v5395_v57 }
0x1a90   :  { %8632 = vrcp.f32 %v5397_v59 }
0x1a96   :  { %v8631_v63 = vpop.eup %8630 }
0x1a97   :  { %v5399_v3 = vmul.f32 %v8631_v63, %v5380_v61 }
0x1a99   :  { %v5406_v6 = vadd.f32 %v7563_v2, %v5399_v3 }
0x1a9a   :  { %v8633_v7 = vpop.eup %8632 }
0x1a9b   :  { %v5401_v8 = vmul.f32 %v8633_v7, %v5381_v4  ;;  %8191 = vmatprep.mubr.msk.f32.mxu1 %vm247_vm0, %v5406_v6 }
0x1a9d   :  { %v5407_v9 = vadd.f32 %v7563_v2, %v5401_v8 }
0x1a9f   :  { %8192 = vmatmul.mubr.msk.f32.vlgmr.msra.gmra.mrb[62].mxu1 %vm247_vm0, %v5407_v9 }
0x1aa0   :  { %8207 = vmatprep.mubr.msk.f32.mxu1 %vm9011_vm5, %v9010_v47  ;;  %8206 = vmatpush3.xpose.msk.msra.mxu1 %vm408_vm6, %v10137_v15 }
0x1aa1   :  { %8210 = vmatprep.subr.mxu1 %v9010_v47 }
0x1b72   :  { %v8193_v16 = vpop.f32.mrb[62].mxu1 }
0x1b73   :  { %v5495_v19 = vadd.f32 %v8193_v16, %v7564_v32  ;;  %v5489_v20 = vpop.f32.mrb[63].mxu1 }
0x1b74   :  { %v5490_v21 = vadd.f32 %v7564_v32, %v5489_v20 }
0x1b75   :  { %5586 = vrot.lane.b32.xlu1 %v5495_v19, %s9012_s1 }
0x1b76   :  { %5588 = vrot.lane.b32.xlu0 %v5490_v21, %s9013_s18  ;;  %8208 = vmatmul.mubr.msk.f32.vlgmr.msra.gmra.mrb[64].mxu1 %vm408_vm6, %v5490_v21 }
0x1b77   :  { %8211 = vmatpush3.xpose.msk.msra.mxu1 %vm408_vm6, %v10135_v13  ;;  %8212 = vmatprep.mubr.msk.f32.mxu1 %vm9011_vm5, %v9010_v47 }
0x1b78   :  { %8220 = vmatprep.subr.mxu1 %v9010_v47 }
0x1b79   :  { %5584 = vrot.lane.b32.xlu1 %v5490_v21, %s9012_s1 }
0x1b7a   :  { %5592 = vrot.lane.b32.xlu0 %v5490_v21, %s9014_s12  ;;  %8213 = vmatmul.mubr.msk.f32.vlgmr.msra.gmra.mrb[66].mxu1 %vm408_vm6, %v5495_v19 }
0x1b7b   :  { %8221 = vmatpush3.xpose.msk.msra.mxu1 %vm408_vm6, %v10171_v22  ;;  %8222 = vmatprep.mubr.msk.f32.mxu1 %vm9011_vm5, %v9010_v47 }
0x1b7c   :  { %8230 = vmatprep.subr.mxu1 %v9010_v47 }
0x1b7d   :  { %5590 = vrot.lane.b32.xlu1 %v5495_v19, %s9013_s18 }
0x1b81   :  { %5608 = vrot.lane.b32.xlu1 %v10135_v13, %s9014_s12 }
0x1b85   :  { %5594 = vrot.lane.b32.xlu1 %v5495_v19, %s9014_s12 }
0x1be7   :  { %v5587_v40 = vpop.permute.xlu1 %5586 }
0x1be8   :  { %8223 = vmatmul.mubr.msk.f32.vlgmr.msra.gmra.mrb[68].mxu1 %vm408_vm6, %v5587_v40  ;;  %v5589_v24 = vpop.permute.xlu0 %5588 }
0x1be9   :  { %8231 = vmatpush3.xpose.msk.msra.mxu1 %vm408_vm6, %v10184_v11  ;;  %8232 = vmatprep.mubr.msk.f32.mxu1 %vm9011_vm5, %v9010_v47 }
0x1bea   :  { %8240 = vmatprep.subr.mxu1 %v9010_v47 }
0x1beb   :  { %v5585_v23 = vpop.permute.xlu1 %5584 }
0x1bec   :  { %8218 = vmatmul.mubr.msk.f32.vlgmr.msra.gmra.mrb[54].mxu0 %vm408_vm6, %v5585_v23  ;;  %v5593_v26 = vpop.permute.xlu0 %5592 }
0x1bed   :  { %8226 = vmatpush3.xpose.msk.msra.mxu0 %vm408_vm6, %v10182_v5  ;;  %8227 = vmatprep.mubr.msk.f32.mxu0 %vm9011_vm5, %v9010_v47 }
0x1bee   :  { %8235 = vmatprep.subr.mxu0 %v9010_v47 }
0x1bef   :  { %v5591_v25 = vpop.permute.xlu1 %5590 }
0x1bf0   :  { %8228 = vmatmul.mubr.msk.f32.vlgmr.msra.gmra.mrb[56].mxu0 %vm408_vm6, %v5589_v24  ;;  %8233 = vmatmul.mubr.msk.f32.vlgmr.msra.gmra.mrb[70].mxu1 %vm408_vm6, %v5591_v25 }
0x1bf1   :  { %8236 = vmatpush3.xpose.msk.msra.mxu0 %vm408_vm6, %v10187_v39  ;;  %8237 = vmatprep.mubr.msk.f32.mxu0 %vm9011_vm5, %v9010_v47 }
0x1bf2   :  { %8242 = vmatprep.mubr.msk.f32.mxu1 %vm9011_vm5, %v9010_v47  ;;  %8245 = vmatprep.subr.mxu0 %v9010_v47 }
0x1bf3   :  { %v10209_v41 = vpop.permute.xlu1 %5608 }
0x1bf4   :  { %8238 = vmatmul.mubr.msk.f32.vlgmr.msra.gmra.mrb[58].mxu0 %vm408_vm6, %v5593_v26  ;;  %8241 = vmatpush3.xpose.msk.msra.mxu1 %vm408_vm6, %v10209_v41 }
0x1bf5   :  { %8250 = vmatprep.subr.mxu1 %v9010_v47  ;;  %8247 = vmatprep.mubr.msk.f32.mxu0 %vm9011_vm5, %v9010_v47 }
0x1bf7   :  { %v5595_v46 = vpop.permute.xlu1 %5594 }
0x1bf8   :  { %8243 = vmatmul.mubr.msk.f32.vlgmr.msra.gmra.mrb[72].mxu1 %vm408_vm6, %v5595_v46 }
0x1bf9   :  { %8252 = vmatprep.mubr.msk.f32.mxu1 %vm9011_vm5, %v9010_v47 }
0x1c49   :  { %v5680_v27 = vpop.f32.mrb[64].mxu1 }
0x1c4a   :  { %v5681_v28 = vadd.f32 %v5680_v27, %v9722_v56  ;;  %v8209_v58 = vpop.f32.mrb[65].mxu1 }
0x1c4c   :  { %v6202_v35 = vsel %vm408_vm6, %v5681_v28, -inf }
0x1c4d   :  { %6203 = vmax.xlane.f32.xlu0 %v6202_v35  ;;  %v5754_v36 = vpop.f32.mrb[66].mxu1 }
0x1c4e   :  { %v5755_v37 = vadd.f32 %v5754_v36, %v9726_v62  ;;  %v8214_v30 = vpop.f32.mrb[67].mxu1 }
0x1c50   :  { %v6205_v38 = vsel %vm408_vm6, %v5755_v37, -inf }
0x1c51   :  { %6206 = vmax.xlane.f32.xlu1 %v6205_v38 }
0x1cbb   :  { %v5902_v34 = vpop.f32.mrb[68].mxu1 }
0x1cbc   :  { %v5903_v0 = vadd.f32 %v5902_v34, %v9726_v62  ;;  %v8224_v55 = vpop.f32.mrb[69].mxu1 }
0x1cbe   :  { %v6211_v1 = vsel %vm408_vm6, %v5903_v0, -inf }
0x1cbf   :  { %6212 = vmax.xlane.f32.xlu0 %v6211_v1  ;;  %v5828_v42 = vpop.f32.mrb[54].mxu0 }
0x1cc0   :  { %v5829_v43 = vadd.f32 %v5828_v42, %v9722_v56  ;;  %v8219_v44 = vpop.f32.mrb[55].mxu0 }
0x1cc2   :  { %v6208_v45 = vsel %vm408_vm6, %v5829_v43, -inf }
0x1cc3   :  { %v6050_v48 = vpop.f32.mrb[70].mxu1  ;;  %6209 = vmax.xlane.f32.xlu0 %v6208_v45  ;;  %v5976_v29 = vpop.f32.mrb[56].mxu0 }
0x1cc4   :  { %v6051_v31 = vadd.f32 %v6050_v48, %v9726_v62  ;;  %v5977_v49 = vadd.f32 %v5976_v29, %v9722_v56  ;;  %v8229_v50 = vpop.f32.mrb[57].mxu0  ;;  %v8234_v51 = vpop.f32.mrb[71].mxu1 }
0x1cc6   :  { %v6217_v52 = vsel %vm408_vm6, %v6051_v31, -inf  ;;  %v6214_v53 = vsel %vm408_vm6, %v5977_v49, -inf }
0x1cc7   :  { %6218 = vmax.xlane.f32.xlu1 %v6217_v52  ;;  %6215 = vmax.xlane.f32.xlu0 %v6214_v53  ;;  %v6124_v54 = vpop.f32.mrb[58].mxu0 }
0x1cc8   :  { %v6125_v57 = vadd.f32 %v6124_v54, %v9722_v56  ;;  %v8239_v59 = vpop.f32.mrb[59].mxu0 }
0x1cca   :  { %v6220_v60 = vsel %vm408_vm6, %v6125_v57, -inf }
0x1ccb   :  { %v6198_v61 = vpop.f32.mrb[72].mxu1  ;;  %6221 = vmax.xlane.f32.xlu0 %v6220_v60 }
0x1ccc   :  { %v6199_v63 = vadd.f32 %v6198_v61, %v9726_v62  ;;  %v8244_v2 = vpop.f32.mrb[73].mxu1 }
0x1cce   :  { %v6223_v3 = vsel %vm408_vm6, %v6199_v63, -inf }
0x1ccf   :  { %6224 = vmax.xlane.f32.xlu1 %v6223_v3 }
0x1cda   :  { %v6204_v56 = vpop.xlane.xlu0 %6203 }
0x1cdb   :  { %v6226_v62 = vsub.f32 %v5681_v28, %v6204_v56 }
0x1cdd   :  { %v6234_v4 = vmul.f32 1.442695, %v6226_v62 }
0x1cde   :  { %v6207_v6 = vpop.xlane.xlu1 %6206 }
0x1cdf   :  { %8634 = vpow2.f32 %v6234_v4  ;;  %v6227_v7 = vsub.f32 %v5755_v37, %v6207_v6 }
0x1ce0   :  { %6366 = vrot.lane.b32.xlu1 %v10135_v13, %s9015_s2 }
0x1ce1   :  { %6290 = vrot.lane.b32.xlu0 %v10137_v15, %s9015_s2  ;;  %v6236_v8 = vmul.f32 1.442695, %v6227_v7 }
0x1ce3   :  { %8636 = vpow2.f32 %v6236_v8 }
0x1ce4   :  { %6442 = vrot.lane.b32.xlu1 %v10152_v33, %s9015_s2 }
0x1ce5   :  { %6594 = vrot.lane.b32.xlu0 %v10182_v5, %s9015_s2 }
0x1ce8   :  { %6518 = vrot.lane.b32.xlu1 %v10171_v22, %s9015_s2 }
0x1ce9   :  { %v10248_v9 = vpop.eup %8634 }
0x1cea   :  { %v6250_v10 = vsel %vm408_vm6, %v10248_v9, 0.0 }
0x1cec   :  { %6670 = vrot.lane.b32.xlu1 %v10184_v11, %s9015_s2 }
0x1ced   :  { %v10252_v12 = vpop.eup %8636 }
0x1cee   :  { %v6253_v13 = vsel %vm408_vm6, %v10252_v12, 0.0 }
0x1d04   :  { %6251 = vadd.xlane.f32.xlu0 %v6250_v10 }
0x1d10   :  { %6254 = vadd.xlane.f32.xlu1 %v6253_v13 }
0x1d4c   :  { %v6213_v14 = vpop.xlane.xlu0 %6212 }
0x1d4d   :  { %v6229_v15 = vsub.f32 %v5903_v0, %v6213_v14 }
0x1d4f   :  { %v6240_v33 = vmul.f32 1.442695, %v6229_v15 }
0x1d50   :  { %v6210_v32 = vpop.xlane.xlu0 %6209 }
0x1d51   :  { %8638 = vpow2.f32 %v6240_v33  ;;  %v6228_v16 = vsub.f32 %v5829_v43, %v6210_v32 }
0x1d53   :  { %v6238_v19 = vmul.f32 1.442695, %v6228_v16 }
0x1d54   :  { %v6219_v20 = vpop.xlane.xlu1 %6218  ;;  %v6216_v21 = vpop.xlane.xlu0 %6215 }
0x1d55   :  { %8640 = vpow2.f32 %v6238_v19  ;;  %v6231_v22 = vsub.f32 %v6051_v31, %v6219_v20  ;;  %v6230_v5 = vsub.f32 %v5977_v49, %v6216_v21  ;;  %v6928_v19 = vld [vmem:[#allocation19] sm:$0xff]  ;;  %v6929_v20 = vld [vmem:[#allocation19 + $0x8] sm:$0xff] }
0x1d56   :  { %v8433_v21 = vpack.c.bf16 %v6929_v20, %v6928_v19 }
0x1d57   :  { %v6244_v11 = vmul.f32 1.442695, %v6231_v22  ;;  %v6242_v40 = vmul.f32 1.442695, %v6230_v5  ;;  %v6930_v5 = vld [vmem:[#allocation19 + $0x10] sm:$0xff] }
0x1d58   :  { %v6222_v23 = vpop.xlane.xlu0 %6221 }
0x1d59   :  { %8642 = vpow2.f32 %v6244_v11  ;;  %v6232_v24 = vsub.f32 %v6125_v57, %v6222_v23  ;;  %v6931_v11 = vld [vmem:[#allocation19 + $0x18] sm:$0xff] }
0x1d5a   :  { %8644 = vpow2.f32 %v6242_v40  ;;  %v8437_v40 = vpack.c.bf16 %v6931_v11, %v6930_v5 }
0x1d5b   :  { %v8639_v25 = vpop.eup %8638  ;;  %v6246_v26 = vmul.f32 1.442695, %v6232_v24 }
0x1d5c   :  { %v6225_v46 = vpop.xlane.xlu1 %6224  ;;  %v6291_v27 = vpop.permute.xlu0 %6290  ;;  %v6259_v28 = vsel %vm408_vm6, %v8639_v25, 0.0 }
0x1d5d   :  { %8646 = vpow2.f32 %v6246_v26  ;;  %v6233_v58 = vsub.f32 %v6199_v63, %v6225_v46  ;;  %6260 = vadd.xlane.f32.xlu1 %v6259_v28  ;;  %8246 = vmatpush3.msra.mxu0 %v6291_v27 }
0x1d5e   :  { %8255 = vmatprep.subr.mxu0 %v9010_v47 }
0x1d5f   :  { %v8641_v35 = vpop.eup %8640  ;;  %v6248_v36 = vmul.f32 1.442695, %v6233_v58 }
0x1d60   :  { %v6367_v37 = vpop.permute.xlu1 %6366  ;;  %v6256_v30 = vsel %vm408_vm6, %v8641_v35, 0.0  ;;  %v6595_v45 = vpop.permute.xlu0 %6594 }
0x1d61   :  { %8648 = vpow2.f32 %v6248_v36  ;;  %8251 = vmatpush3.msra.mxu1 %v6367_v37  ;;  %6257 = vadd.xlane.f32.xlu0 %v6256_v30 }
0x1d62   :  { %8260 = vmatprep.subr.mxu1 %v9010_v47 }
0x1d63   :  { %v8643_v38 = vpop.eup %8642 }
0x1d64   :  { %v8645_v34 = vpop.eup %8644  ;;  %v6265_v0 = vsel %vm408_vm6, %v8643_v38, 0.0  ;;  %v6443_v48 = vpop.permute.xlu1 %6442 }
0x1d65   :  { %6266 = vadd.xlane.f32.xlu1 %v6265_v0  ;;  %v6262_v55 = vsel %vm408_vm6, %v8645_v34, 0.0 }
0x1d66   :  { %6263 = vadd.xlane.f32.xlu0 %v6262_v55 }
0x1d67   :  { %v10262_v1 = vpop.eup %8646 }
0x1d68   :  { %v6268_v42 = vsel %vm408_vm6, %v10262_v1, 0.0  ;;  %v6519_v31 = vpop.permute.xlu1 %6518 }
0x1d6a   :  { %6269 = vadd.xlane.f32.xlu0 %v6268_v42 }
0x1d6b   :  { %v10266_v43 = vpop.eup %8648 }
0x1d6c   :  { %v6271_v44 = vsel %vm408_vm6, %v10266_v43, 0.0  ;;  %v6671_v49 = vpop.permute.xlu1 %6670 }
0x1d6d   :  { %6272 = vadd.xlane.f32.xlu1 %v6271_v44 }
0x1d7e   :  { %6822 = vrot.lane.b32.xlu1 %v10209_v41, %s9015_s2 }
0x1d80   :  { %6746 = vrot.lane.b32.xlu0 %v10187_v39, %s9015_s2 }
0x1d91   :  { %v6252_v29 = vpop.xlane.xlu0 %6251 }
0x1d92   :  { %8650 = vrcp.f32 %v6252_v29 }
0x1d9c   :  { %v8651_v50 = vpop.eup %8650 }
0x1d9d   :  { %v6282_v51 = vmul.f32 %v8651_v50, %v10248_v9  ;;  %v6255_v52 = vpop.xlane.xlu1 %6254 }
0x1d9e   :  { %8652 = vrcp.f32 %v6255_v52 }
0x1d9f   :  { %8248 = vmatmul.mubr.msk.f32.vlgmr.msra.gmra.mrb[60].mxu0 %vm408_vm6, %v6282_v51 }
0x1da0   :  { %8256 = vmatpush3.msra.mxu0 %v6443_v48  ;;  %8257 = vmatprep.mubr.msk.f32.mxu0 %vm9011_vm5, %v9010_v47 }
0x1da1   :  { %8265 = vmatprep.subr.mxu0 %v9010_v47 }
0x1da8   :  { %v8653_v39 = vpop.eup %8652 }
0x1da9   :  { %v6283_v41 = vmul.f32 %v8653_v39, %v10252_v12 }
0x1dab   :  { %8253 = vmatmul.mubr.msk.f32.vlgmr.msra.gmra.mrb[74].mxu1 %vm408_vm6, %v6283_v41 }
0x1dac   :  { %8261 = vmatpush3.msra.mxu1 %v6519_v31  ;;  %8262 = vmatprep.mubr.msk.f32.mxu1 %vm9011_vm5, %v9010_v47  ;;  %v7596_v31 = vld [vmem:[%s10456_s10 + $0x15] ss:$0 sm:$0xff] }
0x1dad   :  { %8270 = vmatprep.subr.mxu1 %v9010_v47 }
0x1dea   :  { %v6261_v53 = vpop.xlane.xlu1 %6260 }
0x1deb   :  { %8654 = vrcp.f32 %v6261_v53 }
0x1dee   :  { %v6258_v54 = vpop.xlane.xlu0 %6257 }
0x1def   :  { %8656 = vrcp.f32 %v6258_v54 }
0x1df2   :  { %v6267_v57 = vpop.xlane.xlu1 %6266 }
0x1df3   :  { %8658 = vrcp.f32 %v6267_v57  ;;  %v6264_v59 = vpop.xlane.xlu0 %6263 }
0x1df4   :  { %8660 = vrcp.f32 %v6264_v59 }
0x1df5   :  { %v8655_v60 = vpop.eup %8654 }
0x1df6   :  { %v6285_v61 = vmul.f32 %v8655_v60, %v8639_v25 }
0x1df7   :  { %v6270_v63 = vpop.xlane.xlu0 %6269 }
0x1df8   :  { %8662 = vrcp.f32 %v6270_v63  ;;  %8263 = vmatmul.mubr.msk.f32.vlgmr.msra.gmra.mrb[76].mxu1 %vm408_vm6, %v6285_v61 }
0x1df9   :  { %v8657_v2 = vpop.eup %8656  ;;  %8271 = vmatpush3.msra.mxu1 %v6671_v49  ;;  %8272 = vmatprep.mubr.msk.f32.mxu1 %vm9011_vm5, %v9010_v47 }
0x1dfa   :  { %v6284_v3 = vmul.f32 %v8657_v2, %v8641_v35  ;;  %v6273_v56 = vpop.xlane.xlu1 %6272  ;;  %8280 = vmatprep.subr.mxu1 %v9010_v47 }
0x1dfb   :  { %8664 = vrcp.f32 %v6273_v56  ;;  %v6747_v9 = vpop.permute.xlu0 %6746  ;;  %v7076_v56 = vld [vmem:[%s10434_s17] sm:$0xff] }
0x1dfc   :  { %8258 = vmatmul.mubr.msk.f32.vlgmr.msra.gmra.mrb[62].mxu0 %vm408_vm6, %v6284_v3 }
0x1dfd   :  { %v8659_v62 = vpop.eup %8658  ;;  %8266 = vmatpush3.msra.mxu0 %v6595_v45  ;;  %8267 = vmatprep.mubr.msk.f32.mxu0 %vm9011_vm5, %v9010_v47 }
0x1dfe   :  { %v8661_v4 = vpop.eup %8660  ;;  %v6287_v6 = vmul.f32 %v8659_v62, %v8643_v38  ;;  %v6823_v7 = vpop.permute.xlu1 %6822  ;;  %8275 = vmatprep.subr.mxu0 %v9010_v47  ;;  %v7077_v62 = vld [vmem:[%s10434_s17 + $0x8] sm:$0xff] }
0x1dff   :  { %v6286_v8 = vmul.f32 %v8661_v4, %v8645_v34  ;;  %v7078_v4 = vld [vmem:[%s10434_s17 + $0x10] sm:$0xff] }
0x1e00   :  { %8273 = vmatmul.mubr.msk.f32.vlgmr.msra.gmra.mrb[78].mxu1 %vm408_vm6, %v6287_v6  ;;  %v8441_v6 = vpack.c.bf16 %v7077_v62, %v7076_v56 }
0x1e01   :  { %8268 = vmatmul.mubr.msk.f32.vlgmr.msra.gmra.mrb[64].mxu0 %vm408_vm6, %v6286_v8  ;;  %8281 = vmatpush3.msra.mxu1 %v6823_v7  ;;  %v7079_v7 = vld [vmem:[%s10434_s17 + $0x18] sm:$0xff] }
0x1e02   :  { %v8663_v10 = vpop.eup %8662  ;;  %8276 = vmatpush3.msra.mxu0 %v6747_v9  ;;  %8277 = vmatprep.mubr.msk.f32.mxu0 %vm9011_vm5, %v9010_v47  ;;  %v8445_v8 = vpack.c.bf16 %v7079_v7, %v7078_v4  ;;  %v7168_v9 = vld [vmem:[%s10457_s8] sm:$0xff] }
0x1e03   :  { %v6288_v12 = vmul.f32 %v8663_v10, %v10262_v1  ;;  %8282 = vmatprep.mubr.msk.f32.mxu1 %vm9011_vm5, %v9010_v47  ;;  %8434 = vmatprep.subr.bf16.mxu0 %v8433_v21  ;;  %v7169_v10 = vld [vmem:[%s10457_s8 + $0x8] sm:$0xff] }
0x1e04   :  { %8442 = vmatprep.subr.bf16.mxu1 %v8441_v6 }
0x1e05   :  { %v8665_v13 = vpop.eup %8664  ;;  %8278 = vmatmul.mubr.msk.f32.vlgmr.msra.gmra.mrb[66].mxu0 %vm408_vm6, %v6288_v12  ;;  %v7170_v12 = vld [vmem:[%s10457_s8 + $0x10] sm:$0xff] }
0x1e06   :  { %v6289_v14 = vmul.f32 %v8665_v13, %v10266_v43  ;;  %8436 = vmatpush3.bf16.msra.mxu0 %v8433_v21  ;;  %v8449_v13 = vpack.c.bf16 %v7169_v10, %v7168_v9  ;;  %v7320_v9 = vld [vmem:[#allocation20] sm:$0xff]  ;;  %v7321_v10 = vld [vmem:[#allocation20 + $0x8] sm:$0xff] }
0x1e07   :  { %8438 = vmatprep.subr.bf16.mxu0 %v8437_v40 }
0x1e08   :  { %8283 = vmatmul.mubr.msk.f32.vlgmr.msra.gmra.mrb[80].mxu1 %vm408_vm6, %v6289_v14  ;;  %v7171_v14 = vld [vmem:[%s10457_s8 + $0x18] sm:$0xff] }
0x1e09   :  { %8444 = vmatpush3.bf16.msra.mxu1 %v8441_v6 }
0x1e0a   :  { %8440 = vmatpush3.bf16.msra.mxu0 %v8437_v40  ;;  %8446 = vmatprep.subr.bf16.mxu1 %v8445_v8 }
0x1e0b   :  { %8450 = vmatprep.subr.bf16.mxu0 %v8449_v13 }
0x1e0d   :  { %8448 = vmatpush3.bf16.msra.mxu1 %v8445_v8 }
0x1e72   :  { %v6362_v15 = vpop.f32.mrb[60].mxu0 }
0x1e73   :  { %v8249_v33 = vpop.f32.mrb[61].mxu0 }
0x1e74   :  { %v7172_v33 = vld [vmem:[%s10457_s8 + $0x20] sm:$0xff] }
0x1e7e   :  { %v6438_v32 = vpop.f32.mrb[74].mxu1 }
0x1e7f   :  { %v8254_v16 = vpop.f32.mrb[75].mxu1 }
0x1ecb   :  { %v6590_v22 = vpop.f32.mrb[76].mxu1 }
0x1ecc   :  { %6902 = vrot.lane.b32.xlu1 %v6590_v22, %s8997_s21  ;;  %v8264_v47 = vpop.f32.mrb[77].mxu1 }
0x1ecf   :  { %v6514_v23 = vpop.f32.mrb[62].mxu0 }
0x1ed0   :  { %6900 = vrot.lane.b32.xlu0 %v6514_v23, %s8997_s21  ;;  %v8259_v24 = vpop.f32.mrb[63].mxu0 }
0x1ed3   :  { %v6742_v25 = vpop.f32.mrb[78].mxu1 }
0x1ed4   :  { %v6666_v26 = vpop.f32.mrb[64].mxu0  ;;  %6910 = vrot.lane.b32.xlu1 %v6742_v25, %s9003_s26  ;;  %v8274_v46 = vpop.f32.mrb[79].mxu1 }
0x1ed5   :  { %6908 = vrot.lane.b32.xlu0 %v6666_v26, %s9003_s26  ;;  %v8269_v27 = vpop.f32.mrb[65].mxu0 }
0x1ed8   :  { %v6818_v28 = vpop.f32.mrb[66].mxu0 }
0x1ed9   :  { %6916 = vrot.lane.b32.xlu0 %v6818_v28, %s9017_s6  ;;  %v8279_v58 = vpop.f32.mrb[67].mxu0 }
0x1edb   :  { %v6894_v35 = vpop.f32.mrb[80].mxu1 }
0x1edc   :  { %6918 = vrot.lane.b32.xlu1 %v6894_v35, %s9017_s6  ;;  %v8284_v36 = vpop.f32.mrb[81].mxu1  ;;  %v7597_v35 = vld [vmem:[%s10456_s10 + $0x16] ss:$0 sm:$0xff] }
0x1f3e   :  { %v6903_v30 = vpop.permute.xlu1 %6902 }
0x1f3f   :  { %v6923_v43 = vsel %vm408_vm6, %v6438_v32, %v6903_v30  ;;  %v7173_v32 = vld [vmem:[%s10457_s8 + $0x28] sm:$0xff]  ;;  %v7598_v30 = vld [vmem:[%s10456_s10 + $0x17] ss:$0 sm:$0xff] }
0x1f40   :  { %v8457_v16 = vpack.c.bf16 %v7173_v32, %v7172_v33 }
0x1f42   :  { %v6901_v37 = vpop.permute.xlu0 %6900 }
0x1f43   :  { %v6922_v34 = vsel %vm408_vm6, %v6362_v15, %v6901_v37  ;;  %v8453_v15 = vpack.c.bf16 %v7171_v14, %v7170_v12  ;;  %v7322_v12 = vld [vmem:[#allocation20 + $0x10] sm:$0xff]  ;;  %v7323_v14 = vld [vmem:[#allocation20 + $0x18] sm:$0xff] }
0x1f46   :  { %v6911_v0 = vpop.permute.xlu1 %6910 }
0x1f47   :  { %v6909_v38 = vpop.permute.xlu0 %6908  ;;  %v6925_v44 = vsel %vm1737_vm9, %v6923_v43, %v6911_v0  ;;  %v7174_v43 = vld [vmem:[%s10457_s8 + $0x30] sm:$0xff] }
0x1f48   :  { %v6924_v55 = vsel %vm1737_vm9, %v6922_v34, %v6909_v38 }
0x1f4b   :  { %v6917_v1 = vpop.permute.xlu0 %6916 }
0x1f4c   :  { %v6926_v42 = vsel %vm1740_vm10, %v6924_v55, %v6917_v1 }
0x1f4d   :  { %8293 = vmatprep.mubr.msk.f32.mxu0 %vm247_vm0, %v6926_v42 }
0x1f4e   :  { %v6919_v45 = vpop.permute.xlu1 %6918 }
0x1f4f   :  { %v6927_v48 = vsel %vm1740_vm10, %v6925_v44, %v6919_v45  ;;  %v7175_v44 = vld [vmem:[%s10457_s8 + $0x38] sm:$0xff] }
0x1f50   :  { %8294 = vmatmul.mubr.msk.f32.vlgmr.msra.gmra.mrb[68].mxu0 %vm247_vm0, %v6927_v48  ;;  %v8461_v45 = vpack.c.bf16 %v7175_v44, %v7174_v43  ;;  %v7599_v48 = vld [vmem:[%s10456_s10 + $0x18] ss:$0 sm:$0xff] }
0x1f51   :  { %8452 = vmatpush3.bf16.msra.mxu0 %v8449_v13  ;;  %v8465_v13 = vpack.c.bf16 %v7321_v10, %v7320_v9 }
0x1f52   :  { %8454 = vmatprep.subr.bf16.mxu0 %v8453_v15 }
0x1f53   :  { %8466 = vmatprep.subr.bf16.mxu1 %v8465_v13 }
0x1f55   :  { %8456 = vmatpush3.bf16.msra.mxu0 %v8453_v15  ;;  %v8469_v15 = vpack.c.bf16 %v7323_v14, %v7322_v12 }
0x1f56   :  { %8458 = vmatprep.subr.bf16.mxu0 %v8457_v16 }
0x1f59   :  { %8460 = vmatpush3.bf16.msra.mxu0 %v8457_v16 }
0x1f5a   :  { %8462 = vmatprep.subr.bf16.mxu0 %v8461_v45 }
0x1f5d   :  { %8464 = vmatpush3.bf16.msra.mxu0 %v8461_v45 }
0x2023   :  { %v8295_v29 = vpop.f32.mrb[68].mxu0 }
0x2024   :  { %v7014_v49 = vadd.f32 %v8295_v29, %v10105_v17  ;;  %v7004_v50 = vpop.f32.mrb[69].mxu0 }
0x2025   :  { %v7013_v51 = vadd.f32 %v7004_v50, %v10107_v18 }
0x2026   :  { %v10321_v52 = vadd.f32 %v7596_v31, %v7014_v49 }
0x2027   :  { %v10323_v39 = vadd.f32 %v7596_v31, %v7013_v51 }
0x2028   :  { %v7027_v41 = vsel %vm247_vm0, %v10321_v52, 0.0 }
0x2029   :  { %7028 = vadd.xlane.f32.xlu1 %v7027_v41  ;;  %v7024_v53 = vsel %vm247_vm0, %v10323_v39, 0.0 }
0x202a   :  { %7025 = vadd.xlane.f32.xlu0 %v7024_v53 }
0x20b6   :  { %v7029_v54 = vpop.xlane.xlu1 %7028 }
0x20b7   :  { %v7031_v57 = vmul.f32 0.03125, %v7029_v54  ;;  %v7026_v59 = vpop.xlane.xlu0 %7025  ;;  %v7604_v54 = vld [vmem:[%s10456_s10 + $0x19] ss:$0 sm:$0xff] }
0x20b8   :  { %v7030_v60 = vmul.f32 0.03125, %v7026_v59 }
0x20b9   :  { %v7033_v17 = vsub.f32 %v10321_v52, %v7031_v57 }
0x20ba   :  { %v7032_v18 = vsub.f32 %v10323_v39, %v7030_v60 }
0x20bb   :  { %v7035_v2 = vmul.f32 %v7033_v17, %v7033_v17  ;;  %v7049_v34 = vmul.f32 %v7597_v35, %v7033_v17 }
0x20bc   :  { %v7034_v61 = vmul.f32 %v7032_v18, %v7032_v18  ;;  %v7048_v36 = vmul.f32 %v7597_v35, %v7032_v18 }
0x20bd   :  { %v7039_v3 = vsel %vm247_vm0, %v7035_v2, 0.0 }
0x20be   :  { %v7036_v63 = vsel %vm247_vm0, %v7034_v61, 0.0 }
0x20bf   :  { %7037 = vadd.xlane.f32.xlu0 %v7036_v63 }
0x20c3   :  { %7040 = vadd.xlane.f32.xlu0 %v7039_v3 }
0x214c   :  { %v7038_v19 = vpop.xlane.xlu0 %7037 }
0x214d   :  { %v7042_v20 = vmul.f32 0.032258064, %v7038_v19 }
0x214f   :  { %8666 = vrsqrt.f32 %v7042_v20  ;;  %vm7052_vm5 = vcmp.eq.f32.partialorder %v7042_v20, inf  ;;  %v7055_v47 = vand.u32 2147483648, %v7042_v20  ;;  %vm7054_vm6 = vcmp.eq.f32.partialorder %v7042_v20, 0.0 }
0x2150   :  { %v7041_v21 = vpop.xlane.xlu0 %7040 }
0x2151   :  { %v7043_v22 = vmul.f32 0.032258064, %v7041_v21 }
0x2153   :  { %8668 = vrsqrt.f32 %v7043_v22  ;;  %vm7059_vm9 = vcmp.eq.f32.partialorder %v7043_v22, inf  ;;  %v7062_v46 = vand.u32 2147483648, %v7043_v22  ;;  %vm7061_vm10 = vcmp.eq.f32.partialorder %v7043_v22, 0.0 }
0x2159   :  { %v8667_v5 = vpop.eup %8666 }
0x215a   :  { %v7051_v11 = vmul.f32 %v8667_v5, %v7042_v20 }
0x215c   :  { %v7053_v40 = vsel %vm7052_vm5, %v7042_v20, %v7051_v11 }
0x215d   :  { %v8669_v23 = vpop.eup %8668  ;;  %v7056_v24 = vsel %vm7054_vm6, %v7055_v47, %v7053_v40 }
0x215e   :  { %v7058_v25 = vmul.f32 %v8669_v23, %v7043_v22  ;;  %v7064_v26 = vadd.f32 1e-06, %v7056_v24 }
0x2160   :  { %v7060_v27 = vsel %vm7059_vm9, %v7043_v22, %v7058_v25  ;;  %8670 = vrcp.f32 %v7064_v26 }
0x2161   :  { %v7063_v28 = vsel %vm7061_vm10, %v7062_v46, %v7060_v27  ;;  %v7605_v27 = vld [vmem:[%s10456_s10 + $0x1a] ss:$0 sm:$0xff] }
0x2162   :  { %v7065_v58 = vadd.f32 1e-06, %v7063_v28 }
0x2164   :  { %8672 = vrcp.f32 %v7065_v58 }
0x216a   :  { %v8671_v37 = vpop.eup %8670 }
0x216b   :  { %v7067_v38 = vmul.f32 %v8671_v37, %v7048_v36  ;;  %v7606_v37 = vld [vmem:[%s10456_s10 + $0x1b] ss:$0 sm:$0xff] }
0x216d   :  { %v7074_v0 = vadd.f32 %v7598_v30, %v7067_v38 }
0x216e   :  { %v8673_v55 = vpop.eup %8672 }
0x216f   :  { %v7069_v1 = vmul.f32 %v8673_v55, %v7049_v34  ;;  %8304 = vmatprep.mubr.msk.f32.mxu1 %vm247_vm0, %v7074_v0  ;;  %v7607_v55 = vld [vmem:[%s10456_s10 + $0x1c] ss:$0 sm:$0xff]  ;;  %s9018_s10 = smov [#allocation22]  }
0x2170   :  { %s7437_s28 = sshll.u32 %s9018_s10, 4  ;;  %s7438_s28 = int_to_ptr.vmem [resolvable:$true] %s7437_s28 }
0x2171   :  { %v7075_v42 = vadd.f32 %v7598_v30, %v7069_v1  ;;  %s8956_s9 = scalar_lea.vmem %s7438_s28, 256  ;;  %p8961_p13 = scmp.lt.s32.totalorder %s7438_s28, %s7438_s28 }
0x2172   :  { %p8957_p12 = scmp.ne.s32.totalorder %s7438_s28, %s8956_s9  ;;  %p8962_p0 = scmp.lt.s32.totalorder %s8956_s9, %s8956_s9 }
0x2173   :  { %8305 = vmatmul.mubr.msk.f32.vlgmr.msra.gmra.mrb[82].mxu1 %vm247_vm0, %v7075_v42 }
0x2174   :  { %8468 = vmatpush3.bf16.msra.mxu1 %v8465_v13  ;;  %p8963_p1 = por %p8962_p0, %p8961_p13 }
0x2175   :  { %8470 = vmatprep.subr.bf16.mxu1 %v8469_v15 }
0x2176   :  { %p8964_p2 = pnand %p8963_p1, %p8957_p12 }
0x2178   :  { %8472 = vmatpush3.bf16.msra.mxu1 %v8469_v15 }
0x2246   :  { %v8306_v29 = vpop.f32.mrb[82].mxu1 }
0x2247   :  { %v7163_v31 = vadd.f32 %v8306_v29, %v7599_v48  ;;  %v7157_v49 = vpop.f32.mrb[83].mxu1 }
0x2248   :  { %v7158_v50 = vadd.f32 %v7599_v48, %v7157_v49 }
0x2249   :  { %v7167_v41 = vmax.f32 %v7163_v31, 0.0 }
0x224a   :  { %v7166_v51 = vmax.f32 %v7158_v50, 0.0 }
0x224c   :  { %8323 = vmatprep.mubr.msk.f32.mxu0 %vm3677_vm8, %v7166_v51 }
0x224d   :  { %8324 = vmatmul.mubr.msk.f32.vlgmr.msra.gmra.mrb[70].mxu0 %vm3677_vm8, %v7167_v41 }
0x2320   :  { %v8325_v53 = vpop.f32.mrb[70].mxu0 }
0x2321   :  { %v7258_v57 = vadd.f32 %v8325_v53, %v10321_v52  ;;  %v7248_v59 = vpop.f32.mrb[71].mxu0 }
0x2322   :  { %v7257_v60 = vadd.f32 %v7248_v59, %v10323_v39 }
0x2323   :  { %v7265_v17 = vadd.f32 %v7604_v54, %v7258_v57 }
0x2324   :  { %v7264_v18 = vadd.f32 %v7604_v54, %v7257_v60 }
0x2325   :  { %v7271_v61 = vsel %vm247_vm0, %v7265_v17, 0.0 }
0x2326   :  { %7272 = vadd.xlane.f32.xlu1 %v7271_v61  ;;  %v7268_v63 = vsel %vm247_vm0, %v7264_v18, 0.0 }
0x2327   :  { %7269 = vadd.xlane.f32.xlu0 %v7268_v63 }
0x23b3   :  { %v7273_v2 = vpop.xlane.xlu1 %7272 }
0x23b4   :  { %v7275_v3 = vmul.f32 0.03125, %v7273_v2  ;;  %v7270_v56 = vpop.xlane.xlu0 %7269 }
0x23b5   :  { %v7274_v62 = vmul.f32 0.03125, %v7270_v56 }
0x23b6   :  { %v7277_v4 = vsub.f32 %v7265_v17, %v7275_v3 }
0x23b7   :  { %v7276_v6 = vsub.f32 %v7264_v18, %v7274_v62 }
0x23b8   :  { %v7279_v7 = vmul.f32 %v7277_v4, %v7277_v4  ;;  %v7293_v28 = vmul.f32 %v7605_v27, %v7277_v4 }
0x23b9   :  { %v7278_v8 = vmul.f32 %v7276_v6, %v7276_v6  ;;  %v7292_v35 = vmul.f32 %v7605_v27, %v7276_v6 }
0x23ba   :  { %v7283_v52 = vsel %vm247_vm0, %v7279_v7, 0.0 }
0x23bb   :  { %7284 = vadd.xlane.f32.xlu1 %v7283_v52  ;;  %v7280_v39 = vsel %vm247_vm0, %v7278_v8, 0.0 }
0x23bc   :  { %7281 = vadd.xlane.f32.xlu0 %v7280_v39 }
0x2448   :  { %v7285_v33 = vpop.xlane.xlu1 %7284 }
0x2449   :  { %v7287_v32 = vmul.f32 0.032258064, %v7285_v33  ;;  %v7282_v16 = vpop.xlane.xlu0 %7281 }
0x244a   :  { %v7286_v19 = vmul.f32 0.032258064, %v7282_v16 }
0x244b   :  { %8674 = vrsqrt.f32 %v7287_v32  ;;  %vm7303_vm4 = vcmp.eq.f32.partialorder %v7287_v32, inf  ;;  %v7306_v5 = vand.u32 2147483648, %v7287_v32  ;;  %vm7305_vm7 = vcmp.eq.f32.partialorder %v7287_v32, 0.0 }
0x244c   :  { %8676 = vrsqrt.f32 %v7286_v19  ;;  %vm7296_vm8 = vcmp.eq.f32.partialorder %v7286_v19, inf  ;;  %v7299_v40 = vand.u32 2147483648, %v7286_v19  ;;  %vm7298_vm11 = vcmp.eq.f32.partialorder %v7286_v19, 0.0 }
0x2455   :  { %v8675_v20 = vpop.eup %8674 }
0x2456   :  { %v8677_v21 = vpop.eup %8676  ;;  %v7302_v22 = vmul.f32 %v8675_v20, %v7287_v32 }
0x2457   :  { %v7295_v11 = vmul.f32 %v8677_v21, %v7286_v19 }
0x2458   :  { %v7304_v47 = vsel %vm7303_vm4, %v7287_v32, %v7302_v22 }
0x2459   :  { %v7307_v23 = vsel %vm7305_vm7, %v7306_v5, %v7304_v47  ;;  %v7297_v24 = vsel %vm7296_vm8, %v7286_v19, %v7295_v11 }
0x245a   :  { %v7309_v25 = vadd.f32 1e-06, %v7307_v23  ;;  %v7300_v26 = vsel %vm7298_vm11, %v7299_v40, %v7297_v24 }
0x245b   :  { %v7308_v46 = vadd.f32 1e-06, %v7300_v26 }
0x245c   :  { %8678 = vrcp.f32 %v7309_v25 }
0x245d   :  { %8680 = vrcp.f32 %v7308_v46 }
0x2466   :  { %v8679_v58 = vpop.eup %8678 }
0x2467   :  { %v8681_v36 = vpop.eup %8680  ;;  %v7313_v30 = vmul.f32 %v8679_v58, %v7293_v28 }
0x2468   :  { %v7311_v38 = vmul.f32 %v8681_v36, %v7292_v35 }
0x2469   :  { %v7319_v0 = vadd.f32 %v7606_v37, %v7313_v30 }
0x246a   :  { %v7318_v34 = vadd.f32 %v7606_v37, %v7311_v38 }
0x246c   :  { %8334 = vmatprep.mubr.msk.f32.mxu1 %vm247_vm0, %v7318_v34 }
0x246d   :  { %8335 = vmatmul.mubr.msk.f32.vlgmr.msra.gmra.mrb[84].mxu1 %vm247_vm0, %v7319_v0 }
0x2540   :  { %v8336_v1 = vpop.f32.mrb[84].mxu1 }
0x2541   :  { %v7407_v42 = vadd.f32 %v8336_v1, %v7607_v55  ;;  %v7401_v43 = vpop.f32.mrb[85].mxu1 }
0x2542   :  { %v7402_v44 = vadd.f32 %v7607_v55, %v7401_v43 }
0x2543   :  { %7412 = vmax.xlane.f32.xlu1 %v7407_v42 }
0x2544   :  { %7410 = vmax.xlane.f32.xlu0 %v7402_v44 }
0x25d0   :  { %v7413_v45 = vpop.xlane.xlu1 %7412 }
0x25d1   :  { %v7415_v48 = vsub.f32 %v7407_v42, %v7413_v45  ;;  %v7411_v29 = vpop.xlane.xlu0 %7410 }
0x25d2   :  { %v7414_v31 = vsub.f32 %v7402_v44, %v7411_v29 }
0x25d3   :  { %v7418_v49 = vmul.f32 1.442695, %v7415_v48 }
0x25d4   :  { %v7416_v50 = vmul.f32 1.442695, %v7414_v31 }
0x25d5   :  { %8682 = vpow2.f32 %v7418_v49 }
0x25d6   :  { %8684 = vpow2.f32 %v7416_v50 }
0x25df   :  { %v8683_v51 = vpop.eup %8682 }
0x25e0   :  { %v8685_v41 = vpop.eup %8684  ;;  %7422 = vadd.xlane.f32.xlu1 %v8683_v51 }
0x25e1   :  { %7420 = vadd.xlane.f32.xlu0 %v8685_v41 }
0x266d   :  { %v7423_v53 = vpop.xlane.xlu1 %7422 }
0x266e   :  { %8686 = vlog2.f32 %v7423_v53  ;;  %v7421_v54 = vpop.xlane.xlu0 %7420 }
0x266f   :  { %8688 = vlog2.f32 %v7421_v54 }
0x2678   :  { %v8687_v57 = vpop.eup %8686 }
0x2679   :  { %v8689_v59 = vpop.eup %8688  ;;  %v7427_v60 = vmul.f32 0.6931472, %v8687_v57 }
0x267a   :  { %v7425_v17 = vmul.f32 0.6931472, %v8689_v59 }
0x267b   :  { %v7429_v18 = vsub.f32 %v7415_v48, %v7427_v60 }
0x267c   :  { %v7428_v61 = vsub.f32 %v7414_v31, %v7425_v17 }
0x267d   :  { %7431 = vst [vmem:[#allocation22 + $0x8] sm:$0xff] %v7429_v18 }
0x267e   :  { %7430 = vst [vmem:[#allocation22] sm:$0xff] %v7428_v61 }
0x267f   :  { %8967 = shalt.err (!%p8964_p2)
}
0x2680   :  { %s10458_s30 = sld [smem:[#allocation37_spill]] }
0x2686   :  { %s8968_s17 = scalar_lea.hbm %s10458_s30, 256 }
0x2687   :  { %p8969_p3 = scmp.ne.s32.totalorder %s10458_s30, %s8968_s17  ;;  %p8972_p4 = scmp.lt.u32.totalorder %s8968_s17, %s10458_s30 }
0x2689   :  { %p8974_p5 = pnand %p8972_p4, %p8969_p3 }
0x268b   :  { %8977 = shalt.err (!%p8974_p5)
}
0x268c   :  { %7443 = dma.vmem_to_hbm [thread:$0]  %s7438_s28, 256, %s10458_s30, [#allocation4], %s8996_s0, %s8996_s0, %s8997_s21  }
0x268d   :  { %8992 = dma.done.wait [#allocation4], 256  }
0x268e   :  { %8993 = vsyncadd [#allocation4], 4294967040 }
0x268f   :  { %7447 = vsyncpa [#allocation3], 1 }
0x2690   :  { %7448 = vsyncpa [#allocation6], 1 }
0x2691   :  { %7449 = vsyncpa [#allocation9], 1 }
0x2692   :  { %7450 = vsyncpa [#allocation12], 1 }
0x2693   :  { %7451 = vsyncpa [#allocation15], 1 }
0x2694   :  { %7452 = vsyncpa [#allocation18], 1 }
0x2695   :  { %7453 = vsyncpa [#allocation21], 1 }
0x2696   :  { %7454 = vsyncpa [#allocation4], 1 }

</bundles_post_ra>
